<compile_context>
chip_gen: v6e
topology: v6e:2x2x1
jax: 0.10.0
libtpu: 0.0.40
codegen_flags: <defaults>
</compile_context>

<pallas_src>
import jax
import jax.numpy as jnp
from jax.experimental import pallas as pl
from jax.experimental.pallas import tpu as pltpu

OUT1 = 2       # conv1 output channels
OUT2 = 20      # conv2 output channels
K1 = 3         # conv1 kernel width (kernel1 = (1, 3))
MAX_TB = 1024  # samples per grid step (per-step overhead amortization)


def cnn_kernel(x_ref, w_ref, w1_ref, b1_ref, w2_ref, b2_ref, wv_ref, misc_ref,
               out_ref, h1_scr, votes_scr):
    # x_ref   : (C, rows, cols, TB)      VMEM  (batch on lanes)
    # w_ref   : (rows, TB)               VMEM
    # w1_ref  : (OUT1, C*K1)             SMEM  (conv1 weights as scalars)
    # b1_ref  : (1, OUT1)                SMEM
    # w2_ref  : (OUT2, OUT1*Wc)          VMEM  (conv2 weights, o1-major flat K)
    # b2_ref  : (OUT2, 1)                VMEM
    # wv_ref  : (OUT2, 1)                VMEM  (votes weights for h2 channels)
    # misc_ref: (1, 3)                   SMEM  [wv_w, bv, cash_bias]
    # out_ref : (rows+1, TB)             VMEM
    # h1_scr  : (OUT1*Wc, rows*TB)       VMEM scratch (rows on lanes)
    # votes_scr: (rows, TB)              VMEM scratch
    C, rows, cols, TB = x_ref.shape
    Wc = cols - 2

    # Hoist every scalar read / small weight load out of the loops.
    w1 = [[[w1_ref[o, c * K1 + k] for k in range(K1)]
           for c in range(C)] for o in range(OUT1)]
    b1 = [b1_ref[0, o] for o in range(OUT1)]
    wv_w = misc_ref[0, 0]                     # votes weight of the `w` channel
    bv = misc_ref[0, 1]                       # votes bias
    cash = misc_ref[0, 2]                     # learnable cash bias self.b
    w2c = w2_ref[...]                         # (OUT2, OUT1*Wc)
    b2 = b2_ref[...]                          # (OUT2, 1)
    wv = wv_ref[...]                          # (OUT2, 1)

    # ---- conv1 (1x3) on the VPU; normalization deferred to one multiply ----
    for r in range(rows):
        # reciprocal of channel-0's last column for this row (exact),
        # constant across cols so it commutes with the 1x3 conv.
        inv = pl.reciprocal(x_ref[0, r, cols - 1:cols, :])          # (1, TB)

        acc = [None] * OUT1
        for c in range(C):
            for k in range(K1):
                xs = x_ref[c, r, k:k + Wc, :]                       # (Wc, TB)
                for o in range(OUT1):
                    term = w1[o][c][k] * xs
                    acc[o] = term if acc[o] is None else acc[o] + term

        for o in range(OUT1):
            h1o = jnp.maximum(acc[o] * inv + b1[o], 0.0)            # (Wc, TB)
            h1_scr[o * Wc:(o + 1) * Wc, r * TB:(r + 1) * TB] = h1o

    # ---- conv2 (1 x (cols-2)): ONE MXU dot per grid step over all rows ----
    h2 = jnp.dot(w2c, h1_scr[...],
                 preferred_element_type=jnp.float32) + b2  # (OUT2, rows*TB)
    h2 = jnp.maximum(h2, 0.0)

    # ---- votes 1x1 conv (h2 part): VPU multiply + sublane reduce (XLU) ----
    votes_all = jnp.sum(h2 * wv, axis=0, keepdims=True)     # (1, rows*TB)
    for r in range(rows):
        votes_scr[r:r + 1, :] = votes_all[:, r * TB:(r + 1) * TB]

    # ---- w-channel contribution + bias, softmax with cash folded in ----
    votes = votes_scr[...] + wv_w * w_ref[...] + bv          # (rows, TB)
    m = jnp.maximum(jnp.max(votes, axis=0, keepdims=True), cash)   # (1, TB)
    e = jnp.exp(votes - m)                                   # (rows, TB)
    e_cash = jnp.exp(cash - m)                               # (1, TB)
    inv_den = pl.reciprocal(jnp.sum(e, axis=0, keepdims=True) + e_cash)
    out_ref[0:1, :] = e_cash * inv_den
    out_ref[1:, :] = e * inv_den


def _round_up(a, b):
    return -(-a // b) * b


def _choose_tiling(N, C, rows, cols):
    """Pick (TB, Npad): big lane-dense tiles, >=2 steps for moderate batches."""
    # Keep the double-buffered x block comfortably inside scoped VMEM.
    per_sample_bytes = C * rows * cols * 4
    max_tb = MAX_TB
    while max_tb > 128 and 2 * per_sample_bytes * max_tb > 8 * 1024 * 1024:
        max_tb //= 2

    if N <= 256:
        return N, N                       # one tiny block; overhead irrelevant
    if N >= 2 * max_tb:
        TB = max_tb
    else:
        # aim for >= 2 grid steps (megacore sharding on v7x), lane-friendly TB
        TB = min(max_tb, max(128, _round_up(_round_up(N, 2) // 2, 128)))
    Npad = _round_up(N, TB)
    return TB, Npad


def cnn_forward(x, w, params):
    N, C, rows, cols = x.shape
    Wc = cols - 2

    x = x.astype(jnp.float32)
    wf = w.reshape(N, rows).astype(jnp.float32)

    TB, Npad = _choose_tiling(N, C, rows, cols)
    if Npad != N:
        # pad x with ones (keeps the normalization divide finite), w with zeros
        x = jnp.concatenate(
            [x, jnp.ones((Npad - N, C, rows, cols), jnp.float32)], axis=0)
        wf = jnp.concatenate(
            [wf, jnp.zeros((Npad - N, rows), jnp.float32)], axis=0)

    # batch on the lane (last) axis
    xt = jnp.transpose(x, (1, 2, 3, 0))              # (C, rows, cols, Npad)
    wt = jnp.transpose(wf, (1, 0))                   # (rows, Npad)

    # conv2 weights flattened o1-major to match the h1 sublane stacking
    w2c = params["w2"].transpose(0, 1, 2).reshape(OUT2, OUT1 * Wc)
    w2c = w2c.astype(jnp.float32)
    wv_col = params["wv"][0, :OUT2].reshape(OUT2, 1).astype(jnp.float32)
    misc = jnp.stack([params["wv"][0, OUT2],
                      params["bv"][0, 0],
                      params["b"][0, 0]]).reshape(1, 3).astype(jnp.float32)

    flops = Npad * rows * (2 * OUT1 * C * K1 * Wc     # conv1
                           + OUT1 * Wc                # deferred normalization
                           + 2 * OUT2 * OUT1 * Wc     # conv2 (fused dot)
                           + 2 * OUT2                 # votes
                           + 8)                       # softmax-ish
    bytes_accessed = 4 * Npad * (C * rows * cols + rows + (rows + 1))
    transcendentals = Npad * (rows + 1 + rows + 2)

    out = pl.pallas_call(
        cnn_kernel,
        out_shape=jax.ShapeDtypeStruct((rows + 1, Npad), jnp.float32),
        grid=(Npad // TB,),
        in_specs=[
            pl.BlockSpec((C, rows, cols, TB), lambda n: (0, 0, 0, n)),   # x
            pl.BlockSpec((rows, TB), lambda n: (0, n)),                  # w
            pl.BlockSpec(memory_space=pltpu.MemorySpace.SMEM),           # w1
            pl.BlockSpec(memory_space=pltpu.MemorySpace.SMEM),           # b1
            pl.BlockSpec((OUT2, OUT1 * Wc), lambda n: (0, 0)),           # w2c
            pl.BlockSpec((OUT2, 1), lambda n: (0, 0)),                   # b2
            pl.BlockSpec((OUT2, 1), lambda n: (0, 0)),                   # wv
            pl.BlockSpec(memory_space=pltpu.MemorySpace.SMEM),           # misc
        ],
        out_specs=pl.BlockSpec((rows + 1, TB), lambda n: (0, n)),
        scratch_shapes=[
            pltpu.VMEM((OUT1 * Wc, rows * TB), jnp.float32),   # h1 (rows fused)
            pltpu.VMEM((rows, TB), jnp.float32),               # votes
        ],
        compiler_params=pltpu.CompilerParams(
            dimension_semantics=("parallel",),
            vmem_limit_bytes=48 * 1024 * 1024),
        cost_estimate=pl.CostEstimate(flops=flops,
                                      transcendentals=transcendentals,
                                      bytes_accessed=bytes_accessed),
    )(xt, wt, params["w1"], params["b1"], w2c, params["b2"], wv_col, misc)

    return jnp.transpose(out, (1, 0))[:N]            # (N, rows+1)


def init_params(key, in_features, cols):
    """Deterministic synthetic parameters (shapes match nn.Conv2d layers)."""
    Wc = cols - 2
    k1, k2, k3, k4, k5, k6 = jax.random.split(key, 6)
    s1 = 1.0 / (in_features * K1) ** 0.5
    s2 = 1.0 / (OUT1 * Wc) ** 0.5
    s3 = 1.0 / (OUT2 + 1) ** 0.5
    return {
        # conv1 weight (2, C, 1, 3) flattened to (2, C*3)
        "w1": jax.random.uniform(k1, (OUT1, in_features * K1), jnp.float32, -s1, s1),
        "b1": jax.random.uniform(k2, (1, OUT1), jnp.float32, -s1, s1),
        # conv2 weight (20, 2, 1, cols-2) -> (20, 2, cols-2)
        "w2": jax.random.uniform(k3, (OUT2, OUT1, Wc), jnp.float32, -s2, s2),
        "b2": jax.random.uniform(k4, (OUT2, 1), jnp.float32, -s2, s2),
        # votes weight (1, 21, 1, 1) -> (1, 21)
        "wv": jax.random.uniform(k5, (1, OUT2 + 1), jnp.float32, -s3, s3),
        "bv": jax.random.uniform(k6, (1, 1), jnp.float32, -s3, s3),
        # learnable cash bias self.b, initialized to zeros like the module
        "b": jnp.zeros((1, 1), jnp.float32),
    }


def cnn_ref(x, w, p):
    """Pure-JAX reference mirroring the PyTorch forward, for validation."""
    N, C, rows, cols = x.shape
    Wc = cols - 2
    xn = x / x[:, 0:1, :, -1:]
    w1 = p["w1"].reshape(OUT1, C, K1)
    h1 = jnp.zeros((N, OUT1, rows, Wc), jnp.float32)
    for k in range(K1):
        h1 = h1 + jnp.einsum("oc,ncrw->norw", w1[:, :, k], xn[:, :, :, k:k + Wc])
    h1 = jax.nn.relu(h1 + p["b1"].reshape(1, OUT1, 1, 1))
    h2 = jnp.einsum("ock,ncrk->nor", p["w2"], h1) + p["b2"].reshape(1, OUT2, 1)
    h2 = jax.nn.relu(h2)                                         # (N, OUT2, rows)
    feat = jnp.concatenate([h2, w.reshape(N, 1, rows)], axis=1)  # (N, 21, rows)
    votes = jnp.einsum("oc,ncr->nor", p["wv"], feat)[:, 0, :] + p["bv"][0, 0]
    logits = jnp.concatenate([jnp.broadcast_to(p["b"], (N, 1)), votes], axis=1)
    return jax.nn.softmax(logits, axis=1)


if __name__ == "__main__":
    key = jax.random.PRNGKey(0)
    kx, kw, kp = jax.random.split(key, 3)

    N, C, rows, cols = 2, 4, 8, 16            # batch, in_features, rows, cols
    x = jax.random.uniform(kx, (N, C, rows, cols), jnp.float32, 0.5, 1.5)
    w = jax.random.uniform(kw, (N, 1, rows, 1), jnp.float32, 0.0, 1.0)
    params = init_params(kp, C, cols)

    out = cnn_forward(x, w, params)
    out = jax.block_until_ready(out)

    ref = cnn_ref(x, w, params)
    assert out.shape == (N, rows + 1), out.shape
    assert jnp.allclose(out, ref, atol=1e-5, rtol=1e-5), (out, ref)
    print("KERNEL_OK")
</pallas_src>

<mosaic_0001>
module attributes {stable_mosaic.version = 11 : i64} {
  func.func @cnn_kernel(%arg0: i32, %arg1: memref<4x8x16x2xf32, #tpu.memory_space<vmem>>, %arg2: memref<8x2xf32, #tpu.memory_space<vmem>>, %arg3: memref<2x12xf32, #tpu.memory_space<smem>>, %arg4: memref<1x2xf32, #tpu.memory_space<smem>>, %arg5: memref<20x28xf32, #tpu.memory_space<vmem>>, %arg6: memref<20x1xf32, #tpu.memory_space<vmem>>, %arg7: memref<20x1xf32, #tpu.memory_space<vmem>>, %arg8: memref<1x3xf32, #tpu.memory_space<smem>>, %arg9: memref<9x2xf32, #tpu.memory_space<vmem>>, %arg10: memref<28x16xf32, #tpu.memory_space<vmem>>, %arg11: memref<8x2xf32, #tpu.memory_space<vmem>>) attributes {dimension_semantics = [#tpu.dimension_semantics<parallel>], iteration_bounds = array<i64: 1>, scalar_prefetch = 0 : i64, scratch_operands = 2 : i64, tpu.core_type = #tpu.core_type<tc>, window_params = [{transform_indices = @transform_0, window_bounds = array<i64: 4, 8, 16, 2>}, {transform_indices = @transform_1, window_bounds = array<i64: 8, 2>}, {transform_indices = @transform_2, window_bounds = array<i64: 2, 12>}, {transform_indices = @transform_3, window_bounds = array<i64: 1, 2>}, {pipeline_mode = #tpu.pipeline_mode<synchronous>, transform_indices = @transform_4, window_bounds = array<i64: 20, 28>}, {pipeline_mode = #tpu.pipeline_mode<synchronous>, transform_indices = @transform_5, window_bounds = array<i64: 20, 1>}, {pipeline_mode = #tpu.pipeline_mode<synchronous>, transform_indices = @transform_6, window_bounds = array<i64: 20, 1>}, {transform_indices = @transform_7, window_bounds = array<i64: 1, 3>}, {transform_indices = @transform_8, window_bounds = array<i64: 9, 2>}]} {
    %c0 = arith.constant 0 : index
    %c0_0 = arith.constant 0 : index
    %0 = memref.load %arg3[%c0, %c0_0] : memref<2x12xf32, #tpu.memory_space<smem>>
    %c0_1 = arith.constant 0 : index
    %c1 = arith.constant 1 : index
    %1 = memref.load %arg3[%c0_1, %c1] : memref<2x12xf32, #tpu.memory_space<smem>>
    %c0_2 = arith.constant 0 : index
    %c2 = arith.constant 2 : index
    %2 = memref.load %arg3[%c0_2, %c2] : memref<2x12xf32, #tpu.memory_space<smem>>
    %c0_3 = arith.constant 0 : index
    %c3 = arith.constant 3 : index
    %3 = memref.load %arg3[%c0_3, %c3] : memref<2x12xf32, #tpu.memory_space<smem>>
    %c0_4 = arith.constant 0 : index
    %c4 = arith.constant 4 : index
    %4 = memref.load %arg3[%c0_4, %c4] : memref<2x12xf32, #tpu.memory_space<smem>>
    %c0_5 = arith.constant 0 : index
    %c5 = arith.constant 5 : index
    %5 = memref.load %arg3[%c0_5, %c5] : memref<2x12xf32, #tpu.memory_space<smem>>
    %c0_6 = arith.constant 0 : index
    %c6 = arith.constant 6 : index
    %6 = memref.load %arg3[%c0_6, %c6] : memref<2x12xf32, #tpu.memory_space<smem>>
    %c0_7 = arith.constant 0 : index
    %c7 = arith.constant 7 : index
    %7 = memref.load %arg3[%c0_7, %c7] : memref<2x12xf32, #tpu.memory_space<smem>>
    %c0_8 = arith.constant 0 : index
    %c8 = arith.constant 8 : index
    %8 = memref.load %arg3[%c0_8, %c8] : memref<2x12xf32, #tpu.memory_space<smem>>
    %c0_9 = arith.constant 0 : index
    %c9 = arith.constant 9 : index
    %9 = memref.load %arg3[%c0_9, %c9] : memref<2x12xf32, #tpu.memory_space<smem>>
    %c0_10 = arith.constant 0 : index
    %c10 = arith.constant 10 : index
    %10 = memref.load %arg3[%c0_10, %c10] : memref<2x12xf32, #tpu.memory_space<smem>>
    %c0_11 = arith.constant 0 : index
    %c11 = arith.constant 11 : index
    %11 = memref.load %arg3[%c0_11, %c11] : memref<2x12xf32, #tpu.memory_space<smem>>
    %c1_12 = arith.constant 1 : index
    %c0_13 = arith.constant 0 : index
    %12 = memref.load %arg3[%c1_12, %c0_13] : memref<2x12xf32, #tpu.memory_space<smem>>
    %c1_14 = arith.constant 1 : index
    %c1_15 = arith.constant 1 : index
    %13 = memref.load %arg3[%c1_14, %c1_15] : memref<2x12xf32, #tpu.memory_space<smem>>
    %c1_16 = arith.constant 1 : index
    %c2_17 = arith.constant 2 : index
    %14 = memref.load %arg3[%c1_16, %c2_17] : memref<2x12xf32, #tpu.memory_space<smem>>
    %c1_18 = arith.constant 1 : index
    %c3_19 = arith.constant 3 : index
    %15 = memref.load %arg3[%c1_18, %c3_19] : memref<2x12xf32, #tpu.memory_space<smem>>
    %c1_20 = arith.constant 1 : index
    %c4_21 = arith.constant 4 : index
    %16 = memref.load %arg3[%c1_20, %c4_21] : memref<2x12xf32, #tpu.memory_space<smem>>
    %c1_22 = arith.constant 1 : index
    %c5_23 = arith.constant 5 : index
    %17 = memref.load %arg3[%c1_22, %c5_23] : memref<2x12xf32, #tpu.memory_space<smem>>
    %c1_24 = arith.constant 1 : index
    %c6_25 = arith.constant 6 : index
    %18 = memref.load %arg3[%c1_24, %c6_25] : memref<2x12xf32, #tpu.memory_space<smem>>
    %c1_26 = arith.constant 1 : index
    %c7_27 = arith.constant 7 : index
    %19 = memref.load %arg3[%c1_26, %c7_27] : memref<2x12xf32, #tpu.memory_space<smem>>
    %c1_28 = arith.constant 1 : index
    %c8_29 = arith.constant 8 : index
    %20 = memref.load %arg3[%c1_28, %c8_29] : memref<2x12xf32, #tpu.memory_space<smem>>
    %c1_30 = arith.constant 1 : index
    %c9_31 = arith.constant 9 : index
    %21 = memref.load %arg3[%c1_30, %c9_31] : memref<2x12xf32, #tpu.memory_space<smem>>
    %c1_32 = arith.constant 1 : index
    %c10_33 = arith.constant 10 : index
    %22 = memref.load %arg3[%c1_32, %c10_33] : memref<2x12xf32, #tpu.memory_space<smem>>
    %c1_34 = arith.constant 1 : index
    %c11_35 = arith.constant 11 : index
    %23 = memref.load %arg3[%c1_34, %c11_35] : memref<2x12xf32, #tpu.memory_space<smem>>
    %c0_36 = arith.constant 0 : index
    %c0_37 = arith.constant 0 : index
    %24 = memref.load %arg4[%c0_36, %c0_37] : memref<1x2xf32, #tpu.memory_space<smem>>
    %c0_38 = arith.constant 0 : index
    %c1_39 = arith.constant 1 : index
    %25 = memref.load %arg4[%c0_38, %c1_39] : memref<1x2xf32, #tpu.memory_space<smem>>
    %c0_40 = arith.constant 0 : index
    %c0_41 = arith.constant 0 : index
    %26 = memref.load %arg8[%c0_40, %c0_41] : memref<1x3xf32, #tpu.memory_space<smem>>
    %c0_42 = arith.constant 0 : index
    %c1_43 = arith.constant 1 : index
    %27 = memref.load %arg8[%c0_42, %c1_43] : memref<1x3xf32, #tpu.memory_space<smem>>
    %c0_44 = arith.constant 0 : index
    %c2_45 = arith.constant 2 : index
    %28 = memref.load %arg8[%c0_44, %c2_45] : memref<1x3xf32, #tpu.memory_space<smem>>
    %c0_46 = arith.constant 0 : index
    %c0_47 = arith.constant 0 : index
    %29 = vector.load %arg5[%c0_46, %c0_47] : memref<20x28xf32, #tpu.memory_space<vmem>>, vector<20x28xf32>
    %c0_48 = arith.constant 0 : index
    %c0_49 = arith.constant 0 : index
    %30 = vector.load %arg6[%c0_48, %c0_49] : memref<20x1xf32, #tpu.memory_space<vmem>>, vector<20x1xf32>
    %c0_50 = arith.constant 0 : index
    %c0_51 = arith.constant 0 : index
    %31 = vector.load %arg7[%c0_50, %c0_51] : memref<20x1xf32, #tpu.memory_space<vmem>>, vector<20x1xf32>
    %c0_52 = arith.constant 0 : index
    %c0_53 = arith.constant 0 : index
    %c15 = arith.constant 15 : index
    %c0_54 = arith.constant 0 : index
    %32 = vector.load %arg1[%c0_52, %c0_53, %c15, %c0_54] : memref<4x8x16x2xf32, #tpu.memory_space<vmem>>, vector<1x1x1x2xf32>
    %33 = vector.shape_cast %32 : vector<1x1x1x2xf32> to vector<1x2xf32>
    %34 = tpu.reciprocal %33 : vector<1x2xf32> -> vector<1x2xf32>
    %c0_55 = arith.constant 0 : index
    %c0_56 = arith.constant 0 : index
    %c0_57 = arith.constant 0 : index
    %c0_58 = arith.constant 0 : index
    %35 = vector.load %arg1[%c0_55, %c0_56, %c0_57, %c0_58] : memref<4x8x16x2xf32, #tpu.memory_space<vmem>>, vector<1x1x14x2xf32>
    %36 = vector.shape_cast %35 : vector<1x1x14x2xf32> to vector<14x2xf32>
    %37 = vector.broadcast %0 : f32 to vector<14x2xf32>
    %38 = arith.mulf %37, %36 : vector<14x2xf32>
    %39 = vector.broadcast %12 : f32 to vector<14x2xf32>
    %40 = arith.mulf %39, %36 : vector<14x2xf32>
    %c0_59 = arith.constant 0 : index
    %c0_60 = arith.constant 0 : index
    %c1_61 = arith.constant 1 : index
    %c0_62 = arith.constant 0 : index
    %41 = vector.load %arg1[%c0_59, %c0_60, %c1_61, %c0_62] : memref<4x8x16x2xf32, #tpu.memory_space<vmem>>, vector<1x1x14x2xf32>
    %42 = vector.shape_cast %41 : vector<1x1x14x2xf32> to vector<14x2xf32>
    %43 = vector.broadcast %1 : f32 to vector<14x2xf32>
    %44 = arith.mulf %43, %42 : vector<14x2xf32>
    %45 = arith.addf %38, %44 : vector<14x2xf32>
    %46 = vector.broadcast %13 : f32 to vector<14x2xf32>
    %47 = arith.mulf %46, %42 : vector<14x2xf32>
    %48 = arith.addf %40, %47 : vector<14x2xf32>
    %c0_63 = arith.constant 0 : index
    %c0_64 = arith.constant 0 : index
    %c2_65 = arith.constant 2 : index
    %c0_66 = arith.constant 0 : index
    %49 = vector.load %arg1[%c0_63, %c0_64, %c2_65, %c0_66] : memref<4x8x16x2xf32, #tpu.memory_space<vmem>>, vector<1x1x14x2xf32>
    %50 = vector.shape_cast %49 : vector<1x1x14x2xf32> to vector<14x2xf32>
    %51 = vector.broadcast %2 : f32 to vector<14x2xf32>
    %52 = arith.mulf %51, %50 : vector<14x2xf32>
    %53 = arith.addf %45, %52 : vector<14x2xf32>
    %54 = vector.broadcast %14 : f32 to vector<14x2xf32>
    %55 = arith.mulf %54, %50 : vector<14x2xf32>
    %56 = arith.addf %48, %55 : vector<14x2xf32>
    %c1_67 = arith.constant 1 : index
    %c0_68 = arith.constant 0 : index
    %c0_69 = arith.constant 0 : index
    %c0_70 = arith.constant 0 : index
    %57 = vector.load %arg1[%c1_67, %c0_68, %c0_69, %c0_70] : memref<4x8x16x2xf32, #tpu.memory_space<vmem>>, vector<1x1x14x2xf32>
    %58 = vector.shape_cast %57 : vector<1x1x14x2xf32> to vector<14x2xf32>
    %59 = vector.broadcast %3 : f32 to vector<14x2xf32>
    %60 = arith.mulf %59, %58 : vector<14x2xf32>
    %61 = arith.addf %53, %60 : vector<14x2xf32>
    %62 = vector.broadcast %15 : f32 to vector<14x2xf32>
    %63 = arith.mulf %62, %58 : vector<14x2xf32>
    %64 = arith.addf %56, %63 : vector<14x2xf32>
    %c1_71 = arith.constant 1 : index
    %c0_72 = arith.constant 0 : index
    %c1_73 = arith.constant 1 : index
    %c0_74 = arith.constant 0 : index
    %65 = vector.load %arg1[%c1_71, %c0_72, %c1_73, %c0_74] : memref<4x8x16x2xf32, #tpu.memory_space<vmem>>, vector<1x1x14x2xf32>
    %66 = vector.shape_cast %65 : vector<1x1x14x2xf32> to vector<14x2xf32>
    %67 = vector.broadcast %4 : f32 to vector<14x2xf32>
    %68 = arith.mulf %67, %66 : vector<14x2xf32>
    %69 = arith.addf %61, %68 : vector<14x2xf32>
    %70 = vector.broadcast %16 : f32 to vector<14x2xf32>
    %71 = arith.mulf %70, %66 : vector<14x2xf32>
    %72 = arith.addf %64, %71 : vector<14x2xf32>
    %c1_75 = arith.constant 1 : index
    %c0_76 = arith.constant 0 : index
    %c2_77 = arith.constant 2 : index
    %c0_78 = arith.constant 0 : index
    %73 = vector.load %arg1[%c1_75, %c0_76, %c2_77, %c0_78] : memref<4x8x16x2xf32, #tpu.memory_space<vmem>>, vector<1x1x14x2xf32>
    %74 = vector.shape_cast %73 : vector<1x1x14x2xf32> to vector<14x2xf32>
    %75 = vector.broadcast %5 : f32 to vector<14x2xf32>
    %76 = arith.mulf %75, %74 : vector<14x2xf32>
    %77 = arith.addf %69, %76 : vector<14x2xf32>
    %78 = vector.broadcast %17 : f32 to vector<14x2xf32>
    %79 = arith.mulf %78, %74 : vector<14x2xf32>
    %80 = arith.addf %72, %79 : vector<14x2xf32>
    %c2_79 = arith.constant 2 : index
    %c0_80 = arith.constant 0 : index
    %c0_81 = arith.constant 0 : index
    %c0_82 = arith.constant 0 : index
    %81 = vector.load %arg1[%c2_79, %c0_80, %c0_81, %c0_82] : memref<4x8x16x2xf32, #tpu.memory_space<vmem>>, vector<1x1x14x2xf32>
    %82 = vector.shape_cast %81 : vector<1x1x14x2xf32> to vector<14x2xf32>
    %83 = vector.broadcast %6 : f32 to vector<14x2xf32>
    %84 = arith.mulf %83, %82 : vector<14x2xf32>
    %85 = arith.addf %77, %84 : vector<14x2xf32>
    %86 = vector.broadcast %18 : f32 to vector<14x2xf32>
    %87 = arith.mulf %86, %82 : vector<14x2xf32>
    %88 = arith.addf %80, %87 : vector<14x2xf32>
    %c2_83 = arith.constant 2 : index
    %c0_84 = arith.constant 0 : index
    %c1_85 = arith.constant 1 : index
    %c0_86 = arith.constant 0 : index
    %89 = vector.load %arg1[%c2_83, %c0_84, %c1_85, %c0_86] : memref<4x8x16x2xf32, #tpu.memory_space<vmem>>, vector<1x1x14x2xf32>
    %90 = vector.shape_cast %89 : vector<1x1x14x2xf32> to vector<14x2xf32>
    %91 = vector.broadcast %7 : f32 to vector<14x2xf32>
    %92 = arith.mulf %91, %90 : vector<14x2xf32>
    %93 = arith.addf %85, %92 : vector<14x2xf32>
    %94 = vector.broadcast %19 : f32 to vector<14x2xf32>
    %95 = arith.mulf %94, %90 : vector<14x2xf32>
    %96 = arith.addf %88, %95 : vector<14x2xf32>
    %c2_87 = arith.constant 2 : index
    %c0_88 = arith.constant 0 : index
    %c2_89 = arith.constant 2 : index
    %c0_90 = arith.constant 0 : index
    %97 = vector.load %arg1[%c2_87, %c0_88, %c2_89, %c0_90] : memref<4x8x16x2xf32, #tpu.memory_space<vmem>>, vector<1x1x14x2xf32>
    %98 = vector.shape_cast %97 : vector<1x1x14x2xf32> to vector<14x2xf32>
    %99 = vector.broadcast %8 : f32 to vector<14x2xf32>
    %100 = arith.mulf %99, %98 : vector<14x2xf32>
    %101 = arith.addf %93, %100 : vector<14x2xf32>
    %102 = vector.broadcast %20 : f32 to vector<14x2xf32>
    %103 = arith.mulf %102, %98 : vector<14x2xf32>
    %104 = arith.addf %96, %103 : vector<14x2xf32>
    %c3_91 = arith.constant 3 : index
    %c0_92 = arith.constant 0 : index
    %c0_93 = arith.constant 0 : index
    %c0_94 = arith.constant 0 : index
    %105 = vector.load %arg1[%c3_91, %c0_92, %c0_93, %c0_94] : memref<4x8x16x2xf32, #tpu.memory_space<vmem>>, vector<1x1x14x2xf32>
    %106 = vector.shape_cast %105 : vector<1x1x14x2xf32> to vector<14x2xf32>
    %107 = vector.broadcast %9 : f32 to vector<14x2xf32>
    %108 = arith.mulf %107, %106 : vector<14x2xf32>
    %109 = arith.addf %101, %108 : vector<14x2xf32>
    %110 = vector.broadcast %21 : f32 to vector<14x2xf32>
    %111 = arith.mulf %110, %106 : vector<14x2xf32>
    %112 = arith.addf %104, %111 : vector<14x2xf32>
    %c3_95 = arith.constant 3 : index
    %c0_96 = arith.constant 0 : index
    %c1_97 = arith.constant 1 : index
    %c0_98 = arith.constant 0 : index
    %113 = vector.load %arg1[%c3_95, %c0_96, %c1_97, %c0_98] : memref<4x8x16x2xf32, #tpu.memory_space<vmem>>, vector<1x1x14x2xf32>
    %114 = vector.shape_cast %113 : vector<1x1x14x2xf32> to vector<14x2xf32>
    %115 = vector.broadcast %10 : f32 to vector<14x2xf32>
    %116 = arith.mulf %115, %114 : vector<14x2xf32>
    %117 = arith.addf %109, %116 : vector<14x2xf32>
    %118 = vector.broadcast %22 : f32 to vector<14x2xf32>
    %119 = arith.mulf %118, %114 : vector<14x2xf32>
    %120 = arith.addf %112, %119 : vector<14x2xf32>
    %c3_99 = arith.constant 3 : index
    %c0_100 = arith.constant 0 : index
    %c2_101 = arith.constant 2 : index
    %c0_102 = arith.constant 0 : index
    %121 = vector.load %arg1[%c3_99, %c0_100, %c2_101, %c0_102] : memref<4x8x16x2xf32, #tpu.memory_space<vmem>>, vector<1x1x14x2xf32>
    %122 = vector.shape_cast %121 : vector<1x1x14x2xf32> to vector<14x2xf32>
    %123 = vector.broadcast %11 : f32 to vector<14x2xf32>
    %124 = arith.mulf %123, %122 : vector<14x2xf32>
    %125 = arith.addf %117, %124 : vector<14x2xf32>
    %126 = vector.broadcast %23 : f32 to vector<14x2xf32>
    %127 = arith.mulf %126, %122 : vector<14x2xf32>
    %128 = arith.addf %120, %127 : vector<14x2xf32>
    %129 = vector.broadcast %34 : vector<1x2xf32> to vector<14x2xf32>
    %130 = arith.mulf %125, %129 : vector<14x2xf32>
    %131 = vector.broadcast %24 : f32 to vector<14x2xf32>
    %132 = arith.addf %130, %131 : vector<14x2xf32>
    %cst = arith.constant 0.000000e+00 : f32
    %133 = vector.broadcast %cst : f32 to vector<14x2xf32>
    %134 = arith.maximumf %132, %133 : vector<14x2xf32>
    %c0_103 = arith.constant 0 : index
    %c0_104 = arith.constant 0 : index
    %135 = vector.load %arg10[%c0_103, %c0_104] : memref<28x16xf32, #tpu.memory_space<vmem>>, vector<14x2xf32>
    tpu.vector_store %arg10[%c0_103, %c0_104], %134 {strides = array<i32>} : memref<28x16xf32, #tpu.memory_space<vmem>>, vector<14x2xf32>,
    %136 = vector.broadcast %34 : vector<1x2xf32> to vector<14x2xf32>
    %137 = arith.mulf %128, %136 : vector<14x2xf32>
    %138 = vector.broadcast %25 : f32 to vector<14x2xf32>
    %139 = arith.addf %137, %138 : vector<14x2xf32>
    %cst_105 = arith.constant 0.000000e+00 : f32
    %140 = vector.broadcast %cst_105 : f32 to vector<14x2xf32>
    %141 = arith.maximumf %139, %140 : vector<14x2xf32>
    %c14 = arith.constant 14 : index
    %c0_106 = arith.constant 0 : index
    %142 = vector.load %arg10[%c14, %c0_106] : memref<28x16xf32, #tpu.memory_space<vmem>>, vector<14x2xf32>
    tpu.vector_store %arg10[%c14, %c0_106], %141 {strides = array<i32>} : memref<28x16xf32, #tpu.memory_space<vmem>>, vector<14x2xf32>,
    %c0_107 = arith.constant 0 : index
    %c1_108 = arith.constant 1 : index
    %c15_109 = arith.constant 15 : index
    %c0_110 = arith.constant 0 : index
    %143 = vector.load %arg1[%c0_107, %c1_108, %c15_109, %c0_110] : memref<4x8x16x2xf32, #tpu.memory_space<vmem>>, vector<1x1x1x2xf32>
    %144 = vector.shape_cast %143 : vector<1x1x1x2xf32> to vector<1x2xf32>
    %145 = tpu.reciprocal %144 : vector<1x2xf32> -> vector<1x2xf32>
    %c0_111 = arith.constant 0 : index
    %c1_112 = arith.constant 1 : index
    %c0_113 = arith.constant 0 : index
    %c0_114 = arith.constant 0 : index
    %146 = vector.load %arg1[%c0_111, %c1_112, %c0_113, %c0_114] : memref<4x8x16x2xf32, #tpu.memory_space<vmem>>, vector<1x1x14x2xf32>
    %147 = vector.shape_cast %146 : vector<1x1x14x2xf32> to vector<14x2xf32>
    %148 = vector.broadcast %0 : f32 to vector<14x2xf32>
    %149 = arith.mulf %148, %147 : vector<14x2xf32>
    %150 = vector.broadcast %12 : f32 to vector<14x2xf32>
    %151 = arith.mulf %150, %147 : vector<14x2xf32>
    %c0_115 = arith.constant 0 : index
    %c1_116 = arith.constant 1 : index
    %c1_117 = arith.constant 1 : index
    %c0_118 = arith.constant 0 : index
    %152 = vector.load %arg1[%c0_115, %c1_116, %c1_117, %c0_118] : memref<4x8x16x2xf32, #tpu.memory_space<vmem>>, vector<1x1x14x2xf32>
    %153 = vector.shape_cast %152 : vector<1x1x14x2xf32> to vector<14x2xf32>
    %154 = vector.broadcast %1 : f32 to vector<14x2xf32>
    %155 = arith.mulf %154, %153 : vector<14x2xf32>
    %156 = arith.addf %149, %155 : vector<14x2xf32>
    %157 = vector.broadcast %13 : f32 to vector<14x2xf32>
    %158 = arith.mulf %157, %153 : vector<14x2xf32>
    %159 = arith.addf %151, %158 : vector<14x2xf32>
    %c0_119 = arith.constant 0 : index
    %c1_120 = arith.constant 1 : index
    %c2_121 = arith.constant 2 : index
    %c0_122 = arith.constant 0 : index
    %160 = vector.load %arg1[%c0_119, %c1_120, %c2_121, %c0_122] : memref<4x8x16x2xf32, #tpu.memory_space<vmem>>, vector<1x1x14x2xf32>
    %161 = vector.shape_cast %160 : vector<1x1x14x2xf32> to vector<14x2xf32>
    %162 = vector.broadcast %2 : f32 to vector<14x2xf32>
    %163 = arith.mulf %162, %161 : vector<14x2xf32>
    %164 = arith.addf %156, %163 : vector<14x2xf32>
    %165 = vector.broadcast %14 : f32 to vector<14x2xf32>
    %166 = arith.mulf %165, %161 : vector<14x2xf32>
    %167 = arith.addf %159, %166 : vector<14x2xf32>
    %c1_123 = arith.constant 1 : index
    %c1_124 = arith.constant 1 : index
    %c0_125 = arith.constant 0 : index
    %c0_126 = arith.constant 0 : index
    %168 = vector.load %arg1[%c1_123, %c1_124, %c0_125, %c0_126] : memref<4x8x16x2xf32, #tpu.memory_space<vmem>>, vector<1x1x14x2xf32>
    %169 = vector.shape_cast %168 : vector<1x1x14x2xf32> to vector<14x2xf32>
    %170 = vector.broadcast %3 : f32 to vector<14x2xf32>
    %171 = arith.mulf %170, %169 : vector<14x2xf32>
    %172 = arith.addf %164, %171 : vector<14x2xf32>
    %173 = vector.broadcast %15 : f32 to vector<14x2xf32>
    %174 = arith.mulf %173, %169 : vector<14x2xf32>
    %175 = arith.addf %167, %174 : vector<14x2xf32>
    %c1_127 = arith.constant 1 : index
    %c1_128 = arith.constant 1 : index
    %c1_129 = arith.constant 1 : index
    %c0_130 = arith.constant 0 : index
    %176 = vector.load %arg1[%c1_127, %c1_128, %c1_129, %c0_130] : memref<4x8x16x2xf32, #tpu.memory_space<vmem>>, vector<1x1x14x2xf32>
    %177 = vector.shape_cast %176 : vector<1x1x14x2xf32> to vector<14x2xf32>
    %178 = vector.broadcast %4 : f32 to vector<14x2xf32>
    %179 = arith.mulf %178, %177 : vector<14x2xf32>
    %180 = arith.addf %172, %179 : vector<14x2xf32>
    %181 = vector.broadcast %16 : f32 to vector<14x2xf32>
    %182 = arith.mulf %181, %177 : vector<14x2xf32>
    %183 = arith.addf %175, %182 : vector<14x2xf32>
    %c1_131 = arith.constant 1 : index
    %c1_132 = arith.constant 1 : index
    %c2_133 = arith.constant 2 : index
    %c0_134 = arith.constant 0 : index
    %184 = vector.load %arg1[%c1_131, %c1_132, %c2_133, %c0_134] : memref<4x8x16x2xf32, #tpu.memory_space<vmem>>, vector<1x1x14x2xf32>
    %185 = vector.shape_cast %184 : vector<1x1x14x2xf32> to vector<14x2xf32>
    %186 = vector.broadcast %5 : f32 to vector<14x2xf32>
    %187 = arith.mulf %186, %185 : vector<14x2xf32>
    %188 = arith.addf %180, %187 : vector<14x2xf32>
    %189 = vector.broadcast %17 : f32 to vector<14x2xf32>
    %190 = arith.mulf %189, %185 : vector<14x2xf32>
    %191 = arith.addf %183, %190 : vector<14x2xf32>
    %c2_135 = arith.constant 2 : index
    %c1_136 = arith.constant 1 : index
    %c0_137 = arith.constant 0 : index
    %c0_138 = arith.constant 0 : index
    %192 = vector.load %arg1[%c2_135, %c1_136, %c0_137, %c0_138] : memref<4x8x16x2xf32, #tpu.memory_space<vmem>>, vector<1x1x14x2xf32>
    %193 = vector.shape_cast %192 : vector<1x1x14x2xf32> to vector<14x2xf32>
    %194 = vector.broadcast %6 : f32 to vector<14x2xf32>
    %195 = arith.mulf %194, %193 : vector<14x2xf32>
    %196 = arith.addf %188, %195 : vector<14x2xf32>
    %197 = vector.broadcast %18 : f32 to vector<14x2xf32>
    %198 = arith.mulf %197, %193 : vector<14x2xf32>
    %199 = arith.addf %191, %198 : vector<14x2xf32>
    %c2_139 = arith.constant 2 : index
    %c1_140 = arith.constant 1 : index
    %c1_141 = arith.constant 1 : index
    %c0_142 = arith.constant 0 : index
    %200 = vector.load %arg1[%c2_139, %c1_140, %c1_141, %c0_142] : memref<4x8x16x2xf32, #tpu.memory_space<vmem>>, vector<1x1x14x2xf32>
    %201 = vector.shape_cast %200 : vector<1x1x14x2xf32> to vector<14x2xf32>
    %202 = vector.broadcast %7 : f32 to vector<14x2xf32>
    %203 = arith.mulf %202, %201 : vector<14x2xf32>
    %204 = arith.addf %196, %203 : vector<14x2xf32>
    %205 = vector.broadcast %19 : f32 to vector<14x2xf32>
    %206 = arith.mulf %205, %201 : vector<14x2xf32>
    %207 = arith.addf %199, %206 : vector<14x2xf32>
    %c2_143 = arith.constant 2 : index
    %c1_144 = arith.constant 1 : index
    %c2_145 = arith.constant 2 : index
    %c0_146 = arith.constant 0 : index
    %208 = vector.load %arg1[%c2_143, %c1_144, %c2_145, %c0_146] : memref<4x8x16x2xf32, #tpu.memory_space<vmem>>, vector<1x1x14x2xf32>
    %209 = vector.shape_cast %208 : vector<1x1x14x2xf32> to vector<14x2xf32>
    %210 = vector.broadcast %8 : f32 to vector<14x2xf32>
    %211 = arith.mulf %210, %209 : vector<14x2xf32>
    %212 = arith.addf %204, %211 : vector<14x2xf32>
    %213 = vector.broadcast %20 : f32 to vector<14x2xf32>
    %214 = arith.mulf %213, %209 : vector<14x2xf32>
    %215 = arith.addf %207, %214 : vector<14x2xf32>
    %c3_147 = arith.constant 3 : index
    %c1_148 = arith.constant 1 : index
    %c0_149 = arith.constant 0 : index
    %c0_150 = arith.constant 0 : index
    %216 = vector.load %arg1[%c3_147, %c1_148, %c0_149, %c0_150] : memref<4x8x16x2xf32, #tpu.memory_space<vmem>>, vector<1x1x14x2xf32>
    %217 = vector.shape_cast %216 : vector<1x1x14x2xf32> to vector<14x2xf32>
    %218 = vector.broadcast %9 : f32 to vector<14x2xf32>
    %219 = arith.mulf %218, %217 : vector<14x2xf32>
    %220 = arith.addf %212, %219 : vector<14x2xf32>
    %221 = vector.broadcast %21 : f32 to vector<14x2xf32>
    %222 = arith.mulf %221, %217 : vector<14x2xf32>
    %223 = arith.addf %215, %222 : vector<14x2xf32>
    %c3_151 = arith.constant 3 : index
    %c1_152 = arith.constant 1 : index
    %c1_153 = arith.constant 1 : index
    %c0_154 = arith.constant 0 : index
    %224 = vector.load %arg1[%c3_151, %c1_152, %c1_153, %c0_154] : memref<4x8x16x2xf32, #tpu.memory_space<vmem>>, vector<1x1x14x2xf32>
    %225 = vector.shape_cast %224 : vector<1x1x14x2xf32> to vector<14x2xf32>
    %226 = vector.broadcast %10 : f32 to vector<14x2xf32>
    %227 = arith.mulf %226, %225 : vector<14x2xf32>
    %228 = arith.addf %220, %227 : vector<14x2xf32>
    %229 = vector.broadcast %22 : f32 to vector<14x2xf32>
    %230 = arith.mulf %229, %225 : vector<14x2xf32>
    %231 = arith.addf %223, %230 : vector<14x2xf32>
    %c3_155 = arith.constant 3 : index
    %c1_156 = arith.constant 1 : index
    %c2_157 = arith.constant 2 : index
    %c0_158 = arith.constant 0 : index
    %232 = vector.load %arg1[%c3_155, %c1_156, %c2_157, %c0_158] : memref<4x8x16x2xf32, #tpu.memory_space<vmem>>, vector<1x1x14x2xf32>
    %233 = vector.shape_cast %232 : vector<1x1x14x2xf32> to vector<14x2xf32>
    %234 = vector.broadcast %11 : f32 to vector<14x2xf32>
    %235 = arith.mulf %234, %233 : vector<14x2xf32>
    %236 = arith.addf %228, %235 : vector<14x2xf32>
    %237 = vector.broadcast %23 : f32 to vector<14x2xf32>
    %238 = arith.mulf %237, %233 : vector<14x2xf32>
    %239 = arith.addf %231, %238 : vector<14x2xf32>
    %240 = vector.broadcast %145 : vector<1x2xf32> to vector<14x2xf32>
    %241 = arith.mulf %236, %240 : vector<14x2xf32>
    %242 = vector.broadcast %24 : f32 to vector<14x2xf32>
    %243 = arith.addf %241, %242 : vector<14x2xf32>
    %cst_159 = arith.constant 0.000000e+00 : f32
    %244 = vector.broadcast %cst_159 : f32 to vector<14x2xf32>
    %245 = arith.maximumf %243, %244 : vector<14x2xf32>
    %c0_160 = arith.constant 0 : index
    %c2_161 = arith.constant 2 : index
    %246 = vector.load %arg10[%c0_160, %c2_161] : memref<28x16xf32, #tpu.memory_space<vmem>>, vector<14x2xf32>
    tpu.vector_store %arg10[%c0_160, %c2_161], %245 {strides = array<i32>} : memref<28x16xf32, #tpu.memory_space<vmem>>, vector<14x2xf32>,
    %247 = vector.broadcast %145 : vector<1x2xf32> to vector<14x2xf32>
    %248 = arith.mulf %239, %247 : vector<14x2xf32>
    %249 = vector.broadcast %25 : f32 to vector<14x2xf32>
    %250 = arith.addf %248, %249 : vector<14x2xf32>
    %cst_162 = arith.constant 0.000000e+00 : f32
    %251 = vector.broadcast %cst_162 : f32 to vector<14x2xf32>
    %252 = arith.maximumf %250, %251 : vector<14x2xf32>
    %c14_163 = arith.constant 14 : index
    %c2_164 = arith.constant 2 : index
    %253 = vector.load %arg10[%c14_163, %c2_164] : memref<28x16xf32, #tpu.memory_space<vmem>>, vector<14x2xf32>
    tpu.vector_store %arg10[%c14_163, %c2_164], %252 {strides = array<i32>} : memref<28x16xf32, #tpu.memory_space<vmem>>, vector<14x2xf32>,
    %c0_165 = arith.constant 0 : index
    %c2_166 = arith.constant 2 : index
    %c15_167 = arith.constant 15 : index
    %c0_168 = arith.constant 0 : index
    %254 = vector.load %arg1[%c0_165, %c2_166, %c15_167, %c0_168] : memref<4x8x16x2xf32, #tpu.memory_space<vmem>>, vector<1x1x1x2xf32>
    %255 = vector.shape_cast %254 : vector<1x1x1x2xf32> to vector<1x2xf32>
    %256 = tpu.reciprocal %255 : vector<1x2xf32> -> vector<1x2xf32>
    %c0_169 = arith.constant 0 : index
    %c2_170 = arith.constant 2 : index
    %c0_171 = arith.constant 0 : index
    %c0_172 = arith.constant 0 : index
    %257 = vector.load %arg1[%c0_169, %c2_170, %c0_171, %c0_172] : memref<4x8x16x2xf32, #tpu.memory_space<vmem>>, vector<1x1x14x2xf32>
    %258 = vector.shape_cast %257 : vector<1x1x14x2xf32> to vector<14x2xf32>
    %259 = vector.broadcast %0 : f32 to vector<14x2xf32>
    %260 = arith.mulf %259, %258 : vector<14x2xf32>
    %261 = vector.broadcast %12 : f32 to vector<14x2xf32>
    %262 = arith.mulf %261, %258 : vector<14x2xf32>
    %c0_173 = arith.constant 0 : index
    %c2_174 = arith.constant 2 : index
    %c1_175 = arith.constant 1 : index
    %c0_176 = arith.constant 0 : index
    %263 = vector.load %arg1[%c0_173, %c2_174, %c1_175, %c0_176] : memref<4x8x16x2xf32, #tpu.memory_space<vmem>>, vector<1x1x14x2xf32>
    %264 = vector.shape_cast %263 : vector<1x1x14x2xf32> to vector<14x2xf32>
    %265 = vector.broadcast %1 : f32 to vector<14x2xf32>
    %266 = arith.mulf %265, %264 : vector<14x2xf32>
    %267 = arith.addf %260, %266 : vector<14x2xf32>
    %268 = vector.broadcast %13 : f32 to vector<14x2xf32>
    %269 = arith.mulf %268, %264 : vector<14x2xf32>
    %270 = arith.addf %262, %269 : vector<14x2xf32>
    %c0_177 = arith.constant 0 : index
    %c2_178 = arith.constant 2 : index
    %c2_179 = arith.constant 2 : index
    %c0_180 = arith.constant 0 : index
    %271 = vector.load %arg1[%c0_177, %c2_178, %c2_179, %c0_180] : memref<4x8x16x2xf32, #tpu.memory_space<vmem>>, vector<1x1x14x2xf32>
    %272 = vector.shape_cast %271 : vector<1x1x14x2xf32> to vector<14x2xf32>
    %273 = vector.broadcast %2 : f32 to vector<14x2xf32>
    %274 = arith.mulf %273, %272 : vector<14x2xf32>
    %275 = arith.addf %267, %274 : vector<14x2xf32>
    %276 = vector.broadcast %14 : f32 to vector<14x2xf32>
    %277 = arith.mulf %276, %272 : vector<14x2xf32>
    %278 = arith.addf %270, %277 : vector<14x2xf32>
    %c1_181 = arith.constant 1 : index
    %c2_182 = arith.constant 2 : index
    %c0_183 = arith.constant 0 : index
    %c0_184 = arith.constant 0 : index
    %279 = vector.load %arg1[%c1_181, %c2_182, %c0_183, %c0_184] : memref<4x8x16x2xf32, #tpu.memory_space<vmem>>, vector<1x1x14x2xf32>
    %280 = vector.shape_cast %279 : vector<1x1x14x2xf32> to vector<14x2xf32>
    %281 = vector.broadcast %3 : f32 to vector<14x2xf32>
    %282 = arith.mulf %281, %280 : vector<14x2xf32>
    %283 = arith.addf %275, %282 : vector<14x2xf32>
    %284 = vector.broadcast %15 : f32 to vector<14x2xf32>
    %285 = arith.mulf %284, %280 : vector<14x2xf32>
    %286 = arith.addf %278, %285 : vector<14x2xf32>
    %c1_185 = arith.constant 1 : index
    %c2_186 = arith.constant 2 : index
    %c1_187 = arith.constant 1 : index
    %c0_188 = arith.constant 0 : index
    %287 = vector.load %arg1[%c1_185, %c2_186, %c1_187, %c0_188] : memref<4x8x16x2xf32, #tpu.memory_space<vmem>>, vector<1x1x14x2xf32>
    %288 = vector.shape_cast %287 : vector<1x1x14x2xf32> to vector<14x2xf32>
    %289 = vector.broadcast %4 : f32 to vector<14x2xf32>
    %290 = arith.mulf %289, %288 : vector<14x2xf32>
    %291 = arith.addf %283, %290 : vector<14x2xf32>
    %292 = vector.broadcast %16 : f32 to vector<14x2xf32>
    %293 = arith.mulf %292, %288 : vector<14x2xf32>
    %294 = arith.addf %286, %293 : vector<14x2xf32>
    %c1_189 = arith.constant 1 : index
    %c2_190 = arith.constant 2 : index
    %c2_191 = arith.constant 2 : index
    %c0_192 = arith.constant 0 : index
    %295 = vector.load %arg1[%c1_189, %c2_190, %c2_191, %c0_192] : memref<4x8x16x2xf32, #tpu.memory_space<vmem>>, vector<1x1x14x2xf32>
    %296 = vector.shape_cast %295 : vector<1x1x14x2xf32> to vector<14x2xf32>
    %297 = vector.broadcast %5 : f32 to vector<14x2xf32>
    %298 = arith.mulf %297, %296 : vector<14x2xf32>
    %299 = arith.addf %291, %298 : vector<14x2xf32>
    %300 = vector.broadcast %17 : f32 to vector<14x2xf32>
    %301 = arith.mulf %300, %296 : vector<14x2xf32>
    %302 = arith.addf %294, %301 : vector<14x2xf32>
    %c2_193 = arith.constant 2 : index
    %c2_194 = arith.constant 2 : index
    %c0_195 = arith.constant 0 : index
    %c0_196 = arith.constant 0 : index
    %303 = vector.load %arg1[%c2_193, %c2_194, %c0_195, %c0_196] : memref<4x8x16x2xf32, #tpu.memory_space<vmem>>, vector<1x1x14x2xf32>
    %304 = vector.shape_cast %303 : vector<1x1x14x2xf32> to vector<14x2xf32>
    %305 = vector.broadcast %6 : f32 to vector<14x2xf32>
    %306 = arith.mulf %305, %304 : vector<14x2xf32>
    %307 = arith.addf %299, %306 : vector<14x2xf32>
    %308 = vector.broadcast %18 : f32 to vector<14x2xf32>
    %309 = arith.mulf %308, %304 : vector<14x2xf32>
    %310 = arith.addf %302, %309 : vector<14x2xf32>
    %c2_197 = arith.constant 2 : index
    %c2_198 = arith.constant 2 : index
    %c1_199 = arith.constant 1 : index
    %c0_200 = arith.constant 0 : index
    %311 = vector.load %arg1[%c2_197, %c2_198, %c1_199, %c0_200] : memref<4x8x16x2xf32, #tpu.memory_space<vmem>>, vector<1x1x14x2xf32>
    %312 = vector.shape_cast %311 : vector<1x1x14x2xf32> to vector<14x2xf32>
    %313 = vector.broadcast %7 : f32 to vector<14x2xf32>
    %314 = arith.mulf %313, %312 : vector<14x2xf32>
    %315 = arith.addf %307, %314 : vector<14x2xf32>
    %316 = vector.broadcast %19 : f32 to vector<14x2xf32>
    %317 = arith.mulf %316, %312 : vector<14x2xf32>
    %318 = arith.addf %310, %317 : vector<14x2xf32>
    %c2_201 = arith.constant 2 : index
    %c2_202 = arith.constant 2 : index
    %c2_203 = arith.constant 2 : index
    %c0_204 = arith.constant 0 : index
    %319 = vector.load %arg1[%c2_201, %c2_202, %c2_203, %c0_204] : memref<4x8x16x2xf32, #tpu.memory_space<vmem>>, vector<1x1x14x2xf32>
    %320 = vector.shape_cast %319 : vector<1x1x14x2xf32> to vector<14x2xf32>
    %321 = vector.broadcast %8 : f32 to vector<14x2xf32>
    %322 = arith.mulf %321, %320 : vector<14x2xf32>
    %323 = arith.addf %315, %322 : vector<14x2xf32>
    %324 = vector.broadcast %20 : f32 to vector<14x2xf32>
    %325 = arith.mulf %324, %320 : vector<14x2xf32>
    %326 = arith.addf %318, %325 : vector<14x2xf32>
    %c3_205 = arith.constant 3 : index
    %c2_206 = arith.constant 2 : index
    %c0_207 = arith.constant 0 : index
    %c0_208 = arith.constant 0 : index
    %327 = vector.load %arg1[%c3_205, %c2_206, %c0_207, %c0_208] : memref<4x8x16x2xf32, #tpu.memory_space<vmem>>, vector<1x1x14x2xf32>
    %328 = vector.shape_cast %327 : vector<1x1x14x2xf32> to vector<14x2xf32>
    %329 = vector.broadcast %9 : f32 to vector<14x2xf32>
    %330 = arith.mulf %329, %328 : vector<14x2xf32>
    %331 = arith.addf %323, %330 : vector<14x2xf32>
    %332 = vector.broadcast %21 : f32 to vector<14x2xf32>
    %333 = arith.mulf %332, %328 : vector<14x2xf32>
    %334 = arith.addf %326, %333 : vector<14x2xf32>
    %c3_209 = arith.constant 3 : index
    %c2_210 = arith.constant 2 : index
    %c1_211 = arith.constant 1 : index
    %c0_212 = arith.constant 0 : index
    %335 = vector.load %arg1[%c3_209, %c2_210, %c1_211, %c0_212] : memref<4x8x16x2xf32, #tpu.memory_space<vmem>>, vector<1x1x14x2xf32>
    %336 = vector.shape_cast %335 : vector<1x1x14x2xf32> to vector<14x2xf32>
    %337 = vector.broadcast %10 : f32 to vector<14x2xf32>
    %338 = arith.mulf %337, %336 : vector<14x2xf32>
    %339 = arith.addf %331, %338 : vector<14x2xf32>
    %340 = vector.broadcast %22 : f32 to vector<14x2xf32>
    %341 = arith.mulf %340, %336 : vector<14x2xf32>
    %342 = arith.addf %334, %341 : vector<14x2xf32>
    %c3_213 = arith.constant 3 : index
    %c2_214 = arith.constant 2 : index
    %c2_215 = arith.constant 2 : index
    %c0_216 = arith.constant 0 : index
    %343 = vector.load %arg1[%c3_213, %c2_214, %c2_215, %c0_216] : memref<4x8x16x2xf32, #tpu.memory_space<vmem>>, vector<1x1x14x2xf32>
    %344 = vector.shape_cast %343 : vector<1x1x14x2xf32> to vector<14x2xf32>
    %345 = vector.broadcast %11 : f32 to vector<14x2xf32>
    %346 = arith.mulf %345, %344 : vector<14x2xf32>
    %347 = arith.addf %339, %346 : vector<14x2xf32>
    %348 = vector.broadcast %23 : f32 to vector<14x2xf32>
    %349 = arith.mulf %348, %344 : vector<14x2xf32>
    %350 = arith.addf %342, %349 : vector<14x2xf32>
    %351 = vector.broadcast %256 : vector<1x2xf32> to vector<14x2xf32>
    %352 = arith.mulf %347, %351 : vector<14x2xf32>
    %353 = vector.broadcast %24 : f32 to vector<14x2xf32>
    %354 = arith.addf %352, %353 : vector<14x2xf32>
    %cst_217 = arith.constant 0.000000e+00 : f32
    %355 = vector.broadcast %cst_217 : f32 to vector<14x2xf32>
    %356 = arith.maximumf %354, %355 : vector<14x2xf32>
    %c0_218 = arith.constant 0 : index
    %c4_219 = arith.constant 4 : index
    %357 = vector.load %arg10[%c0_218, %c4_219] : memref<28x16xf32, #tpu.memory_space<vmem>>, vector<14x2xf32>
    tpu.vector_store %arg10[%c0_218, %c4_219], %356 {strides = array<i32>} : memref<28x16xf32, #tpu.memory_space<vmem>>, vector<14x2xf32>,
    %358 = vector.broadcast %256 : vector<1x2xf32> to vector<14x2xf32>
    %359 = arith.mulf %350, %358 : vector<14x2xf32>
    %360 = vector.broadcast %25 : f32 to vector<14x2xf32>
    %361 = arith.addf %359, %360 : vector<14x2xf32>
    %cst_220 = arith.constant 0.000000e+00 : f32
    %362 = vector.broadcast %cst_220 : f32 to vector<14x2xf32>
    %363 = arith.maximumf %361, %362 : vector<14x2xf32>
    %c14_221 = arith.constant 14 : index
    %c4_222 = arith.constant 4 : index
    %364 = vector.load %arg10[%c14_221, %c4_222] : memref<28x16xf32, #tpu.memory_space<vmem>>, vector<14x2xf32>
    tpu.vector_store %arg10[%c14_221, %c4_222], %363 {strides = array<i32>} : memref<28x16xf32, #tpu.memory_space<vmem>>, vector<14x2xf32>,
    %c0_223 = arith.constant 0 : index
    %c3_224 = arith.constant 3 : index
    %c15_225 = arith.constant 15 : index
    %c0_226 = arith.constant 0 : index
    %365 = vector.load %arg1[%c0_223, %c3_224, %c15_225, %c0_226] : memref<4x8x16x2xf32, #tpu.memory_space<vmem>>, vector<1x1x1x2xf32>
    %366 = vector.shape_cast %365 : vector<1x1x1x2xf32> to vector<1x2xf32>
    %367 = tpu.reciprocal %366 : vector<1x2xf32> -> vector<1x2xf32>
    %c0_227 = arith.constant 0 : index
    %c3_228 = arith.constant 3 : index
    %c0_229 = arith.constant 0 : index
    %c0_230 = arith.constant 0 : index
    %368 = vector.load %arg1[%c0_227, %c3_228, %c0_229, %c0_230] : memref<4x8x16x2xf32, #tpu.memory_space<vmem>>, vector<1x1x14x2xf32>
    %369 = vector.shape_cast %368 : vector<1x1x14x2xf32> to vector<14x2xf32>
    %370 = vector.broadcast %0 : f32 to vector<14x2xf32>
    %371 = arith.mulf %370, %369 : vector<14x2xf32>
    %372 = vector.broadcast %12 : f32 to vector<14x2xf32>
    %373 = arith.mulf %372, %369 : vector<14x2xf32>
    %c0_231 = arith.constant 0 : index
    %c3_232 = arith.constant 3 : index
    %c1_233 = arith.constant 1 : index
    %c0_234 = arith.constant 0 : index
    %374 = vector.load %arg1[%c0_231, %c3_232, %c1_233, %c0_234] : memref<4x8x16x2xf32, #tpu.memory_space<vmem>>, vector<1x1x14x2xf32>
    %375 = vector.shape_cast %374 : vector<1x1x14x2xf32> to vector<14x2xf32>
    %376 = vector.broadcast %1 : f32 to vector<14x2xf32>
    %377 = arith.mulf %376, %375 : vector<14x2xf32>
    %378 = arith.addf %371, %377 : vector<14x2xf32>
    %379 = vector.broadcast %13 : f32 to vector<14x2xf32>
    %380 = arith.mulf %379, %375 : vector<14x2xf32>
    %381 = arith.addf %373, %380 : vector<14x2xf32>
    %c0_235 = arith.constant 0 : index
    %c3_236 = arith.constant 3 : index
    %c2_237 = arith.constant 2 : index
    %c0_238 = arith.constant 0 : index
    %382 = vector.load %arg1[%c0_235, %c3_236, %c2_237, %c0_238] : memref<4x8x16x2xf32, #tpu.memory_space<vmem>>, vector<1x1x14x2xf32>
    %383 = vector.shape_cast %382 : vector<1x1x14x2xf32> to vector<14x2xf32>
    %384 = vector.broadcast %2 : f32 to vector<14x2xf32>
    %385 = arith.mulf %384, %383 : vector<14x2xf32>
    %386 = arith.addf %378, %385 : vector<14x2xf32>
    %387 = vector.broadcast %14 : f32 to vector<14x2xf32>
    %388 = arith.mulf %387, %383 : vector<14x2xf32>
    %389 = arith.addf %381, %388 : vector<14x2xf32>
    %c1_239 = arith.constant 1 : index
    %c3_240 = arith.constant 3 : index
    %c0_241 = arith.constant 0 : index
    %c0_242 = arith.constant 0 : index
    %390 = vector.load %arg1[%c1_239, %c3_240, %c0_241, %c0_242] : memref<4x8x16x2xf32, #tpu.memory_space<vmem>>, vector<1x1x14x2xf32>
    %391 = vector.shape_cast %390 : vector<1x1x14x2xf32> to vector<14x2xf32>
    %392 = vector.broadcast %3 : f32 to vector<14x2xf32>
    %393 = arith.mulf %392, %391 : vector<14x2xf32>
    %394 = arith.addf %386, %393 : vector<14x2xf32>
    %395 = vector.broadcast %15 : f32 to vector<14x2xf32>
    %396 = arith.mulf %395, %391 : vector<14x2xf32>
    %397 = arith.addf %389, %396 : vector<14x2xf32>
    %c1_243 = arith.constant 1 : index
    %c3_244 = arith.constant 3 : index
    %c1_245 = arith.constant 1 : index
    %c0_246 = arith.constant 0 : index
    %398 = vector.load %arg1[%c1_243, %c3_244, %c1_245, %c0_246] : memref<4x8x16x2xf32, #tpu.memory_space<vmem>>, vector<1x1x14x2xf32>
    %399 = vector.shape_cast %398 : vector<1x1x14x2xf32> to vector<14x2xf32>
    %400 = vector.broadcast %4 : f32 to vector<14x2xf32>
    %401 = arith.mulf %400, %399 : vector<14x2xf32>
    %402 = arith.addf %394, %401 : vector<14x2xf32>
    %403 = vector.broadcast %16 : f32 to vector<14x2xf32>
    %404 = arith.mulf %403, %399 : vector<14x2xf32>
    %405 = arith.addf %397, %404 : vector<14x2xf32>
    %c1_247 = arith.constant 1 : index
    %c3_248 = arith.constant 3 : index
    %c2_249 = arith.constant 2 : index
    %c0_250 = arith.constant 0 : index
    %406 = vector.load %arg1[%c1_247, %c3_248, %c2_249, %c0_250] : memref<4x8x16x2xf32, #tpu.memory_space<vmem>>, vector<1x1x14x2xf32>
    %407 = vector.shape_cast %406 : vector<1x1x14x2xf32> to vector<14x2xf32>
    %408 = vector.broadcast %5 : f32 to vector<14x2xf32>
    %409 = arith.mulf %408, %407 : vector<14x2xf32>
    %410 = arith.addf %402, %409 : vector<14x2xf32>
    %411 = vector.broadcast %17 : f32 to vector<14x2xf32>
    %412 = arith.mulf %411, %407 : vector<14x2xf32>
    %413 = arith.addf %405, %412 : vector<14x2xf32>
    %c2_251 = arith.constant 2 : index
    %c3_252 = arith.constant 3 : index
    %c0_253 = arith.constant 0 : index
    %c0_254 = arith.constant 0 : index
    %414 = vector.load %arg1[%c2_251, %c3_252, %c0_253, %c0_254] : memref<4x8x16x2xf32, #tpu.memory_space<vmem>>, vector<1x1x14x2xf32>
    %415 = vector.shape_cast %414 : vector<1x1x14x2xf32> to vector<14x2xf32>
    %416 = vector.broadcast %6 : f32 to vector<14x2xf32>
    %417 = arith.mulf %416, %415 : vector<14x2xf32>
    %418 = arith.addf %410, %417 : vector<14x2xf32>
    %419 = vector.broadcast %18 : f32 to vector<14x2xf32>
    %420 = arith.mulf %419, %415 : vector<14x2xf32>
    %421 = arith.addf %413, %420 : vector<14x2xf32>
    %c2_255 = arith.constant 2 : index
    %c3_256 = arith.constant 3 : index
    %c1_257 = arith.constant 1 : index
    %c0_258 = arith.constant 0 : index
    %422 = vector.load %arg1[%c2_255, %c3_256, %c1_257, %c0_258] : memref<4x8x16x2xf32, #tpu.memory_space<vmem>>, vector<1x1x14x2xf32>
    %423 = vector.shape_cast %422 : vector<1x1x14x2xf32> to vector<14x2xf32>
    %424 = vector.broadcast %7 : f32 to vector<14x2xf32>
    %425 = arith.mulf %424, %423 : vector<14x2xf32>
    %426 = arith.addf %418, %425 : vector<14x2xf32>
    %427 = vector.broadcast %19 : f32 to vector<14x2xf32>
    %428 = arith.mulf %427, %423 : vector<14x2xf32>
    %429 = arith.addf %421, %428 : vector<14x2xf32>
    %c2_259 = arith.constant 2 : index
    %c3_260 = arith.constant 3 : index
    %c2_261 = arith.constant 2 : index
    %c0_262 = arith.constant 0 : index
    %430 = vector.load %arg1[%c2_259, %c3_260, %c2_261, %c0_262] : memref<4x8x16x2xf32, #tpu.memory_space<vmem>>, vector<1x1x14x2xf32>
    %431 = vector.shape_cast %430 : vector<1x1x14x2xf32> to vector<14x2xf32>
    %432 = vector.broadcast %8 : f32 to vector<14x2xf32>
    %433 = arith.mulf %432, %431 : vector<14x2xf32>
    %434 = arith.addf %426, %433 : vector<14x2xf32>
    %435 = vector.broadcast %20 : f32 to vector<14x2xf32>
    %436 = arith.mulf %435, %431 : vector<14x2xf32>
    %437 = arith.addf %429, %436 : vector<14x2xf32>
    %c3_263 = arith.constant 3 : index
    %c3_264 = arith.constant 3 : index
    %c0_265 = arith.constant 0 : index
    %c0_266 = arith.constant 0 : index
    %438 = vector.load %arg1[%c3_263, %c3_264, %c0_265, %c0_266] : memref<4x8x16x2xf32, #tpu.memory_space<vmem>>, vector<1x1x14x2xf32>
    %439 = vector.shape_cast %438 : vector<1x1x14x2xf32> to vector<14x2xf32>
    %440 = vector.broadcast %9 : f32 to vector<14x2xf32>
    %441 = arith.mulf %440, %439 : vector<14x2xf32>
    %442 = arith.addf %434, %441 : vector<14x2xf32>
    %443 = vector.broadcast %21 : f32 to vector<14x2xf32>
    %444 = arith.mulf %443, %439 : vector<14x2xf32>
    %445 = arith.addf %437, %444 : vector<14x2xf32>
    %c3_267 = arith.constant 3 : index
    %c3_268 = arith.constant 3 : index
    %c1_269 = arith.constant 1 : index
    %c0_270 = arith.constant 0 : index
    %446 = vector.load %arg1[%c3_267, %c3_268, %c1_269, %c0_270] : memref<4x8x16x2xf32, #tpu.memory_space<vmem>>, vector<1x1x14x2xf32>
    %447 = vector.shape_cast %446 : vector<1x1x14x2xf32> to vector<14x2xf32>
    %448 = vector.broadcast %10 : f32 to vector<14x2xf32>
    %449 = arith.mulf %448, %447 : vector<14x2xf32>
    %450 = arith.addf %442, %449 : vector<14x2xf32>
    %451 = vector.broadcast %22 : f32 to vector<14x2xf32>
    %452 = arith.mulf %451, %447 : vector<14x2xf32>
    %453 = arith.addf %445, %452 : vector<14x2xf32>
    %c3_271 = arith.constant 3 : index
    %c3_272 = arith.constant 3 : index
    %c2_273 = arith.constant 2 : index
    %c0_274 = arith.constant 0 : index
    %454 = vector.load %arg1[%c3_271, %c3_272, %c2_273, %c0_274] : memref<4x8x16x2xf32, #tpu.memory_space<vmem>>, vector<1x1x14x2xf32>
    %455 = vector.shape_cast %454 : vector<1x1x14x2xf32> to vector<14x2xf32>
    %456 = vector.broadcast %11 : f32 to vector<14x2xf32>
    %457 = arith.mulf %456, %455 : vector<14x2xf32>
    %458 = arith.addf %450, %457 : vector<14x2xf32>
    %459 = vector.broadcast %23 : f32 to vector<14x2xf32>
    %460 = arith.mulf %459, %455 : vector<14x2xf32>
    %461 = arith.addf %453, %460 : vector<14x2xf32>
    %462 = vector.broadcast %367 : vector<1x2xf32> to vector<14x2xf32>
    %463 = arith.mulf %458, %462 : vector<14x2xf32>
    %464 = vector.broadcast %24 : f32 to vector<14x2xf32>
    %465 = arith.addf %463, %464 : vector<14x2xf32>
    %cst_275 = arith.constant 0.000000e+00 : f32
    %466 = vector.broadcast %cst_275 : f32 to vector<14x2xf32>
    %467 = arith.maximumf %465, %466 : vector<14x2xf32>
    %c0_276 = arith.constant 0 : index
    %c6_277 = arith.constant 6 : index
    %468 = vector.load %arg10[%c0_276, %c6_277] : memref<28x16xf32, #tpu.memory_space<vmem>>, vector<14x2xf32>
    tpu.vector_store %arg10[%c0_276, %c6_277], %467 {strides = array<i32>} : memref<28x16xf32, #tpu.memory_space<vmem>>, vector<14x2xf32>,
    %469 = vector.broadcast %367 : vector<1x2xf32> to vector<14x2xf32>
    %470 = arith.mulf %461, %469 : vector<14x2xf32>
    %471 = vector.broadcast %25 : f32 to vector<14x2xf32>
    %472 = arith.addf %470, %471 : vector<14x2xf32>
    %cst_278 = arith.constant 0.000000e+00 : f32
    %473 = vector.broadcast %cst_278 : f32 to vector<14x2xf32>
    %474 = arith.maximumf %472, %473 : vector<14x2xf32>
    %c14_279 = arith.constant 14 : index
    %c6_280 = arith.constant 6 : index
    %475 = vector.load %arg10[%c14_279, %c6_280] : memref<28x16xf32, #tpu.memory_space<vmem>>, vector<14x2xf32>
    tpu.vector_store %arg10[%c14_279, %c6_280], %474 {strides = array<i32>} : memref<28x16xf32, #tpu.memory_space<vmem>>, vector<14x2xf32>,
    %c0_281 = arith.constant 0 : index
    %c4_282 = arith.constant 4 : index
    %c15_283 = arith.constant 15 : index
    %c0_284 = arith.constant 0 : index
    %476 = vector.load %arg1[%c0_281, %c4_282, %c15_283, %c0_284] : memref<4x8x16x2xf32, #tpu.memory_space<vmem>>, vector<1x1x1x2xf32>
    %477 = vector.shape_cast %476 : vector<1x1x1x2xf32> to vector<1x2xf32>
    %478 = tpu.reciprocal %477 : vector<1x2xf32> -> vector<1x2xf32>
    %c0_285 = arith.constant 0 : index
    %c4_286 = arith.constant 4 : index
    %c0_287 = arith.constant 0 : index
    %c0_288 = arith.constant 0 : index
    %479 = vector.load %arg1[%c0_285, %c4_286, %c0_287, %c0_288] : memref<4x8x16x2xf32, #tpu.memory_space<vmem>>, vector<1x1x14x2xf32>
    %480 = vector.shape_cast %479 : vector<1x1x14x2xf32> to vector<14x2xf32>
    %481 = vector.broadcast %0 : f32 to vector<14x2xf32>
    %482 = arith.mulf %481, %480 : vector<14x2xf32>
    %483 = vector.broadcast %12 : f32 to vector<14x2xf32>
    %484 = arith.mulf %483, %480 : vector<14x2xf32>
    %c0_289 = arith.constant 0 : index
    %c4_290 = arith.constant 4 : index
    %c1_291 = arith.constant 1 : index
    %c0_292 = arith.constant 0 : index
    %485 = vector.load %arg1[%c0_289, %c4_290, %c1_291, %c0_292] : memref<4x8x16x2xf32, #tpu.memory_space<vmem>>, vector<1x1x14x2xf32>
    %486 = vector.shape_cast %485 : vector<1x1x14x2xf32> to vector<14x2xf32>
    %487 = vector.broadcast %1 : f32 to vector<14x2xf32>
    %488 = arith.mulf %487, %486 : vector<14x2xf32>
    %489 = arith.addf %482, %488 : vector<14x2xf32>
    %490 = vector.broadcast %13 : f32 to vector<14x2xf32>
    %491 = arith.mulf %490, %486 : vector<14x2xf32>
    %492 = arith.addf %484, %491 : vector<14x2xf32>
    %c0_293 = arith.constant 0 : index
    %c4_294 = arith.constant 4 : index
    %c2_295 = arith.constant 2 : index
    %c0_296 = arith.constant 0 : index
    %493 = vector.load %arg1[%c0_293, %c4_294, %c2_295, %c0_296] : memref<4x8x16x2xf32, #tpu.memory_space<vmem>>, vector<1x1x14x2xf32>
    %494 = vector.shape_cast %493 : vector<1x1x14x2xf32> to vector<14x2xf32>
    %495 = vector.broadcast %2 : f32 to vector<14x2xf32>
    %496 = arith.mulf %495, %494 : vector<14x2xf32>
    %497 = arith.addf %489, %496 : vector<14x2xf32>
    %498 = vector.broadcast %14 : f32 to vector<14x2xf32>
    %499 = arith.mulf %498, %494 : vector<14x2xf32>
    %500 = arith.addf %492, %499 : vector<14x2xf32>
    %c1_297 = arith.constant 1 : index
    %c4_298 = arith.constant 4 : index
    %c0_299 = arith.constant 0 : index
    %c0_300 = arith.constant 0 : index
    %501 = vector.load %arg1[%c1_297, %c4_298, %c0_299, %c0_300] : memref<4x8x16x2xf32, #tpu.memory_space<vmem>>, vector<1x1x14x2xf32>
    %502 = vector.shape_cast %501 : vector<1x1x14x2xf32> to vector<14x2xf32>
    %503 = vector.broadcast %3 : f32 to vector<14x2xf32>
    %504 = arith.mulf %503, %502 : vector<14x2xf32>
    %505 = arith.addf %497, %504 : vector<14x2xf32>
    %506 = vector.broadcast %15 : f32 to vector<14x2xf32>
    %507 = arith.mulf %506, %502 : vector<14x2xf32>
    %508 = arith.addf %500, %507 : vector<14x2xf32>
    %c1_301 = arith.constant 1 : index
    %c4_302 = arith.constant 4 : index
    %c1_303 = arith.constant 1 : index
    %c0_304 = arith.constant 0 : index
    %509 = vector.load %arg1[%c1_301, %c4_302, %c1_303, %c0_304] : memref<4x8x16x2xf32, #tpu.memory_space<vmem>>, vector<1x1x14x2xf32>
    %510 = vector.shape_cast %509 : vector<1x1x14x2xf32> to vector<14x2xf32>
    %511 = vector.broadcast %4 : f32 to vector<14x2xf32>
    %512 = arith.mulf %511, %510 : vector<14x2xf32>
    %513 = arith.addf %505, %512 : vector<14x2xf32>
    %514 = vector.broadcast %16 : f32 to vector<14x2xf32>
    %515 = arith.mulf %514, %510 : vector<14x2xf32>
    %516 = arith.addf %508, %515 : vector<14x2xf32>
    %c1_305 = arith.constant 1 : index
    %c4_306 = arith.constant 4 : index
    %c2_307 = arith.constant 2 : index
    %c0_308 = arith.constant 0 : index
    %517 = vector.load %arg1[%c1_305, %c4_306, %c2_307, %c0_308] : memref<4x8x16x2xf32, #tpu.memory_space<vmem>>, vector<1x1x14x2xf32>
    %518 = vector.shape_cast %517 : vector<1x1x14x2xf32> to vector<14x2xf32>
    %519 = vector.broadcast %5 : f32 to vector<14x2xf32>
    %520 = arith.mulf %519, %518 : vector<14x2xf32>
    %521 = arith.addf %513, %520 : vector<14x2xf32>
    %522 = vector.broadcast %17 : f32 to vector<14x2xf32>
    %523 = arith.mulf %522, %518 : vector<14x2xf32>
    %524 = arith.addf %516, %523 : vector<14x2xf32>
    %c2_309 = arith.constant 2 : index
    %c4_310 = arith.constant 4 : index
    %c0_311 = arith.constant 0 : index
    %c0_312 = arith.constant 0 : index
    %525 = vector.load %arg1[%c2_309, %c4_310, %c0_311, %c0_312] : memref<4x8x16x2xf32, #tpu.memory_space<vmem>>, vector<1x1x14x2xf32>
    %526 = vector.shape_cast %525 : vector<1x1x14x2xf32> to vector<14x2xf32>
    %527 = vector.broadcast %6 : f32 to vector<14x2xf32>
    %528 = arith.mulf %527, %526 : vector<14x2xf32>
    %529 = arith.addf %521, %528 : vector<14x2xf32>
    %530 = vector.broadcast %18 : f32 to vector<14x2xf32>
    %531 = arith.mulf %530, %526 : vector<14x2xf32>
    %532 = arith.addf %524, %531 : vector<14x2xf32>
    %c2_313 = arith.constant 2 : index
    %c4_314 = arith.constant 4 : index
    %c1_315 = arith.constant 1 : index
    %c0_316 = arith.constant 0 : index
    %533 = vector.load %arg1[%c2_313, %c4_314, %c1_315, %c0_316] : memref<4x8x16x2xf32, #tpu.memory_space<vmem>>, vector<1x1x14x2xf32>
    %534 = vector.shape_cast %533 : vector<1x1x14x2xf32> to vector<14x2xf32>
    %535 = vector.broadcast %7 : f32 to vector<14x2xf32>
    %536 = arith.mulf %535, %534 : vector<14x2xf32>
    %537 = arith.addf %529, %536 : vector<14x2xf32>
    %538 = vector.broadcast %19 : f32 to vector<14x2xf32>
    %539 = arith.mulf %538, %534 : vector<14x2xf32>
    %540 = arith.addf %532, %539 : vector<14x2xf32>
    %c2_317 = arith.constant 2 : index
    %c4_318 = arith.constant 4 : index
    %c2_319 = arith.constant 2 : index
    %c0_320 = arith.constant 0 : index
    %541 = vector.load %arg1[%c2_317, %c4_318, %c2_319, %c0_320] : memref<4x8x16x2xf32, #tpu.memory_space<vmem>>, vector<1x1x14x2xf32>
    %542 = vector.shape_cast %541 : vector<1x1x14x2xf32> to vector<14x2xf32>
    %543 = vector.broadcast %8 : f32 to vector<14x2xf32>
    %544 = arith.mulf %543, %542 : vector<14x2xf32>
    %545 = arith.addf %537, %544 : vector<14x2xf32>
    %546 = vector.broadcast %20 : f32 to vector<14x2xf32>
    %547 = arith.mulf %546, %542 : vector<14x2xf32>
    %548 = arith.addf %540, %547 : vector<14x2xf32>
    %c3_321 = arith.constant 3 : index
    %c4_322 = arith.constant 4 : index
    %c0_323 = arith.constant 0 : index
    %c0_324 = arith.constant 0 : index
    %549 = vector.load %arg1[%c3_321, %c4_322, %c0_323, %c0_324] : memref<4x8x16x2xf32, #tpu.memory_space<vmem>>, vector<1x1x14x2xf32>
    %550 = vector.shape_cast %549 : vector<1x1x14x2xf32> to vector<14x2xf32>
    %551 = vector.broadcast %9 : f32 to vector<14x2xf32>
    %552 = arith.mulf %551, %550 : vector<14x2xf32>
    %553 = arith.addf %545, %552 : vector<14x2xf32>
    %554 = vector.broadcast %21 : f32 to vector<14x2xf32>
    %555 = arith.mulf %554, %550 : vector<14x2xf32>
    %556 = arith.addf %548, %555 : vector<14x2xf32>
    %c3_325 = arith.constant 3 : index
    %c4_326 = arith.constant 4 : index
    %c1_327 = arith.constant 1 : index
    %c0_328 = arith.constant 0 : index
    %557 = vector.load %arg1[%c3_325, %c4_326, %c1_327, %c0_328] : memref<4x8x16x2xf32, #tpu.memory_space<vmem>>, vector<1x1x14x2xf32>
    %558 = vector.shape_cast %557 : vector<1x1x14x2xf32> to vector<14x2xf32>
    %559 = vector.broadcast %10 : f32 to vector<14x2xf32>
    %560 = arith.mulf %559, %558 : vector<14x2xf32>
    %561 = arith.addf %553, %560 : vector<14x2xf32>
    %562 = vector.broadcast %22 : f32 to vector<14x2xf32>
    %563 = arith.mulf %562, %558 : vector<14x2xf32>
    %564 = arith.addf %556, %563 : vector<14x2xf32>
    %c3_329 = arith.constant 3 : index
    %c4_330 = arith.constant 4 : index
    %c2_331 = arith.constant 2 : index
    %c0_332 = arith.constant 0 : index
    %565 = vector.load %arg1[%c3_329, %c4_330, %c2_331, %c0_332] : memref<4x8x16x2xf32, #tpu.memory_space<vmem>>, vector<1x1x14x2xf32>
    %566 = vector.shape_cast %565 : vector<1x1x14x2xf32> to vector<14x2xf32>
    %567 = vector.broadcast %11 : f32 to vector<14x2xf32>
    %568 = arith.mulf %567, %566 : vector<14x2xf32>
    %569 = arith.addf %561, %568 : vector<14x2xf32>
    %570 = vector.broadcast %23 : f32 to vector<14x2xf32>
    %571 = arith.mulf %570, %566 : vector<14x2xf32>
    %572 = arith.addf %564, %571 : vector<14x2xf32>
    %573 = vector.broadcast %478 : vector<1x2xf32> to vector<14x2xf32>
    %574 = arith.mulf %569, %573 : vector<14x2xf32>
    %575 = vector.broadcast %24 : f32 to vector<14x2xf32>
    %576 = arith.addf %574, %575 : vector<14x2xf32>
    %cst_333 = arith.constant 0.000000e+00 : f32
    %577 = vector.broadcast %cst_333 : f32 to vector<14x2xf32>
    %578 = arith.maximumf %576, %577 : vector<14x2xf32>
    %c0_334 = arith.constant 0 : index
    %c8_335 = arith.constant 8 : index
    %579 = vector.load %arg10[%c0_334, %c8_335] : memref<28x16xf32, #tpu.memory_space<vmem>>, vector<14x2xf32>
    tpu.vector_store %arg10[%c0_334, %c8_335], %578 {strides = array<i32>} : memref<28x16xf32, #tpu.memory_space<vmem>>, vector<14x2xf32>,
    %580 = vector.broadcast %478 : vector<1x2xf32> to vector<14x2xf32>
    %581 = arith.mulf %572, %580 : vector<14x2xf32>
    %582 = vector.broadcast %25 : f32 to vector<14x2xf32>
    %583 = arith.addf %581, %582 : vector<14x2xf32>
    %cst_336 = arith.constant 0.000000e+00 : f32
    %584 = vector.broadcast %cst_336 : f32 to vector<14x2xf32>
    %585 = arith.maximumf %583, %584 : vector<14x2xf32>
    %c14_337 = arith.constant 14 : index
    %c8_338 = arith.constant 8 : index
    %586 = vector.load %arg10[%c14_337, %c8_338] : memref<28x16xf32, #tpu.memory_space<vmem>>, vector<14x2xf32>
    tpu.vector_store %arg10[%c14_337, %c8_338], %585 {strides = array<i32>} : memref<28x16xf32, #tpu.memory_space<vmem>>, vector<14x2xf32>,
    %c0_339 = arith.constant 0 : index
    %c5_340 = arith.constant 5 : index
    %c15_341 = arith.constant 15 : index
    %c0_342 = arith.constant 0 : index
    %587 = vector.load %arg1[%c0_339, %c5_340, %c15_341, %c0_342] : memref<4x8x16x2xf32, #tpu.memory_space<vmem>>, vector<1x1x1x2xf32>
    %588 = vector.shape_cast %587 : vector<1x1x1x2xf32> to vector<1x2xf32>
    %589 = tpu.reciprocal %588 : vector<1x2xf32> -> vector<1x2xf32>
    %c0_343 = arith.constant 0 : index
    %c5_344 = arith.constant 5 : index
    %c0_345 = arith.constant 0 : index
    %c0_346 = arith.constant 0 : index
    %590 = vector.load %arg1[%c0_343, %c5_344, %c0_345, %c0_346] : memref<4x8x16x2xf32, #tpu.memory_space<vmem>>, vector<1x1x14x2xf32>
    %591 = vector.shape_cast %590 : vector<1x1x14x2xf32> to vector<14x2xf32>
    %592 = vector.broadcast %0 : f32 to vector<14x2xf32>
    %593 = arith.mulf %592, %591 : vector<14x2xf32>
    %594 = vector.broadcast %12 : f32 to vector<14x2xf32>
    %595 = arith.mulf %594, %591 : vector<14x2xf32>
    %c0_347 = arith.constant 0 : index
    %c5_348 = arith.constant 5 : index
    %c1_349 = arith.constant 1 : index
    %c0_350 = arith.constant 0 : index
    %596 = vector.load %arg1[%c0_347, %c5_348, %c1_349, %c0_350] : memref<4x8x16x2xf32, #tpu.memory_space<vmem>>, vector<1x1x14x2xf32>
    %597 = vector.shape_cast %596 : vector<1x1x14x2xf32> to vector<14x2xf32>
    %598 = vector.broadcast %1 : f32 to vector<14x2xf32>
    %599 = arith.mulf %598, %597 : vector<14x2xf32>
    %600 = arith.addf %593, %599 : vector<14x2xf32>
    %601 = vector.broadcast %13 : f32 to vector<14x2xf32>
    %602 = arith.mulf %601, %597 : vector<14x2xf32>
    %603 = arith.addf %595, %602 : vector<14x2xf32>
    %c0_351 = arith.constant 0 : index
    %c5_352 = arith.constant 5 : index
    %c2_353 = arith.constant 2 : index
    %c0_354 = arith.constant 0 : index
    %604 = vector.load %arg1[%c0_351, %c5_352, %c2_353, %c0_354] : memref<4x8x16x2xf32, #tpu.memory_space<vmem>>, vector<1x1x14x2xf32>
    %605 = vector.shape_cast %604 : vector<1x1x14x2xf32> to vector<14x2xf32>
    %606 = vector.broadcast %2 : f32 to vector<14x2xf32>
    %607 = arith.mulf %606, %605 : vector<14x2xf32>
    %608 = arith.addf %600, %607 : vector<14x2xf32>
    %609 = vector.broadcast %14 : f32 to vector<14x2xf32>
    %610 = arith.mulf %609, %605 : vector<14x2xf32>
    %611 = arith.addf %603, %610 : vector<14x2xf32>
    %c1_355 = arith.constant 1 : index
    %c5_356 = arith.constant 5 : index
    %c0_357 = arith.constant 0 : index
    %c0_358 = arith.constant 0 : index
    %612 = vector.load %arg1[%c1_355, %c5_356, %c0_357, %c0_358] : memref<4x8x16x2xf32, #tpu.memory_space<vmem>>, vector<1x1x14x2xf32>
    %613 = vector.shape_cast %612 : vector<1x1x14x2xf32> to vector<14x2xf32>
    %614 = vector.broadcast %3 : f32 to vector<14x2xf32>
    %615 = arith.mulf %614, %613 : vector<14x2xf32>
    %616 = arith.addf %608, %615 : vector<14x2xf32>
    %617 = vector.broadcast %15 : f32 to vector<14x2xf32>
    %618 = arith.mulf %617, %613 : vector<14x2xf32>
    %619 = arith.addf %611, %618 : vector<14x2xf32>
    %c1_359 = arith.constant 1 : index
    %c5_360 = arith.constant 5 : index
    %c1_361 = arith.constant 1 : index
    %c0_362 = arith.constant 0 : index
    %620 = vector.load %arg1[%c1_359, %c5_360, %c1_361, %c0_362] : memref<4x8x16x2xf32, #tpu.memory_space<vmem>>, vector<1x1x14x2xf32>
    %621 = vector.shape_cast %620 : vector<1x1x14x2xf32> to vector<14x2xf32>
    %622 = vector.broadcast %4 : f32 to vector<14x2xf32>
    %623 = arith.mulf %622, %621 : vector<14x2xf32>
    %624 = arith.addf %616, %623 : vector<14x2xf32>
    %625 = vector.broadcast %16 : f32 to vector<14x2xf32>
    %626 = arith.mulf %625, %621 : vector<14x2xf32>
    %627 = arith.addf %619, %626 : vector<14x2xf32>
    %c1_363 = arith.constant 1 : index
    %c5_364 = arith.constant 5 : index
    %c2_365 = arith.constant 2 : index
    %c0_366 = arith.constant 0 : index
    %628 = vector.load %arg1[%c1_363, %c5_364, %c2_365, %c0_366] : memref<4x8x16x2xf32, #tpu.memory_space<vmem>>, vector<1x1x14x2xf32>
    %629 = vector.shape_cast %628 : vector<1x1x14x2xf32> to vector<14x2xf32>
    %630 = vector.broadcast %5 : f32 to vector<14x2xf32>
    %631 = arith.mulf %630, %629 : vector<14x2xf32>
    %632 = arith.addf %624, %631 : vector<14x2xf32>
    %633 = vector.broadcast %17 : f32 to vector<14x2xf32>
    %634 = arith.mulf %633, %629 : vector<14x2xf32>
    %635 = arith.addf %627, %634 : vector<14x2xf32>
    %c2_367 = arith.constant 2 : index
    %c5_368 = arith.constant 5 : index
    %c0_369 = arith.constant 0 : index
    %c0_370 = arith.constant 0 : index
    %636 = vector.load %arg1[%c2_367, %c5_368, %c0_369, %c0_370] : memref<4x8x16x2xf32, #tpu.memory_space<vmem>>, vector<1x1x14x2xf32>
    %637 = vector.shape_cast %636 : vector<1x1x14x2xf32> to vector<14x2xf32>
    %638 = vector.broadcast %6 : f32 to vector<14x2xf32>
    %639 = arith.mulf %638, %637 : vector<14x2xf32>
    %640 = arith.addf %632, %639 : vector<14x2xf32>
    %641 = vector.broadcast %18 : f32 to vector<14x2xf32>
    %642 = arith.mulf %641, %637 : vector<14x2xf32>
    %643 = arith.addf %635, %642 : vector<14x2xf32>
    %c2_371 = arith.constant 2 : index
    %c5_372 = arith.constant 5 : index
    %c1_373 = arith.constant 1 : index
    %c0_374 = arith.constant 0 : index
    %644 = vector.load %arg1[%c2_371, %c5_372, %c1_373, %c0_374] : memref<4x8x16x2xf32, #tpu.memory_space<vmem>>, vector<1x1x14x2xf32>
    %645 = vector.shape_cast %644 : vector<1x1x14x2xf32> to vector<14x2xf32>
    %646 = vector.broadcast %7 : f32 to vector<14x2xf32>
    %647 = arith.mulf %646, %645 : vector<14x2xf32>
    %648 = arith.addf %640, %647 : vector<14x2xf32>
    %649 = vector.broadcast %19 : f32 to vector<14x2xf32>
    %650 = arith.mulf %649, %645 : vector<14x2xf32>
    %651 = arith.addf %643, %650 : vector<14x2xf32>
    %c2_375 = arith.constant 2 : index
    %c5_376 = arith.constant 5 : index
    %c2_377 = arith.constant 2 : index
    %c0_378 = arith.constant 0 : index
    %652 = vector.load %arg1[%c2_375, %c5_376, %c2_377, %c0_378] : memref<4x8x16x2xf32, #tpu.memory_space<vmem>>, vector<1x1x14x2xf32>
    %653 = vector.shape_cast %652 : vector<1x1x14x2xf32> to vector<14x2xf32>
    %654 = vector.broadcast %8 : f32 to vector<14x2xf32>
    %655 = arith.mulf %654, %653 : vector<14x2xf32>
    %656 = arith.addf %648, %655 : vector<14x2xf32>
    %657 = vector.broadcast %20 : f32 to vector<14x2xf32>
    %658 = arith.mulf %657, %653 : vector<14x2xf32>
    %659 = arith.addf %651, %658 : vector<14x2xf32>
    %c3_379 = arith.constant 3 : index
    %c5_380 = arith.constant 5 : index
    %c0_381 = arith.constant 0 : index
    %c0_382 = arith.constant 0 : index
    %660 = vector.load %arg1[%c3_379, %c5_380, %c0_381, %c0_382] : memref<4x8x16x2xf32, #tpu.memory_space<vmem>>, vector<1x1x14x2xf32>
    %661 = vector.shape_cast %660 : vector<1x1x14x2xf32> to vector<14x2xf32>
    %662 = vector.broadcast %9 : f32 to vector<14x2xf32>
    %663 = arith.mulf %662, %661 : vector<14x2xf32>
    %664 = arith.addf %656, %663 : vector<14x2xf32>
    %665 = vector.broadcast %21 : f32 to vector<14x2xf32>
    %666 = arith.mulf %665, %661 : vector<14x2xf32>
    %667 = arith.addf %659, %666 : vector<14x2xf32>
    %c3_383 = arith.constant 3 : index
    %c5_384 = arith.constant 5 : index
    %c1_385 = arith.constant 1 : index
    %c0_386 = arith.constant 0 : index
    %668 = vector.load %arg1[%c3_383, %c5_384, %c1_385, %c0_386] : memref<4x8x16x2xf32, #tpu.memory_space<vmem>>, vector<1x1x14x2xf32>
    %669 = vector.shape_cast %668 : vector<1x1x14x2xf32> to vector<14x2xf32>
    %670 = vector.broadcast %10 : f32 to vector<14x2xf32>
    %671 = arith.mulf %670, %669 : vector<14x2xf32>
    %672 = arith.addf %664, %671 : vector<14x2xf32>
    %673 = vector.broadcast %22 : f32 to vector<14x2xf32>
    %674 = arith.mulf %673, %669 : vector<14x2xf32>
    %675 = arith.addf %667, %674 : vector<14x2xf32>
    %c3_387 = arith.constant 3 : index
    %c5_388 = arith.constant 5 : index
    %c2_389 = arith.constant 2 : index
    %c0_390 = arith.constant 0 : index
    %676 = vector.load %arg1[%c3_387, %c5_388, %c2_389, %c0_390] : memref<4x8x16x2xf32, #tpu.memory_space<vmem>>, vector<1x1x14x2xf32>
    %677 = vector.shape_cast %676 : vector<1x1x14x2xf32> to vector<14x2xf32>
    %678 = vector.broadcast %11 : f32 to vector<14x2xf32>
    %679 = arith.mulf %678, %677 : vector<14x2xf32>
    %680 = arith.addf %672, %679 : vector<14x2xf32>
    %681 = vector.broadcast %23 : f32 to vector<14x2xf32>
    %682 = arith.mulf %681, %677 : vector<14x2xf32>
    %683 = arith.addf %675, %682 : vector<14x2xf32>
    %684 = vector.broadcast %589 : vector<1x2xf32> to vector<14x2xf32>
    %685 = arith.mulf %680, %684 : vector<14x2xf32>
    %686 = vector.broadcast %24 : f32 to vector<14x2xf32>
    %687 = arith.addf %685, %686 : vector<14x2xf32>
    %cst_391 = arith.constant 0.000000e+00 : f32
    %688 = vector.broadcast %cst_391 : f32 to vector<14x2xf32>
    %689 = arith.maximumf %687, %688 : vector<14x2xf32>
    %c0_392 = arith.constant 0 : index
    %c10_393 = arith.constant 10 : index
    %690 = vector.load %arg10[%c0_392, %c10_393] : memref<28x16xf32, #tpu.memory_space<vmem>>, vector<14x2xf32>
    tpu.vector_store %arg10[%c0_392, %c10_393], %689 {strides = array<i32>} : memref<28x16xf32, #tpu.memory_space<vmem>>, vector<14x2xf32>,
    %691 = vector.broadcast %589 : vector<1x2xf32> to vector<14x2xf32>
    %692 = arith.mulf %683, %691 : vector<14x2xf32>
    %693 = vector.broadcast %25 : f32 to vector<14x2xf32>
    %694 = arith.addf %692, %693 : vector<14x2xf32>
    %cst_394 = arith.constant 0.000000e+00 : f32
    %695 = vector.broadcast %cst_394 : f32 to vector<14x2xf32>
    %696 = arith.maximumf %694, %695 : vector<14x2xf32>
    %c14_395 = arith.constant 14 : index
    %c10_396 = arith.constant 10 : index
    %697 = vector.load %arg10[%c14_395, %c10_396] : memref<28x16xf32, #tpu.memory_space<vmem>>, vector<14x2xf32>
    tpu.vector_store %arg10[%c14_395, %c10_396], %696 {strides = array<i32>} : memref<28x16xf32, #tpu.memory_space<vmem>>, vector<14x2xf32>,
    %c0_397 = arith.constant 0 : index
    %c6_398 = arith.constant 6 : index
    %c15_399 = arith.constant 15 : index
    %c0_400 = arith.constant 0 : index
    %698 = vector.load %arg1[%c0_397, %c6_398, %c15_399, %c0_400] : memref<4x8x16x2xf32, #tpu.memory_space<vmem>>, vector<1x1x1x2xf32>
    %699 = vector.shape_cast %698 : vector<1x1x1x2xf32> to vector<1x2xf32>
    %700 = tpu.reciprocal %699 : vector<1x2xf32> -> vector<1x2xf32>
    %c0_401 = arith.constant 0 : index
    %c6_402 = arith.constant 6 : index
    %c0_403 = arith.constant 0 : index
    %c0_404 = arith.constant 0 : index
    %701 = vector.load %arg1[%c0_401, %c6_402, %c0_403, %c0_404] : memref<4x8x16x2xf32, #tpu.memory_space<vmem>>, vector<1x1x14x2xf32>
    %702 = vector.shape_cast %701 : vector<1x1x14x2xf32> to vector<14x2xf32>
    %703 = vector.broadcast %0 : f32 to vector<14x2xf32>
    %704 = arith.mulf %703, %702 : vector<14x2xf32>
    %705 = vector.broadcast %12 : f32 to vector<14x2xf32>
    %706 = arith.mulf %705, %702 : vector<14x2xf32>
    %c0_405 = arith.constant 0 : index
    %c6_406 = arith.constant 6 : index
    %c1_407 = arith.constant 1 : index
    %c0_408 = arith.constant 0 : index
    %707 = vector.load %arg1[%c0_405, %c6_406, %c1_407, %c0_408] : memref<4x8x16x2xf32, #tpu.memory_space<vmem>>, vector<1x1x14x2xf32>
    %708 = vector.shape_cast %707 : vector<1x1x14x2xf32> to vector<14x2xf32>
    %709 = vector.broadcast %1 : f32 to vector<14x2xf32>
    %710 = arith.mulf %709, %708 : vector<14x2xf32>
    %711 = arith.addf %704, %710 : vector<14x2xf32>
    %712 = vector.broadcast %13 : f32 to vector<14x2xf32>
    %713 = arith.mulf %712, %708 : vector<14x2xf32>
    %714 = arith.addf %706, %713 : vector<14x2xf32>
    %c0_409 = arith.constant 0 : index
    %c6_410 = arith.constant 6 : index
    %c2_411 = arith.constant 2 : index
    %c0_412 = arith.constant 0 : index
    %715 = vector.load %arg1[%c0_409, %c6_410, %c2_411, %c0_412] : memref<4x8x16x2xf32, #tpu.memory_space<vmem>>, vector<1x1x14x2xf32>
    %716 = vector.shape_cast %715 : vector<1x1x14x2xf32> to vector<14x2xf32>
    %717 = vector.broadcast %2 : f32 to vector<14x2xf32>
    %718 = arith.mulf %717, %716 : vector<14x2xf32>
    %719 = arith.addf %711, %718 : vector<14x2xf32>
    %720 = vector.broadcast %14 : f32 to vector<14x2xf32>
    %721 = arith.mulf %720, %716 : vector<14x2xf32>
    %722 = arith.addf %714, %721 : vector<14x2xf32>
    %c1_413 = arith.constant 1 : index
    %c6_414 = arith.constant 6 : index
    %c0_415 = arith.constant 0 : index
    %c0_416 = arith.constant 0 : index
    %723 = vector.load %arg1[%c1_413, %c6_414, %c0_415, %c0_416] : memref<4x8x16x2xf32, #tpu.memory_space<vmem>>, vector<1x1x14x2xf32>
    %724 = vector.shape_cast %723 : vector<1x1x14x2xf32> to vector<14x2xf32>
    %725 = vector.broadcast %3 : f32 to vector<14x2xf32>
    %726 = arith.mulf %725, %724 : vector<14x2xf32>
    %727 = arith.addf %719, %726 : vector<14x2xf32>
    %728 = vector.broadcast %15 : f32 to vector<14x2xf32>
    %729 = arith.mulf %728, %724 : vector<14x2xf32>
    %730 = arith.addf %722, %729 : vector<14x2xf32>
    %c1_417 = arith.constant 1 : index
    %c6_418 = arith.constant 6 : index
    %c1_419 = arith.constant 1 : index
    %c0_420 = arith.constant 0 : index
    %731 = vector.load %arg1[%c1_417, %c6_418, %c1_419, %c0_420] : memref<4x8x16x2xf32, #tpu.memory_space<vmem>>, vector<1x1x14x2xf32>
    %732 = vector.shape_cast %731 : vector<1x1x14x2xf32> to vector<14x2xf32>
    %733 = vector.broadcast %4 : f32 to vector<14x2xf32>
    %734 = arith.mulf %733, %732 : vector<14x2xf32>
    %735 = arith.addf %727, %734 : vector<14x2xf32>
    %736 = vector.broadcast %16 : f32 to vector<14x2xf32>
    %737 = arith.mulf %736, %732 : vector<14x2xf32>
    %738 = arith.addf %730, %737 : vector<14x2xf32>
    %c1_421 = arith.constant 1 : index
    %c6_422 = arith.constant 6 : index
    %c2_423 = arith.constant 2 : index
    %c0_424 = arith.constant 0 : index
    %739 = vector.load %arg1[%c1_421, %c6_422, %c2_423, %c0_424] : memref<4x8x16x2xf32, #tpu.memory_space<vmem>>, vector<1x1x14x2xf32>
    %740 = vector.shape_cast %739 : vector<1x1x14x2xf32> to vector<14x2xf32>
    %741 = vector.broadcast %5 : f32 to vector<14x2xf32>
    %742 = arith.mulf %741, %740 : vector<14x2xf32>
    %743 = arith.addf %735, %742 : vector<14x2xf32>
    %744 = vector.broadcast %17 : f32 to vector<14x2xf32>
    %745 = arith.mulf %744, %740 : vector<14x2xf32>
    %746 = arith.addf %738, %745 : vector<14x2xf32>
    %c2_425 = arith.constant 2 : index
    %c6_426 = arith.constant 6 : index
    %c0_427 = arith.constant 0 : index
    %c0_428 = arith.constant 0 : index
    %747 = vector.load %arg1[%c2_425, %c6_426, %c0_427, %c0_428] : memref<4x8x16x2xf32, #tpu.memory_space<vmem>>, vector<1x1x14x2xf32>
    %748 = vector.shape_cast %747 : vector<1x1x14x2xf32> to vector<14x2xf32>
    %749 = vector.broadcast %6 : f32 to vector<14x2xf32>
    %750 = arith.mulf %749, %748 : vector<14x2xf32>
    %751 = arith.addf %743, %750 : vector<14x2xf32>
    %752 = vector.broadcast %18 : f32 to vector<14x2xf32>
    %753 = arith.mulf %752, %748 : vector<14x2xf32>
    %754 = arith.addf %746, %753 : vector<14x2xf32>
    %c2_429 = arith.constant 2 : index
    %c6_430 = arith.constant 6 : index
    %c1_431 = arith.constant 1 : index
    %c0_432 = arith.constant 0 : index
    %755 = vector.load %arg1[%c2_429, %c6_430, %c1_431, %c0_432] : memref<4x8x16x2xf32, #tpu.memory_space<vmem>>, vector<1x1x14x2xf32>
    %756 = vector.shape_cast %755 : vector<1x1x14x2xf32> to vector<14x2xf32>
    %757 = vector.broadcast %7 : f32 to vector<14x2xf32>
    %758 = arith.mulf %757, %756 : vector<14x2xf32>
    %759 = arith.addf %751, %758 : vector<14x2xf32>
    %760 = vector.broadcast %19 : f32 to vector<14x2xf32>
    %761 = arith.mulf %760, %756 : vector<14x2xf32>
    %762 = arith.addf %754, %761 : vector<14x2xf32>
    %c2_433 = arith.constant 2 : index
    %c6_434 = arith.constant 6 : index
    %c2_435 = arith.constant 2 : index
    %c0_436 = arith.constant 0 : index
    %763 = vector.load %arg1[%c2_433, %c6_434, %c2_435, %c0_436] : memref<4x8x16x2xf32, #tpu.memory_space<vmem>>, vector<1x1x14x2xf32>
    %764 = vector.shape_cast %763 : vector<1x1x14x2xf32> to vector<14x2xf32>
    %765 = vector.broadcast %8 : f32 to vector<14x2xf32>
    %766 = arith.mulf %765, %764 : vector<14x2xf32>
    %767 = arith.addf %759, %766 : vector<14x2xf32>
    %768 = vector.broadcast %20 : f32 to vector<14x2xf32>
    %769 = arith.mulf %768, %764 : vector<14x2xf32>
    %770 = arith.addf %762, %769 : vector<14x2xf32>
    %c3_437 = arith.constant 3 : index
    %c6_438 = arith.constant 6 : index
    %c0_439 = arith.constant 0 : index
    %c0_440 = arith.constant 0 : index
    %771 = vector.load %arg1[%c3_437, %c6_438, %c0_439, %c0_440] : memref<4x8x16x2xf32, #tpu.memory_space<vmem>>, vector<1x1x14x2xf32>
    %772 = vector.shape_cast %771 : vector<1x1x14x2xf32> to vector<14x2xf32>
    %773 = vector.broadcast %9 : f32 to vector<14x2xf32>
    %774 = arith.mulf %773, %772 : vector<14x2xf32>
    %775 = arith.addf %767, %774 : vector<14x2xf32>
    %776 = vector.broadcast %21 : f32 to vector<14x2xf32>
    %777 = arith.mulf %776, %772 : vector<14x2xf32>
    %778 = arith.addf %770, %777 : vector<14x2xf32>
    %c3_441 = arith.constant 3 : index
    %c6_442 = arith.constant 6 : index
    %c1_443 = arith.constant 1 : index
    %c0_444 = arith.constant 0 : index
    %779 = vector.load %arg1[%c3_441, %c6_442, %c1_443, %c0_444] : memref<4x8x16x2xf32, #tpu.memory_space<vmem>>, vector<1x1x14x2xf32>
    %780 = vector.shape_cast %779 : vector<1x1x14x2xf32> to vector<14x2xf32>
    %781 = vector.broadcast %10 : f32 to vector<14x2xf32>
    %782 = arith.mulf %781, %780 : vector<14x2xf32>
    %783 = arith.addf %775, %782 : vector<14x2xf32>
    %784 = vector.broadcast %22 : f32 to vector<14x2xf32>
    %785 = arith.mulf %784, %780 : vector<14x2xf32>
    %786 = arith.addf %778, %785 : vector<14x2xf32>
    %c3_445 = arith.constant 3 : index
    %c6_446 = arith.constant 6 : index
    %c2_447 = arith.constant 2 : index
    %c0_448 = arith.constant 0 : index
    %787 = vector.load %arg1[%c3_445, %c6_446, %c2_447, %c0_448] : memref<4x8x16x2xf32, #tpu.memory_space<vmem>>, vector<1x1x14x2xf32>
    %788 = vector.shape_cast %787 : vector<1x1x14x2xf32> to vector<14x2xf32>
    %789 = vector.broadcast %11 : f32 to vector<14x2xf32>
    %790 = arith.mulf %789, %788 : vector<14x2xf32>
    %791 = arith.addf %783, %790 : vector<14x2xf32>
    %792 = vector.broadcast %23 : f32 to vector<14x2xf32>
    %793 = arith.mulf %792, %788 : vector<14x2xf32>
    %794 = arith.addf %786, %793 : vector<14x2xf32>
    %795 = vector.broadcast %700 : vector<1x2xf32> to vector<14x2xf32>
    %796 = arith.mulf %791, %795 : vector<14x2xf32>
    %797 = vector.broadcast %24 : f32 to vector<14x2xf32>
    %798 = arith.addf %796, %797 : vector<14x2xf32>
    %cst_449 = arith.constant 0.000000e+00 : f32
    %799 = vector.broadcast %cst_449 : f32 to vector<14x2xf32>
    %800 = arith.maximumf %798, %799 : vector<14x2xf32>
    %c0_450 = arith.constant 0 : index
    %c12 = arith.constant 12 : index
    %801 = vector.load %arg10[%c0_450, %c12] : memref<28x16xf32, #tpu.memory_space<vmem>>, vector<14x2xf32>
    tpu.vector_store %arg10[%c0_450, %c12], %800 {strides = array<i32>} : memref<28x16xf32, #tpu.memory_space<vmem>>, vector<14x2xf32>,
    %802 = vector.broadcast %700 : vector<1x2xf32> to vector<14x2xf32>
    %803 = arith.mulf %794, %802 : vector<14x2xf32>
    %804 = vector.broadcast %25 : f32 to vector<14x2xf32>
    %805 = arith.addf %803, %804 : vector<14x2xf32>
    %cst_451 = arith.constant 0.000000e+00 : f32
    %806 = vector.broadcast %cst_451 : f32 to vector<14x2xf32>
    %807 = arith.maximumf %805, %806 : vector<14x2xf32>
    %c14_452 = arith.constant 14 : index
    %c12_453 = arith.constant 12 : index
    %808 = vector.load %arg10[%c14_452, %c12_453] : memref<28x16xf32, #tpu.memory_space<vmem>>, vector<14x2xf32>
    tpu.vector_store %arg10[%c14_452, %c12_453], %807 {strides = array<i32>} : memref<28x16xf32, #tpu.memory_space<vmem>>, vector<14x2xf32>,
    %c0_454 = arith.constant 0 : index
    %c7_455 = arith.constant 7 : index
    %c15_456 = arith.constant 15 : index
    %c0_457 = arith.constant 0 : index
    %809 = vector.load %arg1[%c0_454, %c7_455, %c15_456, %c0_457] : memref<4x8x16x2xf32, #tpu.memory_space<vmem>>, vector<1x1x1x2xf32>
    %810 = vector.shape_cast %809 : vector<1x1x1x2xf32> to vector<1x2xf32>
    %811 = tpu.reciprocal %810 : vector<1x2xf32> -> vector<1x2xf32>
    %c0_458 = arith.constant 0 : index
    %c7_459 = arith.constant 7 : index
    %c0_460 = arith.constant 0 : index
    %c0_461 = arith.constant 0 : index
    %812 = vector.load %arg1[%c0_458, %c7_459, %c0_460, %c0_461] : memref<4x8x16x2xf32, #tpu.memory_space<vmem>>, vector<1x1x14x2xf32>
    %813 = vector.shape_cast %812 : vector<1x1x14x2xf32> to vector<14x2xf32>
    %814 = vector.broadcast %0 : f32 to vector<14x2xf32>
    %815 = arith.mulf %814, %813 : vector<14x2xf32>
    %816 = vector.broadcast %12 : f32 to vector<14x2xf32>
    %817 = arith.mulf %816, %813 : vector<14x2xf32>
    %c0_462 = arith.constant 0 : index
    %c7_463 = arith.constant 7 : index
    %c1_464 = arith.constant 1 : index
    %c0_465 = arith.constant 0 : index
    %818 = vector.load %arg1[%c0_462, %c7_463, %c1_464, %c0_465] : memref<4x8x16x2xf32, #tpu.memory_space<vmem>>, vector<1x1x14x2xf32>
    %819 = vector.shape_cast %818 : vector<1x1x14x2xf32> to vector<14x2xf32>
    %820 = vector.broadcast %1 : f32 to vector<14x2xf32>
    %821 = arith.mulf %820, %819 : vector<14x2xf32>
    %822 = arith.addf %815, %821 : vector<14x2xf32>
    %823 = vector.broadcast %13 : f32 to vector<14x2xf32>
    %824 = arith.mulf %823, %819 : vector<14x2xf32>
    %825 = arith.addf %817, %824 : vector<14x2xf32>
    %c0_466 = arith.constant 0 : index
    %c7_467 = arith.constant 7 : index
    %c2_468 = arith.constant 2 : index
    %c0_469 = arith.constant 0 : index
    %826 = vector.load %arg1[%c0_466, %c7_467, %c2_468, %c0_469] : memref<4x8x16x2xf32, #tpu.memory_space<vmem>>, vector<1x1x14x2xf32>
    %827 = vector.shape_cast %826 : vector<1x1x14x2xf32> to vector<14x2xf32>
    %828 = vector.broadcast %2 : f32 to vector<14x2xf32>
    %829 = arith.mulf %828, %827 : vector<14x2xf32>
    %830 = arith.addf %822, %829 : vector<14x2xf32>
    %831 = vector.broadcast %14 : f32 to vector<14x2xf32>
    %832 = arith.mulf %831, %827 : vector<14x2xf32>
    %833 = arith.addf %825, %832 : vector<14x2xf32>
    %c1_470 = arith.constant 1 : index
    %c7_471 = arith.constant 7 : index
    %c0_472 = arith.constant 0 : index
    %c0_473 = arith.constant 0 : index
    %834 = vector.load %arg1[%c1_470, %c7_471, %c0_472, %c0_473] : memref<4x8x16x2xf32, #tpu.memory_space<vmem>>, vector<1x1x14x2xf32>
    %835 = vector.shape_cast %834 : vector<1x1x14x2xf32> to vector<14x2xf32>
    %836 = vector.broadcast %3 : f32 to vector<14x2xf32>
    %837 = arith.mulf %836, %835 : vector<14x2xf32>
    %838 = arith.addf %830, %837 : vector<14x2xf32>
    %839 = vector.broadcast %15 : f32 to vector<14x2xf32>
    %840 = arith.mulf %839, %835 : vector<14x2xf32>
    %841 = arith.addf %833, %840 : vector<14x2xf32>
    %c1_474 = arith.constant 1 : index
    %c7_475 = arith.constant 7 : index
    %c1_476 = arith.constant 1 : index
    %c0_477 = arith.constant 0 : index
    %842 = vector.load %arg1[%c1_474, %c7_475, %c1_476, %c0_477] : memref<4x8x16x2xf32, #tpu.memory_space<vmem>>, vector<1x1x14x2xf32>
    %843 = vector.shape_cast %842 : vector<1x1x14x2xf32> to vector<14x2xf32>
    %844 = vector.broadcast %4 : f32 to vector<14x2xf32>
    %845 = arith.mulf %844, %843 : vector<14x2xf32>
    %846 = arith.addf %838, %845 : vector<14x2xf32>
    %847 = vector.broadcast %16 : f32 to vector<14x2xf32>
    %848 = arith.mulf %847, %843 : vector<14x2xf32>
    %849 = arith.addf %841, %848 : vector<14x2xf32>
    %c1_478 = arith.constant 1 : index
    %c7_479 = arith.constant 7 : index
    %c2_480 = arith.constant 2 : index
    %c0_481 = arith.constant 0 : index
    %850 = vector.load %arg1[%c1_478, %c7_479, %c2_480, %c0_481] : memref<4x8x16x2xf32, #tpu.memory_space<vmem>>, vector<1x1x14x2xf32>
    %851 = vector.shape_cast %850 : vector<1x1x14x2xf32> to vector<14x2xf32>
    %852 = vector.broadcast %5 : f32 to vector<14x2xf32>
    %853 = arith.mulf %852, %851 : vector<14x2xf32>
    %854 = arith.addf %846, %853 : vector<14x2xf32>
    %855 = vector.broadcast %17 : f32 to vector<14x2xf32>
    %856 = arith.mulf %855, %851 : vector<14x2xf32>
    %857 = arith.addf %849, %856 : vector<14x2xf32>
    %c2_482 = arith.constant 2 : index
    %c7_483 = arith.constant 7 : index
    %c0_484 = arith.constant 0 : index
    %c0_485 = arith.constant 0 : index
    %858 = vector.load %arg1[%c2_482, %c7_483, %c0_484, %c0_485] : memref<4x8x16x2xf32, #tpu.memory_space<vmem>>, vector<1x1x14x2xf32>
    %859 = vector.shape_cast %858 : vector<1x1x14x2xf32> to vector<14x2xf32>
    %860 = vector.broadcast %6 : f32 to vector<14x2xf32>
    %861 = arith.mulf %860, %859 : vector<14x2xf32>
    %862 = arith.addf %854, %861 : vector<14x2xf32>
    %863 = vector.broadcast %18 : f32 to vector<14x2xf32>
    %864 = arith.mulf %863, %859 : vector<14x2xf32>
    %865 = arith.addf %857, %864 : vector<14x2xf32>
    %c2_486 = arith.constant 2 : index
    %c7_487 = arith.constant 7 : index
    %c1_488 = arith.constant 1 : index
    %c0_489 = arith.constant 0 : index
    %866 = vector.load %arg1[%c2_486, %c7_487, %c1_488, %c0_489] : memref<4x8x16x2xf32, #tpu.memory_space<vmem>>, vector<1x1x14x2xf32>
    %867 = vector.shape_cast %866 : vector<1x1x14x2xf32> to vector<14x2xf32>
    %868 = vector.broadcast %7 : f32 to vector<14x2xf32>
    %869 = arith.mulf %868, %867 : vector<14x2xf32>
    %870 = arith.addf %862, %869 : vector<14x2xf32>
    %871 = vector.broadcast %19 : f32 to vector<14x2xf32>
    %872 = arith.mulf %871, %867 : vector<14x2xf32>
    %873 = arith.addf %865, %872 : vector<14x2xf32>
    %c2_490 = arith.constant 2 : index
    %c7_491 = arith.constant 7 : index
    %c2_492 = arith.constant 2 : index
    %c0_493 = arith.constant 0 : index
    %874 = vector.load %arg1[%c2_490, %c7_491, %c2_492, %c0_493] : memref<4x8x16x2xf32, #tpu.memory_space<vmem>>, vector<1x1x14x2xf32>
    %875 = vector.shape_cast %874 : vector<1x1x14x2xf32> to vector<14x2xf32>
    %876 = vector.broadcast %8 : f32 to vector<14x2xf32>
    %877 = arith.mulf %876, %875 : vector<14x2xf32>
    %878 = arith.addf %870, %877 : vector<14x2xf32>
    %879 = vector.broadcast %20 : f32 to vector<14x2xf32>
    %880 = arith.mulf %879, %875 : vector<14x2xf32>
    %881 = arith.addf %873, %880 : vector<14x2xf32>
    %c3_494 = arith.constant 3 : index
    %c7_495 = arith.constant 7 : index
    %c0_496 = arith.constant 0 : index
    %c0_497 = arith.constant 0 : index
    %882 = vector.load %arg1[%c3_494, %c7_495, %c0_496, %c0_497] : memref<4x8x16x2xf32, #tpu.memory_space<vmem>>, vector<1x1x14x2xf32>
    %883 = vector.shape_cast %882 : vector<1x1x14x2xf32> to vector<14x2xf32>
    %884 = vector.broadcast %9 : f32 to vector<14x2xf32>
    %885 = arith.mulf %884, %883 : vector<14x2xf32>
    %886 = arith.addf %878, %885 : vector<14x2xf32>
    %887 = vector.broadcast %21 : f32 to vector<14x2xf32>
    %888 = arith.mulf %887, %883 : vector<14x2xf32>
    %889 = arith.addf %881, %888 : vector<14x2xf32>
    %c3_498 = arith.constant 3 : index
    %c7_499 = arith.constant 7 : index
    %c1_500 = arith.constant 1 : index
    %c0_501 = arith.constant 0 : index
    %890 = vector.load %arg1[%c3_498, %c7_499, %c1_500, %c0_501] : memref<4x8x16x2xf32, #tpu.memory_space<vmem>>, vector<1x1x14x2xf32>
    %891 = vector.shape_cast %890 : vector<1x1x14x2xf32> to vector<14x2xf32>
    %892 = vector.broadcast %10 : f32 to vector<14x2xf32>
    %893 = arith.mulf %892, %891 : vector<14x2xf32>
    %894 = arith.addf %886, %893 : vector<14x2xf32>
    %895 = vector.broadcast %22 : f32 to vector<14x2xf32>
    %896 = arith.mulf %895, %891 : vector<14x2xf32>
    %897 = arith.addf %889, %896 : vector<14x2xf32>
    %c3_502 = arith.constant 3 : index
    %c7_503 = arith.constant 7 : index
    %c2_504 = arith.constant 2 : index
    %c0_505 = arith.constant 0 : index
    %898 = vector.load %arg1[%c3_502, %c7_503, %c2_504, %c0_505] : memref<4x8x16x2xf32, #tpu.memory_space<vmem>>, vector<1x1x14x2xf32>
    %899 = vector.shape_cast %898 : vector<1x1x14x2xf32> to vector<14x2xf32>
    %900 = vector.broadcast %11 : f32 to vector<14x2xf32>
    %901 = arith.mulf %900, %899 : vector<14x2xf32>
    %902 = arith.addf %894, %901 : vector<14x2xf32>
    %903 = vector.broadcast %23 : f32 to vector<14x2xf32>
    %904 = arith.mulf %903, %899 : vector<14x2xf32>
    %905 = arith.addf %897, %904 : vector<14x2xf32>
    %906 = vector.broadcast %811 : vector<1x2xf32> to vector<14x2xf32>
    %907 = arith.mulf %902, %906 : vector<14x2xf32>
    %908 = vector.broadcast %24 : f32 to vector<14x2xf32>
    %909 = arith.addf %907, %908 : vector<14x2xf32>
    %cst_506 = arith.constant 0.000000e+00 : f32
    %910 = vector.broadcast %cst_506 : f32 to vector<14x2xf32>
    %911 = arith.maximumf %909, %910 : vector<14x2xf32>
    %c0_507 = arith.constant 0 : index
    %c14_508 = arith.constant 14 : index
    %912 = vector.load %arg10[%c0_507, %c14_508] : memref<28x16xf32, #tpu.memory_space<vmem>>, vector<14x2xf32>
    tpu.vector_store %arg10[%c0_507, %c14_508], %911 {strides = array<i32>} : memref<28x16xf32, #tpu.memory_space<vmem>>, vector<14x2xf32>,
    %913 = vector.broadcast %811 : vector<1x2xf32> to vector<14x2xf32>
    %914 = arith.mulf %905, %913 : vector<14x2xf32>
    %915 = vector.broadcast %25 : f32 to vector<14x2xf32>
    %916 = arith.addf %914, %915 : vector<14x2xf32>
    %cst_509 = arith.constant 0.000000e+00 : f32
    %917 = vector.broadcast %cst_509 : f32 to vector<14x2xf32>
    %918 = arith.maximumf %916, %917 : vector<14x2xf32>
    %c14_510 = arith.constant 14 : index
    %c14_511 = arith.constant 14 : index
    %919 = vector.load %arg10[%c14_510, %c14_511] : memref<28x16xf32, #tpu.memory_space<vmem>>, vector<14x2xf32>
    tpu.vector_store %arg10[%c14_510, %c14_511], %918 {strides = array<i32>} : memref<28x16xf32, #tpu.memory_space<vmem>>, vector<14x2xf32>,
    %c0_512 = arith.constant 0 : index
    %c0_513 = arith.constant 0 : index
    %920 = vector.load %arg10[%c0_512, %c0_513] : memref<28x16xf32, #tpu.memory_space<vmem>>, vector<28x16xf32>
    %cst_514 = arith.constant dense<0.000000e+00> : vector<20x16xf32>
    %921 = tpu.matmul %29, %920, %cst_514 {dimension_numbers = #tpu.dot_dimension_numbers<[1], [0], [0], [1], [0, 0, 1, 1], [], []>} : vector<20x28xf32>, vector<28x16xf32>, vector<20x16xf32> -> vector<20x16xf32>
    %922 = vector.broadcast %30 : vector<20x1xf32> to vector<20x16xf32>
    %923 = arith.addf %921, %922 : vector<20x16xf32>
    %cst_515 = arith.constant 0.000000e+00 : f32
    %924 = vector.broadcast %cst_515 : f32 to vector<20x16xf32>
    %925 = arith.maximumf %923, %924 : vector<20x16xf32>
    %926 = vector.broadcast %31 : vector<20x1xf32> to vector<20x16xf32>
    %927 = arith.mulf %925, %926 : vector<20x16xf32>
    %cst_516 = arith.constant dense<0.000000e+00> : vector<16xf32>
    %928 = vector.multi_reduction <add>, %927, %cst_516 [0] : vector<20x16xf32> to vector<16xf32>
    %929 = vector.shape_cast %928 : vector<16xf32> to vector<1x16xf32>
    %930 = vector.extract_strided_slice %929 {offsets = [0, 0], sizes = [1, 2], strides = [1, 1]} : vector<1x16xf32> to vector<1x2xf32>
    %c0_517 = arith.constant 0 : index
    %c0_518 = arith.constant 0 : index
    %931 = vector.load %arg11[%c0_517, %c0_518] : memref<8x2xf32, #tpu.memory_space<vmem>>, vector<1x2xf32>
    tpu.vector_store %arg11[%c0_517, %c0_518], %930 {strides = array<i32>} : memref<8x2xf32, #tpu.memory_space<vmem>>, vector<1x2xf32>,
    %932 = vector.extract_strided_slice %929 {offsets = [0, 2], sizes = [1, 2], strides = [1, 1]} : vector<1x16xf32> to vector<1x2xf32>
    %c1_519 = arith.constant 1 : index
    %c0_520 = arith.constant 0 : index
    %933 = vector.load %arg11[%c1_519, %c0_520] : memref<8x2xf32, #tpu.memory_space<vmem>>, vector<1x2xf32>
    tpu.vector_store %arg11[%c1_519, %c0_520], %932 {strides = array<i32>} : memref<8x2xf32, #tpu.memory_space<vmem>>, vector<1x2xf32>,
    %934 = vector.extract_strided_slice %929 {offsets = [0, 4], sizes = [1, 2], strides = [1, 1]} : vector<1x16xf32> to vector<1x2xf32>
    %c2_521 = arith.constant 2 : index
    %c0_522 = arith.constant 0 : index
    %935 = vector.load %arg11[%c2_521, %c0_522] : memref<8x2xf32, #tpu.memory_space<vmem>>, vector<1x2xf32>
    tpu.vector_store %arg11[%c2_521, %c0_522], %934 {strides = array<i32>} : memref<8x2xf32, #tpu.memory_space<vmem>>, vector<1x2xf32>,
    %936 = vector.extract_strided_slice %929 {offsets = [0, 6], sizes = [1, 2], strides = [1, 1]} : vector<1x16xf32> to vector<1x2xf32>
    %c3_523 = arith.constant 3 : index
    %c0_524 = arith.constant 0 : index
    %937 = vector.load %arg11[%c3_523, %c0_524] : memref<8x2xf32, #tpu.memory_space<vmem>>, vector<1x2xf32>
    tpu.vector_store %arg11[%c3_523, %c0_524], %936 {strides = array<i32>} : memref<8x2xf32, #tpu.memory_space<vmem>>, vector<1x2xf32>,
    %938 = vector.extract_strided_slice %929 {offsets = [0, 8], sizes = [1, 2], strides = [1, 1]} : vector<1x16xf32> to vector<1x2xf32>
    %c4_525 = arith.constant 4 : index
    %c0_526 = arith.constant 0 : index
    %939 = vector.load %arg11[%c4_525, %c0_526] : memref<8x2xf32, #tpu.memory_space<vmem>>, vector<1x2xf32>
    tpu.vector_store %arg11[%c4_525, %c0_526], %938 {strides = array<i32>} : memref<8x2xf32, #tpu.memory_space<vmem>>, vector<1x2xf32>,
    %940 = vector.extract_strided_slice %929 {offsets = [0, 10], sizes = [1, 2], strides = [1, 1]} : vector<1x16xf32> to vector<1x2xf32>
    %c5_527 = arith.constant 5 : index
    %c0_528 = arith.constant 0 : index
    %941 = vector.load %arg11[%c5_527, %c0_528] : memref<8x2xf32, #tpu.memory_space<vmem>>, vector<1x2xf32>
    tpu.vector_store %arg11[%c5_527, %c0_528], %940 {strides = array<i32>} : memref<8x2xf32, #tpu.memory_space<vmem>>, vector<1x2xf32>,
    %942 = vector.extract_strided_slice %929 {offsets = [0, 12], sizes = [1, 2], strides = [1, 1]} : vector<1x16xf32> to vector<1x2xf32>
    %c6_529 = arith.constant 6 : index
    %c0_530 = arith.constant 0 : index
    %943 = vector.load %arg11[%c6_529, %c0_530] : memref<8x2xf32, #tpu.memory_space<vmem>>, vector<1x2xf32>
    tpu.vector_store %arg11[%c6_529, %c0_530], %942 {strides = array<i32>} : memref<8x2xf32, #tpu.memory_space<vmem>>, vector<1x2xf32>,
    %944 = vector.extract_strided_slice %929 {offsets = [0, 14], sizes = [1, 2], strides = [1, 1]} : vector<1x16xf32> to vector<1x2xf32>
    %c7_531 = arith.constant 7 : index
    %c0_532 = arith.constant 0 : index
    %945 = vector.load %arg11[%c7_531, %c0_532] : memref<8x2xf32, #tpu.memory_space<vmem>>, vector<1x2xf32>
    tpu.vector_store %arg11[%c7_531, %c0_532], %944 {strides = array<i32>} : memref<8x2xf32, #tpu.memory_space<vmem>>, vector<1x2xf32>,
    %c0_533 = arith.constant 0 : index
    %c0_534 = arith.constant 0 : index
    %946 = vector.load %arg11[%c0_533, %c0_534] : memref<8x2xf32, #tpu.memory_space<vmem>>, vector<8x2xf32>
    %c0_535 = arith.constant 0 : index
    %c0_536 = arith.constant 0 : index
    %947 = vector.load %arg2[%c0_535, %c0_536] : memref<8x2xf32, #tpu.memory_space<vmem>>, vector<8x2xf32>
    %948 = vector.broadcast %26 : f32 to vector<8x2xf32>
    %949 = arith.mulf %948, %947 : vector<8x2xf32>
    %950 = arith.addf %946, %949 : vector<8x2xf32>
    %951 = vector.broadcast %27 : f32 to vector<8x2xf32>
    %952 = arith.addf %950, %951 : vector<8x2xf32>
    %cst_537 = arith.constant dense<0xFF800000> : vector<2xf32>
    %953 = vector.multi_reduction <maximumf>, %952, %cst_537 [0] : vector<8x2xf32> to vector<2xf32>
    %954 = vector.shape_cast %953 : vector<2xf32> to vector<1x2xf32>
    %955 = vector.broadcast %28 : f32 to vector<1x2xf32>
    %956 = arith.maximumf %954, %955 : vector<1x2xf32>
    %957 = vector.broadcast %956 : vector<1x2xf32> to vector<8x2xf32>
    %958 = arith.subf %952, %957 : vector<8x2xf32>
    %959 = math.exp %958 : vector<8x2xf32>
    %960 = vector.broadcast %28 : f32 to vector<1x2xf32>
    %961 = arith.subf %960, %956 : vector<1x2xf32>
    %962 = math.exp %961 : vector<1x2xf32>
    %cst_538 = arith.constant dense<0.000000e+00> : vector<2xf32>
    %963 = vector.multi_reduction <add>, %959, %cst_538 [0] : vector<8x2xf32> to vector<2xf32>
    %964 = vector.shape_cast %963 : vector<2xf32> to vector<1x2xf32>
    %965 = arith.addf %964, %962 : vector<1x2xf32>
    %966 = tpu.reciprocal %965 : vector<1x2xf32> -> vector<1x2xf32>
    %967 = arith.mulf %962, %966 : vector<1x2xf32>
    %c0_539 = arith.constant 0 : index
    %c0_540 = arith.constant 0 : index
    %968 = vector.load %arg9[%c0_539, %c0_540] : memref<9x2xf32, #tpu.memory_space<vmem>>, vector<1x2xf32>
    tpu.vector_store %arg9[%c0_539, %c0_540], %967 {strides = array<i32>} : memref<9x2xf32, #tpu.memory_space<vmem>>, vector<1x2xf32>,
    %969 = vector.broadcast %966 : vector<1x2xf32> to vector<8x2xf32>
    %970 = arith.mulf %959, %969 : vector<8x2xf32>
    %c1_541 = arith.constant 1 : index
    %c0_542 = arith.constant 0 : index
    %971 = vector.load %arg9[%c1_541, %c0_542] : memref<9x2xf32, #tpu.memory_space<vmem>>, vector<8x2xf32>
    tpu.vector_store %arg9[%c1_541, %c0_542], %970 {strides = array<i32>} : memref<9x2xf32, #tpu.memory_space<vmem>>, vector<8x2xf32>,
    return
  }
  func.func @transform_0(%arg0: i32) -> (i32, i32, i32, i32) {
    %c0_i32 = arith.constant 0 : i32
    %c0_i32_0 = arith.constant 0 : i32
    %c0_i32_1 = arith.constant 0 : i32
    %c0_i32_2 = arith.constant 0 : i32
    return %c0_i32, %c0_i32_0, %c0_i32_1, %arg0 : i32, i32, i32, i32
  }
  func.func @transform_1(%arg0: i32) -> (i32, i32) {
    %c0_i32 = arith.constant 0 : i32
    %c0_i32_0 = arith.constant 0 : i32
    return %c0_i32, %arg0 : i32, i32
  }
  func.func @transform_2(%arg0: i32) -> (i32, i32) {
    %c0_i32 = arith.constant 0 : i32
    %c0_i32_0 = arith.constant 0 : i32
    %c0_i32_1 = arith.constant 0 : i32
    return %c0_i32, %c0_i32_0 : i32, i32
  }
  func.func @transform_3(%arg0: i32) -> (i32, i32) {
    %c0_i32 = arith.constant 0 : i32
    %c0_i32_0 = arith.constant 0 : i32
    %c0_i32_1 = arith.constant 0 : i32
    return %c0_i32, %c0_i32_0 : i32, i32
  }
  func.func @transform_4(%arg0: i32) -> (i32, i32) {
    %c0_i32 = arith.constant 0 : i32
    %c0_i32_0 = arith.constant 0 : i32
    %c0_i32_1 = arith.constant 0 : i32
    return %c0_i32, %c0_i32_0 : i32, i32
  }
  func.func @transform_5(%arg0: i32) -> (i32, i32) {
    %c0_i32 = arith.constant 0 : i32
    %c0_i32_0 = arith.constant 0 : i32
    %c0_i32_1 = arith.constant 0 : i32
    return %c0_i32, %c0_i32_0 : i32, i32
  }
  func.func @transform_6(%arg0: i32) -> (i32, i32) {
    %c0_i32 = arith.constant 0 : i32
    %c0_i32_0 = arith.constant 0 : i32
    %c0_i32_1 = arith.constant 0 : i32
    return %c0_i32, %c0_i32_0 : i32, i32
  }
  func.func @transform_7(%arg0: i32) -> (i32, i32) {
    %c0_i32 = arith.constant 0 : i32
    %c0_i32_0 = arith.constant 0 : i32
    %c0_i32_1 = arith.constant 0 : i32
    return %c0_i32, %c0_i32_0 : i32, i32
  }
  func.func @transform_8(%arg0: i32) -> (i32, i32) {
    %c0_i32 = arith.constant 0 : i32
    %c0_i32_0 = arith.constant 0 : i32
    return %c0_i32, %arg0 : i32, i32
  }
}

</mosaic_0001>

<bundles_post_ra>
// kernel: tpu_custom_call.1
= control target key start
LH: loop header
LB: loop body
LE: loop exit
PB: predicated region body
PF: predicated region fallthrough
CT: control target
= control target key end

     0   :  { %13 = vsyncpa [#allocation5], 0  ;;  %s4223_s0 = inlined_call_operand.vmem [shape: f32[4,8,16,2], index: 0, kind: input, shape index: {}]   ;;  %s4224_s1 = inlined_call_operand.vmem [shape: f32[8,2], index: 1, kind: input, shape index: {}]   ;;  %s4225_s2 = inlined_call_operand.vmem [shape: f32[2,12], index: 2, kind: input, shape index: {}]   ;;  %s4226_s3 = inlined_call_operand.vmem [shape: f32[1,2], index: 3, kind: input, shape index: {}]   ;;  %s4227_s4 = inlined_call_operand.vmem [shape: f32[20,28], index: 4, kind: input, shape index: {}]   ;;  %s4228_s5 = inlined_call_operand.vmem [shape: f32[20,1], index: 5, kind: input, shape index: {}]   ;;  %s4229_s6 = inlined_call_operand.vmem [shape: f32[20,1], index: 6, kind: input, shape index: {}]   ;;  %s4230_s7 = inlined_call_operand.vmem [shape: f32[1,3], index: 7, kind: input, shape index: {}]   ;;  %s4231_s8 = inlined_call_operand.vmem [shape: f32[9,2], index: 8, kind: output, shape index: {}]  }
   0x1   :  { %14 = vsyncpa [#allocation7], 0  ;;  %s35_s29 = sshll.u32 %s4226_s3, 4  ;;  %s25_s10 = sshll.u32 %s4225_s2, 4  ;;  %s36_s29 = int_to_ptr.vmem [resolvable:$true] %s35_s29  ;;  %s26_s10 = int_to_ptr.vmem [resolvable:$true] %s25_s10 }
   0x2   :  { %s1910_s11 = scalar_lea.vmem %s36_s29, 16  ;;  %p1915_p1 = scmp.lt.s32.totalorder %s36_s29, %s36_s29 }
   0x3   :  { %p1911_p0 = scmp.ne.s32.totalorder %s36_s29, %s1910_s11  ;;  %p1916_p2 = scmp.lt.s32.totalorder %s1910_s11, %s1910_s11 }
   0x5   :  { %p1917_p3 = por %p1916_p2, %p1915_p1 }
   0x7   :  { %p1918_p4 = pnand %p1917_p3, %p1911_p0 }
   0x9   :  { %1921 = shalt.err (!%p1918_p4)
}
   0xa   :  { %s1950_s12 = smov [#allocation6]   ;;  %s1922_s13 = scalar_lea.vmem %s26_s10, 32 }
   0xb   :  { %38 = dma.vmem_to_smem %s36_s29, 16, %s1950_s12, [#allocation7]  }
   0xc   :  { %p1923_p5 = scmp.ne.s32.totalorder %s26_s10, %s1922_s13  ;;  %p1927_p6 = scmp.lt.s32.totalorder %s26_s10, %s26_s10 }
   0xd   :  { %p1928_p7 = scmp.lt.s32.totalorder %s1922_s13, %s1922_s13 }
   0xf   :  { %p1929_p8 = por %p1928_p7, %p1927_p6 }
  0x11   :  { %p1930_p9 = pnand %p1929_p8, %p1923_p5 }
  0x13   :  { %1933 = shalt.err (!%p1930_p9)
}
  0x14   :  { %s1951_s3 = smov [#allocation4]   ;;  %s51_s15 = sshll.u32 %s4230_s7, 4  ;;  %s52_s15 = int_to_ptr.vmem [resolvable:$true] %s51_s15 }
  0x15   :  { %28 = dma.vmem_to_smem %s26_s10, 32, %s1951_s3, [#allocation5]  }
  0x16   :  { %s1934_s16 = scalar_lea.vmem %s52_s15, 16  ;;  %p1939_p11 = scmp.lt.s32.totalorder %s52_s15, %s52_s15 }
  0x17   :  { %p1935_p10 = scmp.ne.s32.totalorder %s52_s15, %s1934_s16  ;;  %p1940_p12 = scmp.lt.s32.totalorder %s1934_s16, %s1934_s16 }
  0x19   :  { %p1941_p13 = por %p1940_p12, %p1939_p11 }
  0x1b   :  { %p1942_p0 = pnand %p1941_p13, %p1935_p10 }
  0x1d   :  { %1945 = shalt.err (!%p1942_p0)
}
  0x1e   :  { %s1952_s17 = smov [#allocation8]  }
  0x1f   :  { %54 = dma.vmem_to_smem %s52_s15, 16, %s1952_s17, [#allocation7]  }
  0x20   :  { %1946 = dma.done.wait [#allocation5], 32  }
  0x21   :  { %1947 = vsyncadd [#allocation5], 4294967264 }
  0x22   :  { %1948 = dma.done.wait [#allocation7], 32  }
  0x23   :  { %1949 = vsyncadd [#allocation7], 4294967264 }
  0x24   :  { %64 = sfence }
  0x25   :  { %s1622_s18 = sld [smem:[#allocation4 + $0x80]]  ;;  %v1655_v0 = vld [vmem:[%s4223_s0 + $0x1f] sm:$0x1]  ;;  %v2030_v1 = vld [vmem:[%s4223_s0 + $0x18] sm:$0x3f]  ;;  %v2035_v2 = vld [vmem:[%s4223_s0 + $0x10] sm:$0xff]  ;;  %v248_v3 = vlaneseq }
  0x26   :  { %s1623_s7 = sld [smem:[#allocation4 + $0x81]]  ;;  %1888 = vrcp.f32 %v1655_v0  ;;  %v2042_v4 = vld [vmem:[%s4223_s0 + $0x19] sm:$0x3f]  ;;  %v2069_v11 = vld [vmem:[%s4223_s0 + $0x11] sm:$0xff]  ;;  %s1953_s14 = smov 2   ;;  %vm1961_vm0 = vmmov 0  }
  0x27   :  { %s1624_s21 = sld [smem:[#allocation4 + $0x82]]  ;;  %v2051_v6 = vld [vmem:[%s4223_s0 + $0x1a] sm:$0x3f]  ;;  %v2074_v12 = vld [vmem:[%s4223_s0 + $0x12] sm:$0xff]  ;;  %v249_v19 = vshrl.u32 %v248_v3, 7  ;;  %s1956_s25 = smov 8  }
  0x28   :  { %s1625_s22 = sld [smem:[#allocation4 + $0x83]]  ;;  %v2062_v9 = vld [vmem:[%s4223_s0 + $0x98] sm:$0x3f]  ;;  %v2092_v17 = vld [vmem:[%s4223_s0 + $0x90] sm:$0xff]  ;;  %s1957_s11 = smov 10   ;;  %vm261_vm1 = vcmask 13312  }
  0x29   :  { %s1626_s23 = sld [smem:[#allocation4 + $0x84]]  ;;  %v2085_v15 = vld [vmem:[%s4223_s0 + $0x99] sm:$0x3f]  ;;  %v2105_v22 = vld [vmem:[%s4223_s0 + $0x91] sm:$0xff]  ;;  %v2147_v38 = vsub.s32 0, %v249_v19  ;;  %vm414_vm2 = vcmask 29712  }
  0x2a   :  { %s2037_s28 = sld [smem:[#allocation4 + $0x85]]  ;;  %v2116_v26 = vld [vmem:[%s4223_s0 + $0x9a] sm:$0x3f]  ;;  %v2130_v31 = vld [vmem:[%s4223_s0 + $0x92] sm:$0xff]  ;;  %v1680_v19 = vld [vmem:[%s4223_s0 + $0x2f] sm:$0x1] }
  0x2b   :  { %s2044_s9 = sld [smem:[#allocation4 + $0x86]]  ;;  %v2046_v5 = vstv %s1622_s18  ;;  %v2140_v34 = vld [vmem:[%s4223_s0 + $0x118] sm:$0x3f]  ;;  %4407 = vst [vmem:[#allocation19_spill] sm:$0xff] %v2147_v38  ;;  %v2161_v41 = vld [vmem:[%s4223_s0 + $0x110] sm:$0xff]  ;;  %1890 = vrcp.f32 %v1680_v19  ;;  %vm574_vm3 = vcmask 46112  }
  0x2c   :  { %4399 = vst [vmem:[#allocation11_spill] sm:$0xff] %v2046_v5  ;;  %s2053_s12 = sld [smem:[#allocation4 + $0x87]]  ;;  %v2055_v7 = vstv %s1623_s7  ;;  %v280_v8 = vmul.f32 %v2030_v1, %v2046_v5  ;;  %v279_v10 = vmul.f32 %v2035_v2, %v2046_v5  ;;  %v2154_v40 = vld [vmem:[%s4223_s0 + $0x119] sm:$0x3f]  ;;  %v2178_v48 = vld [vmem:[%s4223_s0 + $0x111] sm:$0xff]  ;;  %vm734_vm4 = vcmask 62512  }
  0x2d   :  { %4400 = vst [vmem:[#allocation12_spill] sm:$0xff] %v2055_v7  ;;  %s2076_s17 = sld [smem:[#allocation4 + $0x88]]  ;;  %v2078_v13 = vstv %s1624_s21  ;;  %v288_v14 = vmul.f32 %v2042_v4, %v2055_v7  ;;  %v287_v16 = vmul.f32 %v2069_v11, %v2055_v7  ;;  %v2169_v45 = vld [vmem:[%s4223_s0 + $0x11a] sm:$0x3f]  ;;  %v2207_v57 = vld [vmem:[%s4223_s0 + $0x112] sm:$0xff]  ;;  %vm894_vm5 = vcmask 78912  }
  0x2e   :  { %4401 = vst [vmem:[#allocation13_spill] sm:$0xff] %v2078_v13  ;;  %s2094_s24 = sld [smem:[#allocation4 + $0x89]]  ;;  %v2096_v18 = vstv %s1625_s22  ;;  %v298_v20 = vmul.f32 %v2051_v6, %v2078_v13  ;;  %v297_v21 = vmul.f32 %v2074_v12, %v2078_v13  ;;  %v2188_v51 = vld [vmem:[%s4223_s0 + $0x198] sm:$0x3f]  ;;  %v2212_v58 = vld [vmem:[%s4223_s0 + $0x190] sm:$0xff]  ;;  %s1955_s22 = smov 6  }
  0x2f   :  { %4402 = vst [vmem:[#allocation14_spill] sm:$0xff] %v2096_v18  ;;  %s2107_s26 = sld [smem:[#allocation4 + $0x8a]]  ;;  %v2109_v23 = vstv %s1626_s23  ;;  %v290_v24 = vadd.f32 %v288_v14, %v280_v8  ;;  %v309_v25 = vmul.f32 %v2062_v9, %v2096_v18  ;;  %v289_v27 = vadd.f32 %v287_v16, %v279_v10  ;;  %v2198_v54 = vld [vmem:[%s4223_s0 + $0x199] sm:$0x3f]  ;;  %v2240_v14 = vld [vmem:[%s4223_s0 + $0x191] sm:$0xff]  ;;  %s1966_s15 = smov 122  }
  0x30   :  { %4403 = vst [vmem:[#allocation15_spill] sm:$0xff] %v2109_v23  ;;  %s2118_s29 = sld [smem:[#allocation4 + $0x8b]]  ;;  %v2121_v28 = vstv %s2037_s28  ;;  %v319_v29 = vmul.f32 %v2085_v15, %v2109_v23  ;;  %v308_v30 = vmul.f32 %v2092_v17, %v2096_v18  ;;  %v318_v36 = vmul.f32 %v2105_v22, %v2109_v23  ;;  %v2221_v61 = vld [vmem:[%s4223_s0 + $0x19a] sm:$0x3f]  ;;  %v2245_v16 = vld [vmem:[%s4223_s0 + $0x192] sm:$0xff] }
  0x31   :  { %4404 = vst [vmem:[#allocation16_spill] sm:$0xff] %v2121_v28  ;;  %s2132_s10 = sld [smem:[#allocation6 + $0x1]]  ;;  %v2135_v32 = vstv %s2044_s9  ;;  %v300_v33 = vadd.f32 %v298_v20, %v290_v24  ;;  %v299_v35 = vadd.f32 %v297_v21, %v289_v27  ;;  %v329_v39 = vmul.f32 %v2116_v26, %v2121_v28 }
  0x32   :  { %4405 = vst [vmem:[#allocation17_spill] sm:$0xff] %v2135_v32  ;;  %v2145_v37 = vstv %s2053_s12  ;;  %s2156_s3 = sld [smem:[#allocation4]]  ;;  %v328_v47 = vmul.f32 %v2130_v31, %v2121_v28  ;;  %v340_v50 = vmul.f32 %v2140_v34, %v2135_v32  ;;  %v339_v56 = vmul.f32 %v2161_v41, %v2135_v32  ;;  %s1964_s12 = smov 126  }
  0x33   :  { %4406 = vst [vmem:[#allocation18_spill] sm:$0xff] %v2145_v37  ;;  %v1889_v42 = vpop.eup %1888  ;;  %v2164_v43 = vstv %s2076_s17  ;;  %v311_v44 = vadd.f32 %v309_v25, %v300_v33  ;;  %s2171_s16 = sld [smem:[#allocation4 + $0x1]]  ;;  %v310_v46 = vadd.f32 %v308_v30, %v299_v35  ;;  %v350_v59 = vmul.f32 %v2154_v40, %v2145_v37 }
  0x34   :  { %4408 = vst [vmem:[#allocation20_spill] sm:$0xff] %v2164_v43  ;;  %v2181_v49 = vstv %s2094_s24  ;;  %s2190_s7 = sld [smem:[#allocation4 + $0x2]]  ;;  %v360_v60 = vmul.f32 %v2169_v45, %v2164_v43  ;;  %v2224_v62 = vrot.slane %v1889_v42, %v2147_v38  ;;  %v349_v63 = vmul.f32 %v2178_v48, %v2145_v37 }
  0x35   :  { %4409 = vst [vmem:[#allocation21_spill] sm:$0xff] %v2181_v49  ;;  %v2193_v52 = vstv %s2107_s26  ;;  %v321_v53 = vadd.f32 %v319_v29, %v311_v44  ;;  %s2200_s24 = sld [smem:[#allocation4 + $0x3]]  ;;  %v320_v55 = vadd.f32 %v318_v36, %v310_v46  ;;  %v371_v8 = vmul.f32 %v2188_v51, %v2181_v49  ;;  %s1958_s26 = smov 12  }
  0x36   :  { %4410 = vst [vmem:[#allocation22_spill] sm:$0xff] %v2193_v52  ;;  %4411 = vst [vmem:[#allocation23_spill] sm:$0xff] %v2224_v62  ;;  %s2226_s28 = sld [smem:[#allocation4 + $0x4]]  ;;  %v2231_v0 = vstv %s2118_s29  ;;  %v381_v21 = vmul.f32 %v2198_v54, %v2193_v52  ;;  %v359_v24 = vmul.f32 %v2207_v57, %v2164_v43  ;;  %v370_v25 = vmul.f32 %v2212_v58, %v2181_v49  ;;  %s1965_s29 = smov 120  }
  0x37   :  { %4412 = vst [vmem:[#allocation24_spill] sm:$0xff] %v2231_v0  ;;  %v331_v3 = vadd.f32 %v329_v39, %v321_v53  ;;  %s2235_s9 = sld [smem:[#allocation4 + $0x5]]  ;;  %v330_v10 = vadd.f32 %v328_v47, %v320_v55  ;;  %v2251_v20 = vstv %s2132_s10  ;;  %v391_v35 = vmul.f32 %v2221_v61, %v2231_v0 }
  0x38   :  { %s2255_s18 = sld [smem:[#allocation4 + $0x6]]  ;;  %v2264_v29 = vstv %s2156_s3  ;;  %v380_v36 = vmul.f32 %v2240_v14, %v2193_v52  ;;  %v390_v39 = vmul.f32 %v2245_v16, %v2231_v0  ;;  %vm1054_vm6 = vcmask 95312  }
  0x39   :  { %v342_v27 = vadd.f32 %v340_v50, %v331_v3  ;;  %s2261_s19 = sld [smem:[#allocation4 + $0x7]]  ;;  %v2267_v30 = vstv %s2171_s16  ;;  %v341_v33 = vadd.f32 %v339_v56, %v330_v10  ;;  %v2287_v50 = vmul.f32 %v2030_v1, %v2264_v29 }
  0x3a   :  { %s2271_s10 = sld [smem:[#allocation4 + $0x8]]  ;;  %v2278_v44 = vstv %s2190_s7  ;;  %v2291_v53 = vmul.f32 %v2042_v4, %v2267_v30  ;;  %v2295_v55 = vmul.f32 %v2035_v2, %v2264_v29  ;;  %v2299_v56 = vmul.f32 %v2069_v11, %v2267_v30 }
  0x3b   :  { %v352_v42 = vadd.f32 %v350_v59, %v342_v27  ;;  %s1619_s3 = sld [smem:[#allocation4 + $0x9]]  ;;  %v2281_v46 = vstv %s2200_s24  ;;  %v351_v47 = vadd.f32 %v349_v63, %v341_v33  ;;  %v2309_v4 = vmul.f32 %v2051_v6, %v2278_v44 }
  0x3c   :  { %s2283_s16 = sld [smem:[#allocation4 + $0xa]]  ;;  %4413 = vst [vmem:[#allocation25_spill] sm:$0xff] %v2295_v55  ;;  %4414 = vst [vmem:[#allocation26_spill] sm:$0xff] %v2299_v56  ;;  %v2302_v63 = vstv %s2226_s28  ;;  %v2313_v2 = vmul.f32 %v2062_v9, %v2281_v46  ;;  %v2317_v11 = vmul.f32 %v2074_v12, %v2278_v44  ;;  %v2484_v56 = vld [vmem:[%s4223_s0 + $0x1a8] sm:$0x3f]  ;;  %vm259_vm7 = vcmask 15360  }
  0x3d   :  { %v362_v59 = vadd.f32 %v360_v60, %v352_v42  ;;  %s1621_s17 = sld [smem:[#allocation4 + $0xb]]  ;;  %4415 = vst [vmem:[#allocation27_spill] sm:$0xff] %v2302_v63  ;;  %v2305_v3 = vstv %s2235_s9  ;;  %v361_v1 = vadd.f32 %v359_v24, %v351_v47  ;;  %v2321_v60 = vmul.f32 %v2092_v17, %v2281_v46  ;;  %v2353_v42 = vld [vmem:[%s4223_s0 + $0x28] sm:$0x3f]  ;;  %4448 = vst [vmem:[#allocation60_spill] sm:$0xff] %v2484_v56 }
  0x3e   :  { %4416 = vst [vmem:[#allocation28_spill] sm:$0xff] %v2305_v3  ;;  %4417 = vst [vmem:[#allocation29_spill] sm:$0xff] %v2317_v11  ;;  %v2324_v19 = vstv %s2255_s18  ;;  %v2331_v6 = vmul.f32 %v2085_v15, %v2302_v63  ;;  %v2335_v9 = vmul.f32 %v2116_v26, %v2305_v3  ;;  %v2339_v12 = vmul.f32 %v2105_v22, %v2302_v63  ;;  %v2489_v55 = vld [vmem:[%s4223_s0 + $0x1a9] sm:$0x3f]  ;;  %s1967_s18 = smov 116  }
  0x3f   :  { %4418 = vst [vmem:[#allocation30_spill] sm:$0xff] %v2321_v60  ;;  %v373_v10 = vadd.f32 %v371_v8, %v362_v59  ;;  %4419 = vst [vmem:[#allocation31_spill] sm:$0xff] %v2324_v19  ;;  %v2327_v24 = vstv %s2261_s19  ;;  %v372_v27 = vadd.f32 %v370_v25, %v361_v1  ;;  %v2343_v17 = vmul.f32 %v2130_v31, %v2305_v3  ;;  %v2464_v60 = vld [vmem:[%s4223_s0 + $0x39] sm:$0x3f]  ;;  %v2783_v63 = vld [vmem:[%s4223_s0 + $0x1c9] sm:$0x3f] }
  0x40   :  { %4420 = vst [vmem:[#allocation32_spill] sm:$0xff] %v2327_v24  ;;  %4421 = vst [vmem:[#allocation33_spill] sm:$0xff] %v2335_v9  ;;  %v2346_v33 = vstv %s2271_s10  ;;  %v2357_v26 = vmul.f32 %v2140_v34, %v2324_v19  ;;  %v2361_v22 = vmul.f32 %v2154_v40, %v2327_v24  ;;  %v2365_v31 = vmul.f32 %v2161_v41, %v2324_v19  ;;  %v2379_v34 = vld [vmem:[%s4223_s0 + $0x2a] sm:$0x3f]  ;;  %v2703_v9 = vld [vmem:[%s4223_s0 + $0x1a2] sm:$0xff]  ;;  %s2845_s19 = sld [smem:[#allocation6]] }
  0x41   :  { %4422 = vst [vmem:[#allocation34_spill] sm:$0xff] %v2339_v12  ;;  %4423 = vst [vmem:[#allocation35_spill] sm:$0xff] %v2343_v17  ;;  %v383_v8 = vadd.f32 %v381_v21, %v373_v10  ;;  %v2348_v25 = vstv %s1619_s3  ;;  %v382_v15 = vadd.f32 %v380_v36, %v372_v27  ;;  %v2369_v21 = vmul.f32 %v2178_v48, %v2327_v24  ;;  %v2374_v36 = vld [vmem:[%s4223_s0 + $0x29] sm:$0x3f]  ;;  %s1954_s10 = smov 4  }
  0x42   :  { %4424 = vst [vmem:[#allocation36_spill] sm:$0xff] %v2346_v33  ;;  %4425 = vst [vmem:[#allocation37_spill] sm:$0xff] %v2348_v25  ;;  %v2382_v47 = vstv %s2283_s16  ;;  %v2388_v48 = vmul.f32 %v2169_v45, %v2346_v33  ;;  %v2392_v1 = vmul.f32 %v2188_v51, %v2348_v25  ;;  %v2396_v10 = vmul.f32 %v2207_v57, %v2346_v33  ;;  %v2403_v27 = vld [vmem:[%s4223_s0 + $0xa8] sm:$0x3f]  ;;  %v2585_v33 = vld [vmem:[%s4223_s0 + $0xa0] sm:$0xff] }
  0x43   :  { %4426 = vst [vmem:[#allocation38_spill] sm:$0xff] %v2357_v26  ;;  %4427 = vst [vmem:[#allocation39_spill] sm:$0xff] %v2361_v22  ;;  %v393_v40 = vadd.f32 %v391_v35, %v383_v8  ;;  %v2384_v59 = vstv %s1621_s17  ;;  %v392_v41 = vadd.f32 %v390_v39, %v382_v15  ;;  %v440_v35 = vmul.f32 %v2353_v42, %v2046_v5  ;;  %v2414_v57 = vld [vmem:[%s4223_s0 + $0xa9] sm:$0x3f] }
  0x44   :  { %4428 = vst [vmem:[#allocation40_spill] sm:$0xff] %v2365_v31  ;;  %4429 = vst [vmem:[#allocation41_spill] sm:$0xff] %v2369_v21  ;;  %v448_v51 = vmul.f32 %v2374_v36, %v2055_v7  ;;  %v458_v8 = vmul.f32 %v2379_v34, %v2078_v13  ;;  %v2419_v15 = vld [vmem:[%s4223_s0 + $0xaa] sm:$0x3f]  ;;  %v2436_v21 = vmul.f32 %v2212_v58, %v2348_v25  ;;  %v2526_v25 = vld [vmem:[%s4223_s0 + $0xba] sm:$0x3f] }
  0x45   :  { %4430 = vst [vmem:[#allocation42_spill] sm:$0xff] %v2382_v47  ;;  %4431 = vst [vmem:[#allocation43_spill] sm:$0xff] %v2384_v59  ;;  %v417_v39 = vmul.f32 %v2224_v62, %v393_v40  ;;  %v416_v45 = vmul.f32 %v2224_v62, %v392_v41  ;;  %v2424_v40 = vld [vmem:[%s4223_s0 + $0x128] sm:$0x3f]  ;;  %v2428_v41 = vmul.f32 %v2198_v54, %v2382_v47  ;;  %vm1214_vm8 = vcmask 111712  }
  0x46   :  { %4432 = vst [vmem:[#allocation44_spill] sm:$0xff] %v2388_v48  ;;  %4433 = vst [vmem:[#allocation45_spill] sm:$0xff] %v2392_v1  ;;  %v2440_v31 = vmul.f32 %v2240_v14, %v2382_v47  ;;  %v2445_v17 = vld [vmem:[%s4223_s0 + $0x129] sm:$0x3f]  ;;  %v469_v14 = vmul.f32 %v2403_v27, %v2096_v18  ;;  %v500_v11 = vmul.f32 %v2424_v40, %v2135_v32  ;;  %v2506_v47 = vld [vmem:[%s4223_s0 + $0xb8] sm:$0x3f] }
  0x47   :  { %4434 = vst [vmem:[#allocation46_spill] sm:$0xff] %v2396_v10  ;;  %4435 = vst [vmem:[#allocation47_spill] sm:$0xff] %v2414_v57  ;;  %v2432_v10 = vmul.f32 %v2221_v61, %v2384_v59  ;;  %v2450_v54 = vld [vmem:[%s4223_s0 + $0x12a] sm:$0x3f]  ;;  %v1891_v61 = vpop.eup %1890  ;;  %v419_v12 = vadd.f32 %v417_v39, %v2251_v20  ;;  %v418_v58 = vadd.f32 %v416_v45, %v2251_v20  ;;  %v2469_v39 = vld [vmem:[%s4223_s0 + $0x3a] sm:$0x3f] }
  0x48   :  { %4436 = vst [vmem:[#allocation48_spill] sm:$0xff] %v2419_v15  ;;  %4437 = vst [vmem:[#allocation49_spill] sm:$0xff] %v2424_v40  ;;  %v479_v45 = vmul.f32 %v2414_v57, %v2109_v23  ;;  %v2510_v1 = vmul.f32 %v2450_v54, %v2164_v43  ;;  %v2539_v48 = vmul.f32 %v2489_v55, %v2193_v52  ;;  %v2617_v40 = vld [vmem:[%s4223_s0 + $0xa1] sm:$0xff]  ;;  %vm412_vm9 = vcmask 31760  }
  0x49   :  { %4438 = vst [vmem:[#allocation50_spill] sm:$0xff] %v2428_v41  ;;  %4439 = vst [vmem:[#allocation51_spill] sm:$0xff] %v2432_v10  ;;  %v420_v62 = vmax.f32 %v418_v58, 0.0  ;;  %v2498_v41 = vmul.f32 %v2445_v17, %v2145_v37  ;;  %v2521_v58 = vld [vmem:[%s4223_s0 + $0xb9] sm:$0x3f]  ;;  %vm572_vm10 = vcmask 48160  }
  0x4a   :  { %4440 = vst [vmem:[#allocation52_spill] sm:$0xff] %v2436_v21  ;;  %4441 = vst [vmem:[#allocation53_spill] sm:$0xff] %v2440_v31  ;;  %v450_v21 = vadd.f32 %v448_v51, %v440_v35  ;;  %v2459_v31 = vld [vmem:[%s4223_s0 + $0x38] sm:$0x3f]  ;;  %v2473_v35 = vmul.f32 %v2245_v16, %v2384_v59  ;;  %v489_v51 = vmul.f32 %v2419_v15, %v2121_v28  ;;  %v2494_v16 = vld [vmem:[%s4223_s0 + $0x1aa] sm:$0x3f] }
  0x4b   :  { %4442 = vst [vmem:[#allocation54_spill] sm:$0xff] %v2445_v17  ;;  %4443 = vst [vmem:[#allocation55_spill] sm:$0xff] %v2450_v54  ;;  %v1705_v59 = vld [vmem:[%s4223_s0 + $0x3f] sm:$0x1]  ;;  %424 = vrot.lane.b32.xlu1 %v420_v62, %s1953_s14  ;;  %v2544_v54 = vld [vmem:[%s4223_s0 + $0x20] sm:$0xff]  ;;  %v2553_v62 = vmul.f32 %v2494_v16, %v2231_v0  ;;  %vm732_vm11 = vcmask 64560  }
  0x4c   :  { %4444 = vst [vmem:[#allocation56_spill] sm:$0xff] %v2459_v31  ;;  %4445 = vst [vmem:[#allocation57_spill] sm:$0xff] %v2464_v60  ;;  %v460_v10 = vadd.f32 %v458_v8, %v450_v21  ;;  %v608_v21 = vmul.f32 %v2464_v60, %v2055_v7  ;;  %v618_v8 = vmul.f32 %v2469_v39, %v2078_v13  ;;  %1892 = vrcp.f32 %v1705_v59  ;;  %v2677_v26 = vld [vmem:[%s4223_s0 + $0xc8] sm:$0x3f] }
  0x4d   :  { %4446 = vst [vmem:[#allocation58_spill] sm:$0xff] %v2469_v39  ;;  %4447 = vst [vmem:[#allocation59_spill] sm:$0xff] %v2473_v35  ;;  %v421_v35 = vmax.f32 %v419_v12, 0.0  ;;  %v600_v12 = vmul.f32 %v2459_v31, %v2046_v5  ;;  %v1730_v31 = vld [vmem:[%s4223_s0 + $0x4f] sm:$0x1]  ;;  %v2535_v60 = vmul.f32 %v2484_v56, %v2181_v49  ;;  %vm892_vm12 = vcmask 80960  }
  0x4e   :  { %4449 = vst [vmem:[#allocation61_spill] sm:$0xff] %v2489_v55  ;;  %4450 = vst [vmem:[#allocation62_spill] sm:$0xff] %v2494_v16  ;;  %v471_v39 = vadd.f32 %v469_v14, %v460_v10  ;;  %v629_v14 = vmul.f32 %v2506_v47, %v2096_v18  ;;  %v2560_v55 = vld [vmem:[%s4223_s0 + $0x138] sm:$0x3f]  ;;  %v2570_v16 = vld [vmem:[%s4223_s0 + $0x22] sm:$0xff]  ;;  %1894 = vrcp.f32 %v1730_v31  ;;  %v439_v31 = vmul.f32 %v2544_v54, %v2046_v5 }
  0x4f   :  { %4451 = vst [vmem:[#allocation63_spill] sm:$0xff] %v2506_v47  ;;  %4452 = vst [vmem:[#allocation64_spill] sm:$0xff] %v2521_v58  ;;  %426 = vrot.lane.b32.xlu0 %v421_v35, %s1953_s14  ;;  %v2549_v35 = vld [vmem:[%s4223_s0 + $0x21] sm:$0xff]  ;;  %v610_v10 = vadd.f32 %v608_v21, %v600_v12  ;;  %v2565_v56 = vld [vmem:[%s4223_s0 + $0x139] sm:$0x3f]  ;;  %v2573_v12 = vrot.slane %v1891_v61, %v2147_v38  ;;  %v639_v21 = vmul.f32 %v2521_v58, %v2109_v23  ;;  %vm1374_vm13 = vcmask 128112  }
  0x50   :  { %4453 = vst [vmem:[#allocation65_spill] sm:$0xff] %v2526_v25  ;;  %4454 = vst [vmem:[#allocation66_spill] sm:$0xff] %v2544_v54  ;;  %v481_v59 = vadd.f32 %v479_v45, %v471_v39  ;;  %v2580_v47 = vld [vmem:[%s4223_s0 + $0x13a] sm:$0x3f]  ;;  %v649_v39 = vmul.f32 %v2526_v25, %v2121_v28  ;;  %v660_v25 = vmul.f32 %v2560_v55, %v2135_v32  ;;  %v2622_v54 = vld [vmem:[%s4223_s0 + $0xa2] sm:$0xff]  ;;  %vm1052_vm14 = vcmask 97360  }
  0x51   :  { %4455 = vst [vmem:[#allocation67_spill] sm:$0xff] %v2549_v35  ;;  %4456 = vst [vmem:[#allocation68_spill] sm:$0xff] %v2560_v55  ;;  %v620_v17 = vadd.f32 %v618_v8, %v610_v10  ;;  %v2592_v61 = vld [vmem:[%s4223_s0 + $0x1b8] sm:$0x3f]  ;;  %v447_v8 = vmul.f32 %v2549_v35, %v2055_v7  ;;  %v670_v24 = vmul.f32 %v2565_v56, %v2145_v37  ;;  %v2636_v55 = vld [vmem:[%s4223_s0 + $0x49] sm:$0x3f] }
  0x52   :  { %4457 = vst [vmem:[#allocation69_spill] sm:$0xff] %v2565_v56  ;;  %4458 = vst [vmem:[#allocation70_spill] sm:$0xff] %v2570_v16  ;;  %v2597_v45 = vld [vmem:[%s4223_s0 + $0x1b9] sm:$0x3f]  ;;  %v491_v10 = vadd.f32 %v489_v51, %v481_v59  ;;  %v457_v22 = vmul.f32 %v2570_v16, %v2078_v13  ;;  %v680_v59 = vmul.f32 %v2580_v47, %v2164_v43  ;;  %v2631_v16 = vld [vmem:[%s4223_s0 + $0x48] sm:$0x3f] }
  0x53   :  { %4459 = vst [vmem:[#allocation71_spill] sm:$0xff] %v2573_v12  ;;  %4460 = vst [vmem:[#allocation72_spill] sm:$0xff] %v2580_v47  ;;  %v2602_v58 = vld [vmem:[%s4223_s0 + $0x1ba] sm:$0x3f]  ;;  %v631_v51 = vadd.f32 %v629_v14, %v620_v17  ;;  %v449_v35 = vadd.f32 %v447_v8, %v439_v31  ;;  %v468_v56 = vmul.f32 %v2585_v33, %v2096_v18  ;;  %v2641_v17 = vld [vmem:[%s4223_s0 + $0x4a] sm:$0x3f] }
  0x54   :  { %4461 = vst [vmem:[#allocation73_spill] sm:$0xff] %v2585_v33  ;;  %4462 = vst [vmem:[#allocation74_spill] sm:$0xff] %v2592_v61  ;;  %v502_v14 = vadd.f32 %v500_v11, %v491_v10  ;;  %v2645_v31 = vmul.f32 %v2592_v61, %v2181_v49  ;;  %v2649_v8 = vmul.f32 %v2597_v45, %v2193_v52  ;;  %v2658_v47 = vld [vmem:[%s4223_s0 + $0x120] sm:$0xff]  ;;  %vm1421_vm15 = vcmask 1043456  }
  0x55   :  { %4463 = vst [vmem:[#allocation75_spill] sm:$0xff] %v2597_v45  ;;  %4464 = vst [vmem:[#allocation76_spill] sm:$0xff] %v2602_v58  ;;  %v2653_v33 = vmul.f32 %v2602_v58, %v2231_v0  ;;  %v2663_v11 = vld [vmem:[%s4223_s0 + $0x121] sm:$0xff]  ;;  %v641_v10 = vadd.f32 %v639_v21, %v631_v51  ;;  %v459_v61 = vadd.f32 %v457_v22, %v449_v35 }
  0x56   :  { %4465 = vst [vmem:[#allocation77_spill] sm:$0xff] %v2617_v40  ;;  %4466 = vst [vmem:[#allocation78_spill] sm:$0xff] %v2622_v54  ;;  %v478_v45 = vmul.f32 %v2617_v40, %v2109_v23  ;;  %v488_v19 = vmul.f32 %v2622_v54, %v2121_v28  ;;  %v2672_v58 = vld [vmem:[%s4223_s0 + $0x122] sm:$0xff]  ;;  %v512_v15 = vadd.f32 %v2498_v41, %v502_v14 }
  0x57   :  { %4467 = vst [vmem:[#allocation79_spill] sm:$0xff] %v2631_v16  ;;  %4468 = vst [vmem:[#allocation80_spill] sm:$0xff] %v2636_v55  ;;  %v2683_v22 = vld [vmem:[%s4223_s0 + $0x1a0] sm:$0xff]  ;;  %v760_v21 = vmul.f32 %v2631_v16, %v2046_v5  ;;  %v768_v51 = vmul.f32 %v2636_v55, %v2055_v7  ;;  %v778_v54 = vmul.f32 %v2641_v17, %v2078_v13  ;;  %v2708_v55 = vld [vmem:[%s4223_s0 + $0xc9] sm:$0x3f] }
  0x58   :  { %4469 = vst [vmem:[#allocation81_spill] sm:$0xff] %v2641_v17  ;;  %4470 = vst [vmem:[#allocation82_spill] sm:$0xff] %v2658_v47  ;;  %v2688_v35 = vld [vmem:[%s4223_s0 + $0x1a1] sm:$0xff]  ;;  %v651_v41 = vadd.f32 %v649_v39, %v641_v10  ;;  %v470_v14 = vadd.f32 %v468_v56, %v459_v61  ;;  %v499_v40 = vmul.f32 %v2658_v47, %v2135_v32  ;;  %v2718_v10 = vld [vmem:[%s4223_s0 + $0xca] sm:$0x3f] }
  0x59   :  { %4471 = vst [vmem:[#allocation83_spill] sm:$0xff] %v2663_v11  ;;  %4472 = vst [vmem:[#allocation84_spill] sm:$0xff] %v2672_v58  ;;  %v509_v3 = vmul.f32 %v2663_v11, %v2145_v37  ;;  %v522_v17 = vadd.f32 %v2510_v1, %v512_v15  ;;  %v519_v56 = vmul.f32 %v2672_v58, %v2164_v43  ;;  %v2723_v11 = vld [vmem:[%s4223_s0 + $0x148] sm:$0x3f] }
  0x5a   :  { %4473 = vst [vmem:[#allocation85_spill] sm:$0xff] %v2677_v26  ;;  %4474 = vst [vmem:[#allocation86_spill] sm:$0xff] %v2683_v22  ;;  %v770_v39 = vadd.f32 %v768_v51, %v760_v21  ;;  %v789_v61 = vmul.f32 %v2677_v26, %v2096_v18  ;;  %v662_v47 = vadd.f32 %v660_v25, %v651_v41  ;;  %v2732_v21 = vld [vmem:[%s4223_s0 + $0x149] sm:$0x3f]  ;;  %v2737_v51 = vld [vmem:[%s4223_s0 + $0x30] sm:$0xff] }
  0x5b   :  { %4475 = vst [vmem:[#allocation87_spill] sm:$0xff] %v2688_v35  ;;  %4476 = vst [vmem:[#allocation88_spill] sm:$0xff] %v2703_v9  ;;  %v480_v16 = vadd.f32 %v478_v45, %v470_v14  ;;  %v530_v1 = vmul.f32 %v2683_v22, %v2181_v49  ;;  %v540_v15 = vmul.f32 %v2688_v35, %v2193_v52  ;;  %v2749_v14 = vld [vmem:[%s4223_s0 + $0x31] sm:$0xff] }
  0x5c   :  { %4477 = vst [vmem:[#allocation89_spill] sm:$0xff] %v2708_v55  ;;  %4478 = vst [vmem:[#allocation90_spill] sm:$0xff] %v2718_v10  ;;  %v533_v58 = vadd.f32 %v2535_v60, %v522_v17  ;;  %v2742_v25 = vmul.f32 %v2703_v9, %v2231_v0  ;;  %v780_v45 = vadd.f32 %v778_v54, %v770_v39  ;;  %v2754_v35 = vld [vmem:[%s4223_s0 + $0x32] sm:$0xff]  ;;  %v2763_v39 = vld [vmem:[%s4223_s0 + $0x14a] sm:$0x3f] }
  0x5d   :  { %4479 = vst [vmem:[#allocation91_spill] sm:$0xff] %v2723_v11  ;;  %4480 = vst [vmem:[#allocation92_spill] sm:$0xff] %v2737_v51  ;;  %v799_v41 = vmul.f32 %v2708_v55, %v2109_v23  ;;  %v672_v22 = vadd.f32 %v670_v24, %v662_v47  ;;  %v490_v60 = vadd.f32 %v488_v19, %v480_v16  ;;  %v2768_v9 = vld [vmem:[%s4223_s0 + $0x1c8] sm:$0x3f]  ;;  %v1893_v55 = vpop.eup %1892 }
  0x5e   :  { %4481 = vst [vmem:[#allocation93_spill] sm:$0xff] %v2749_v14  ;;  %4482 = vst [vmem:[#allocation94_spill] sm:$0xff] %v2754_v35  ;;  %v809_v17 = vmul.f32 %v2718_v10, %v2121_v28  ;;  %v820_v54 = vmul.f32 %v2723_v11, %v2135_v32  ;;  %v543_v24 = vadd.f32 %v2539_v48, %v533_v58  ;;  %v2778_v11 = vld [vmem:[%s4223_s0 + $0xb0] sm:$0xff]  ;;  %v1895_v10 = vpop.eup %1894 }
  0x5f   :  { %4483 = vst [vmem:[#allocation95_spill] sm:$0xff] %v2768_v9  ;;  %v791_v19 = vadd.f32 %v789_v61, %v780_v45  ;;  %v830_v47 = vmul.f32 %v2732_v21, %v2145_v37  ;;  %v599_v16 = vmul.f32 %v2737_v51, %v2046_v5  ;;  %v682_v26 = vadd.f32 %v680_v59, %v672_v22  ;;  %v2797_v59 = vld [vmem:[%s4223_s0 + $0xb1] sm:$0xff] }
  0x60   :  { %v501_v57 = vadd.f32 %v499_v40, %v490_v60  ;;  %v607_v48 = vmul.f32 %v2749_v14, %v2055_v7  ;;  %v617_v58 = vmul.f32 %v2754_v35, %v2078_v13  ;;  %v553_v61 = vadd.f32 %v2553_v62, %v543_v24  ;;  %4484 = vst [vmem:[#allocation96_spill] sm:$0xff] %v2797_v59  ;;  %v2803_v35 = vld [vmem:[%s4223_s0 + $0x1ca] sm:$0x3f] }
  0x61   :  { %v801_v45 = vadd.f32 %v799_v41, %v791_v19  ;;  %v840_v51 = vmul.f32 %v2763_v39, %v2164_v43  ;;  %v851_v40 = vmul.f32 %v2768_v9, %v2181_v49  ;;  %v693_v22 = vadd.f32 %v2645_v31, %v682_v26  ;;  %4485 = vst [vmem:[#allocation97_spill] sm:$0xff] %v2803_v35 }
  0x62   :  { %v511_v60 = vadd.f32 %v509_v3, %v501_v57  ;;  %v609_v62 = vadd.f32 %v607_v48, %v599_v16  ;;  %v628_v41 = vmul.f32 %v2778_v11, %v2096_v18  ;;  %v577_v24 = vmul.f32 %v2573_v12, %v553_v61  ;;  %v2816_v3 = vld [vmem:[%s4223_s0 + $0xb2] sm:$0xff] }
  0x63   :  { %v2809_v19 = vrot.slane %v1893_v55, %v2147_v38  ;;  %v811_v14 = vadd.f32 %v809_v17, %v801_v45  ;;  %v861_v9 = vmul.f32 %v2783_v63, %v2193_v52  ;;  %4486 = vst [vmem:[#allocation98_spill] sm:$0xff] %v2816_v3  ;;  %v703_v26 = vadd.f32 %v2649_v8, %v693_v22  ;;  %v2824_v55 = vld [vmem:[%s4223_s0 + $0x130] sm:$0xff] }
  0x64   :  { %v521_v57 = vadd.f32 %v519_v56, %v511_v60  ;;  %v619_v31 = vadd.f32 %v617_v58, %v609_v62  ;;  %v638_v16 = vmul.f32 %v2797_v59, %v2109_v23  ;;  %4487 = vst [vmem:[#allocation99_spill] sm:$0xff] %v2824_v55  ;;  %v579_v17 = vadd.f32 %v577_v24, %v2251_v20  ;;  %v2853_v24 = vld [vmem:[%s4223_s0 + $0x132] sm:$0xff] }
  0x65   :  { %v822_v48 = vadd.f32 %v820_v54, %v811_v14  ;;  %v871_v61 = vmul.f32 %v2803_v35, %v2231_v0  ;;  %v2830_v45 = vrot.slane %v1895_v10, %v2147_v38  ;;  %v713_v8 = vadd.f32 %v2653_v33, %v703_v26  ;;  %v2840_v14 = vld [vmem:[%s4223_s0 + $0x131] sm:$0xff]  ;;  %4489 = vst [vmem:[#allocation101_spill] sm:$0xff] %v2853_v24 }
  0x66   :  { %v532_v56 = vadd.f32 %v530_v1, %v521_v57  ;;  %v630_v58 = vadd.f32 %v628_v41, %v619_v31  ;;  %v648_v22 = vmul.f32 %v2816_v3, %v2121_v28  ;;  %v581_v60 = vmax.f32 %v579_v17, 0.0  ;;  %4488 = vst [vmem:[#allocation100_spill] sm:$0xff] %v2840_v14 }
  0x67   :  { %v832_v62 = vadd.f32 %v830_v47, %v822_v48  ;;  %v659_v59 = vmul.f32 %v2824_v55, %v2135_v32  ;;  %v286_v10 = vadd.f32 %v2291_v53, %v2287_v50  ;;  %v737_v33 = vmul.f32 %v2809_v19, %v713_v8 }
  0x68   :  { %v542_v1 = vadd.f32 %v540_v15, %v532_v56  ;;  %v640_v54 = vadd.f32 %v638_v16, %v630_v58  ;;  %v438_v47 = vmul.f32 %v2353_v42, %v2264_v29  ;;  %586 = vrot.lane.b32.xlu0 %v581_v60, %s1954_s10  ;;  %v444_v53 = vmul.f32 %v2374_v36, %v2267_v30  ;;  %v2867_v16 = vld [vmem:[%s4223_s0 + $0x1b0] sm:$0xff]  ;;  %v4493_v60 = vld [vmem:[#allocation27_spill] sm:$0xff] }
  0x69   :  { %v842_v41 = vadd.f32 %v840_v51, %v832_v62  ;;  %v296_v50 = vadd.f32 %v2309_v4, %v286_v10  ;;  %v454_v15 = vmul.f32 %v2379_v34, %v2278_v44  ;;  %v739_v26 = vadd.f32 %v737_v33, %v2251_v20  ;;  %4490 = vst [vmem:[#allocation102_spill] sm:$0xff] %v2867_v16  ;;  %v2872_v4 = vld [vmem:[%s4223_s0 + $0x1b1] sm:$0xff]  ;;  %v4494_v62 = vld [vmem:[#allocation47_spill] sm:$0xff] }
  0x6a   :  { %v552_v42 = vadd.f32 %v2742_v25, %v542_v1  ;;  %v650_v57 = vadd.f32 %v648_v22, %v640_v54  ;;  %v669_v51 = vmul.f32 %v2840_v14, %v2145_v37  ;;  %4491 = vst [vmem:[#allocation103_spill] sm:$0xff] %v2872_v4  ;;  %v446_v34 = vadd.f32 %v444_v53, %v438_v47  ;;  %v2883_v58 = vld [vmem:[%s4223_s0 + $0x1b2] sm:$0xff] }
  0x6b   :  { %v853_v31 = vadd.f32 %v851_v40, %v842_v41  ;;  %v307_v36 = vadd.f32 %v2313_v2, %v296_v50  ;;  %v465_v25 = vmul.f32 %v2403_v27, %v2281_v46  ;;  %v741_v17 = vmax.f32 %v739_v26, 0.0  ;;  %4492 = vst [vmem:[#allocation104_spill] sm:$0xff] %v2883_v58  ;;  %v4495_v54 = vld [vmem:[#allocation33_spill] sm:$0xff]  ;;  %v4496_v41 = vld [vmem:[#allocation28_spill] sm:$0xff] }
  0x6c   :  { %v576_v48 = vmul.f32 %v2573_v12, %v552_v42  ;;  %v661_v40 = vadd.f32 %v659_v59, %v650_v57  ;;  %v679_v8 = vmul.f32 %v2853_v24, %v2164_v43  ;;  %v456_v2 = vadd.f32 %v454_v15, %v446_v34  ;;  %v4497_v50 = vld [vmem:[#allocation48_spill] sm:$0xff]  ;;  %v2900_v15 = vld [vmem:[%s4223_s0 + $0x58] sm:$0x3f]  ;;  %v4502_v34 = vld [vmem:[#allocation38_spill] sm:$0xff] }
  0x6d   :  { %v863_v56 = vadd.f32 %v861_v9, %v853_v31  ;;  %v317_v22 = vadd.f32 %v2331_v6, %v307_v36  ;;  %v475_v10 = vmul.f32 %v4494_v62, %v4493_v60  ;;  %746 = vrot.lane.b32.xlu1 %v741_v17, %s1955_s22  ;;  %v690_v9 = vmul.f32 %v2867_v16, %v2181_v49  ;;  %v2905_v26 = vld [vmem:[%s4223_s0 + $0x59] sm:$0x3f] }
  0x6e   :  { %v578_v27 = vadd.f32 %v576_v48, %v2251_v20  ;;  %v671_v59 = vadd.f32 %v669_v51, %v661_v40  ;;  %v700_v33 = vmul.f32 %v2872_v4, %v2193_v52  ;;  %v467_v47 = vadd.f32 %v465_v25, %v456_v2  ;;  %4498 = vst [vmem:[#allocation27_spill] sm:$0xff] %v2900_v15  ;;  %v4503_v48 = vld [vmem:[#allocation31_spill] sm:$0xff]  ;;  %v4504_v40 = vld [vmem:[#allocation49_spill] sm:$0xff] }
  0x6f   :  { %v873_v1 = vadd.f32 %v871_v61, %v863_v56  ;;  %v327_v6 = vadd.f32 %v4495_v54, %v317_v22  ;;  %v485_v53 = vmul.f32 %v4497_v50, %v4496_v41  ;;  %4499 = vst [vmem:[#allocation47_spill] sm:$0xff] %v2905_v26  ;;  %v2910_v61 = vld [vmem:[%s4223_s0 + $0x5a] sm:$0x3f]  ;;  %v710_v51 = vmul.f32 %v2883_v58, %v2231_v0  ;;  %v4512_v58 = vld [vmem:[#allocation44_spill] sm:$0xff] }
  0x70   :  { %4500 = vst [vmem:[#allocation33_spill] sm:$0xff] %v2910_v61  ;;  %v580_v42 = vmax.f32 %v578_v27, 0.0  ;;  %v681_v57 = vadd.f32 %v679_v8, %v671_v59  ;;  %v2915_v31 = vstv %s2845_s19  ;;  %v477_v17 = vadd.f32 %v475_v10, %v467_v47  ;;  %v2924_v22 = vld [vmem:[%s4223_s0 + $0xd8] sm:$0x3f]  ;;  %v1755_v2 = vld [vmem:[%s4223_s0 + $0x5f] sm:$0x1] }
  0x71   :  { %4501 = vst [vmem:[#allocation28_spill] sm:$0xff] %v2915_v31  ;;  %v897_v36 = vmul.f32 %v2830_v45, %v873_v1  ;;  %v338_v25 = vadd.f32 %v4502_v34, %v327_v6  ;;  %v496_v56 = vmul.f32 %v4504_v40, %v4503_v48  ;;  %4505 = vst [vmem:[#allocation48_spill] sm:$0xff] %v2924_v22  ;;  %v4506_v1 = vld [vmem:[#allocation39_spill] sm:$0xff]  ;;  %v4507_v47 = vld [vmem:[#allocation32_spill] sm:$0xff]  ;;  %1896 = vrcp.f32 %v1755_v2  ;;  %s1969_s19 = smov 114  }
  0x72   :  { %584 = vrot.lane.b32.xlu0 %v580_v42, %s1954_s10  ;;  %v692_v8 = vadd.f32 %v690_v9, %v681_v57  ;;  %v920_v62 = vmul.f32 %v2900_v15, %v2046_v5  ;;  %v928_v10 = vmul.f32 %v2905_v26, %v2055_v7  ;;  %v938_v27 = vmul.f32 %v2910_v61, %v2078_v13  ;;  %v4508_v9 = vld [vmem:[#allocation54_spill] sm:$0xff]  ;;  %v2943_v42 = vld [vmem:[%s4223_s0 + $0xd9] sm:$0x3f]  ;;  %v4510_v34 = vld [vmem:[#allocation36_spill] sm:$0xff] }
  0x73   :  { %v899_v59 = vadd.f32 %v897_v36, %v2251_v20  ;;  %v348_v54 = vadd.f32 %v4506_v1, %v338_v25  ;;  %v487_v6 = vadd.f32 %v485_v53, %v477_v17  ;;  %v506_v50 = vmul.f32 %v4508_v9, %v4507_v47  ;;  %4509 = vst [vmem:[#allocation38_spill] sm:$0xff] %v2943_v42  ;;  %v4511_v40 = vld [vmem:[#allocation55_spill] sm:$0xff]  ;;  %v2953_v17 = vld [vmem:[%s4223_s0 + $0xda] sm:$0x3f] }
  0x74   :  { %v702_v57 = vadd.f32 %v700_v33, %v692_v8  ;;  %v516_v26 = vmul.f32 %v4511_v40, %v4510_v34  ;;  %v930_v15 = vadd.f32 %v928_v10, %v920_v62  ;;  %v949_v61 = vmul.f32 %v2924_v22, %v2096_v18  ;;  %4513 = vst [vmem:[#allocation31_spill] sm:$0xff] %v2953_v17  ;;  %v2958_v33 = vld [vmem:[%s4223_s0 + $0x158] sm:$0x3f]  ;;  %v4516_v10 = vld [vmem:[#allocation60_spill] sm:$0xff]  ;;  %v2972_v2 = vld [vmem:[%s4223_s0 + $0x69] sm:$0x3f] }
  0x75   :  { %v901_v36 = vmax.f32 %v899_v59, 0.0  ;;  %v358_v25 = vadd.f32 %v4512_v58, %v348_v54  ;;  %v498_v53 = vadd.f32 %v496_v56, %v487_v6  ;;  %4514 = vst [vmem:[#allocation49_spill] sm:$0xff] %v2958_v33  ;;  %v4515_v62 = vld [vmem:[#allocation37_spill] sm:$0xff]  ;;  %v959_v58 = vmul.f32 %v2943_v42, %v2109_v23  ;;  %v2967_v56 = vld [vmem:[%s4223_s0 + $0x68] sm:$0x3f]  ;;  %4518 = vst [vmem:[#allocation32_spill] sm:$0xff] %v2972_v2 }
  0x76   :  { %v712_v8 = vadd.f32 %v710_v51, %v702_v57  ;;  %v527_v1 = vmul.f32 %v4516_v10, %v4515_v62  ;;  %v940_v9 = vadd.f32 %v938_v27, %v930_v15  ;;  %4517 = vst [vmem:[#allocation39_spill] sm:$0xff] %v2967_v56  ;;  %v4519_v51 = vld [vmem:[#allocation45_spill] sm:$0xff]  ;;  %v4520_v15 = vld [vmem:[#allocation42_spill] sm:$0xff]  ;;  %v4522_v57 = vld [vmem:[#allocation43_spill] sm:$0xff] }
  0x77   :  { %906 = vrot.lane.b32.xlu1 %v901_v36, %s1956_s25  ;;  %v369_v59 = vadd.f32 %v4519_v51, %v358_v25  ;;  %v508_v54 = vadd.f32 %v506_v50, %v498_v53  ;;  %v4521_v27 = vld [vmem:[#allocation61_spill] sm:$0xff]  ;;  %v4523_v40 = vld [vmem:[#allocation62_spill] sm:$0xff]  ;;  %v1780_v42 = vld [vmem:[%s4223_s0 + $0x6f] sm:$0x1]  ;;  %v969_v50 = vmul.f32 %v2953_v17, %v2121_v28  ;;  %v980_v25 = vmul.f32 %v2958_v33, %v2135_v32 }
  0x78   :  { %v537_v6 = vmul.f32 %v4521_v27, %v4520_v15  ;;  %v547_v10 = vmul.f32 %v4523_v40, %v4522_v57  ;;  %v2986_v22 = vld [vmem:[%s4223_s0 + $0x6a] sm:$0x3f]  ;;  %v736_v36 = vmul.f32 %v2809_v19, %v712_v8  ;;  %v951_v4 = vadd.f32 %v949_v61, %v940_v9  ;;  %v4526_v51 = vld [vmem:[#allocation50_spill] sm:$0xff]  ;;  %v3002_v16 = vld [vmem:[%s4223_s0 + $0x159] sm:$0x3f] }
  0x79   :  { %4524 = vst [vmem:[#allocation54_spill] sm:$0xff] %v2986_v22  ;;  %v2996_v53 = vld [vmem:[%s4223_s0 + $0xe8] sm:$0x3f]  ;;  %v379_v27 = vadd.f32 %v4526_v51, %v369_v59  ;;  %v518_v40 = vadd.f32 %v516_v26, %v508_v54  ;;  %4527 = vst [vmem:[#allocation55_spill] sm:$0xff] %v3002_v16  ;;  %v3007_v61 = vld [vmem:[%s4223_s0 + $0x15a] sm:$0x3f]  ;;  %v1080_v8 = vmul.f32 %v2967_v56, %v2046_v5  ;;  %1898 = vrcp.f32 %v1780_v42 }
  0x7a   :  { %4525 = vst [vmem:[#allocation36_spill] sm:$0xff] %v2996_v53  ;;  %4528 = vst [vmem:[#allocation44_spill] sm:$0xff] %v3007_v61  ;;  %v1088_v9 = vmul.f32 %v2972_v2, %v2055_v7  ;;  %v738_v33 = vadd.f32 %v736_v36, %v2251_v20  ;;  %v961_v59 = vadd.f32 %v959_v58, %v951_v4  ;;  %v3019_v54 = vld [vmem:[%s4223_s0 + $0xe9] sm:$0x3f]  ;;  %v3025_v56 = vld [vmem:[%s4223_s0 + $0x1d8] sm:$0x3f] }
  0x7b   :  { %v1098_v26 = vmul.f32 %v2986_v22, %v2078_v13  ;;  %4529 = vst [vmem:[#allocation37_spill] sm:$0xff] %v3019_v54  ;;  %v4530_v51 = vld [vmem:[#allocation51_spill] sm:$0xff]  ;;  %v529_v24 = vadd.f32 %v527_v1, %v518_v40  ;;  %4531 = vst [vmem:[#allocation60_spill] sm:$0xff] %v3025_v56  ;;  %v3030_v4 = vld [vmem:[%s4223_s0 + $0x1d9] sm:$0x3f]  ;;  %v1109_v36 = vmul.f32 %v2996_v53, %v2096_v18 }
  0x7c   :  { %v389_v17 = vadd.f32 %v4530_v51, %v379_v27  ;;  %4532 = vst [vmem:[#allocation45_spill] sm:$0xff] %v3030_v4  ;;  %v3035_v42 = vld [vmem:[%s4223_s0 + $0x1da] sm:$0x3f]  ;;  %v1090_v58 = vadd.f32 %v1088_v9, %v1080_v8  ;;  %v740_v1 = vmax.f32 %v738_v33, 0.0  ;;  %v971_v27 = vadd.f32 %v969_v50, %v961_v59  ;;  %v3046_v22 = vld [vmem:[%s4223_s0 + $0xea] sm:$0x3f] }
  0x7d   :  { %4533 = vst [vmem:[#allocation42_spill] sm:$0xff] %v3035_v42  ;;  %v990_v40 = vmul.f32 %v3002_v16, %v2145_v37  ;;  %v1000_v51 = vmul.f32 %v3007_v61, %v2164_v43  ;;  %4534 = vst [vmem:[#allocation61_spill] sm:$0xff] %v3046_v22  ;;  %v4535_v2 = vld [vmem:[#allocation23_spill] sm:$0xff]  ;;  %v539_v55 = vadd.f32 %v537_v6, %v529_v24  ;;  %v3059_v50 = vld [vmem:[%s4223_s0 + $0x40] sm:$0xff] }
  0x7e   :  { %v399_v14 = vmul.f32 %v4535_v2, %v389_v17  ;;  %v1100_v8 = vadd.f32 %v1098_v26, %v1090_v58  ;;  %v1119_v9 = vmul.f32 %v3019_v54, %v2109_v23  ;;  %v3054_v33 = vld [vmem:[%s4223_s0 + $0x168] sm:$0x3f]  ;;  %4537 = vst [vmem:[#allocation62_spill] sm:$0xff] %v3059_v50  ;;  %744 = vrot.lane.b32.xlu1 %v740_v1, %s1955_s22 }
  0x7f   :  { %4536 = vst [vmem:[#allocation43_spill] sm:$0xff] %v3054_v33  ;;  %v3064_v59 = vld [vmem:[%s4223_s0 + $0x41] sm:$0xff]  ;;  %v982_v24 = vadd.f32 %v980_v25, %v971_v27  ;;  %v1011_v17 = vmul.f32 %v3025_v56, %v2181_v49  ;;  %v1021_v6 = vmul.f32 %v3030_v4, %v2193_v52  ;;  %v1031_v26 = vmul.f32 %v3035_v42, %v2231_v0  ;;  %v3084_v1 = vld [vmem:[%s4223_s0 + $0x169] sm:$0x3f] }
  0x80   :  { %4538 = vst [vmem:[#allocation50_spill] sm:$0xff] %v3064_v59  ;;  %v3076_v58 = vld [vmem:[%s4223_s0 + $0x42] sm:$0xff]  ;;  %v401_v54 = vadd.f32 %v399_v14, %v2915_v31  ;;  %v549_v61 = vadd.f32 %v547_v10, %v539_v55  ;;  %v1111_v16 = vadd.f32 %v1109_v36, %v1100_v8  ;;  %v1129_v25 = vmul.f32 %v3046_v22, %v2121_v28  ;;  %v3096_v55 = vld [vmem:[%s4223_s0 + $0x16a] sm:$0x3f] }
  0x81   :  { %4539 = vst [vmem:[#allocation51_spill] sm:$0xff] %v3076_v58  ;;  %4540 = vst [vmem:[#allocation23_spill] sm:$0xff] %v3084_v1  ;;  %v3089_v27 = vld [vmem:[%s4223_s0 + $0xc0] sm:$0xff]  ;;  %v992_v42 = vadd.f32 %v990_v40, %v982_v24  ;;  %v1140_v4 = vmul.f32 %v3054_v33, %v2135_v32  ;;  %v3101_v14 = vld [vmem:[%s4223_s0 + $0x1e8] sm:$0x3f]  ;;  %v759_v10 = vmul.f32 %v3059_v50, %v2046_v5  ;;  %v1897_v50 = vpop.eup %1896 }
  0x82   :  { %4541 = vst [vmem:[#allocation105_spill] sm:$0xff] %v3089_v27  ;;  %4542 = vst [vmem:[#allocation106_spill] sm:$0xff] %v3096_v55  ;;  %v767_v36 = vmul.f32 %v3064_v59, %v2055_v7  ;;  %v403_v40 = vmax.f32 %v401_v54, 0.0  ;;  %v559_v8 = vmul.f32 %v2573_v12, %v549_v61  ;;  %v1121_v24 = vadd.f32 %v1119_v9, %v1111_v16  ;;  %v3111_v33 = vld [vmem:[%s4223_s0 + $0x1e9] sm:$0x3f]  ;;  %v3118_v56 = vld [vmem:[%s4223_s0 + $0xc1] sm:$0xff] }
  0x83   :  { %4543 = vst [vmem:[#allocation107_spill] sm:$0xff] %v3101_v14  ;;  %4544 = vst [vmem:[#allocation108_spill] sm:$0xff] %v3111_v33  ;;  %v777_v22 = vmul.f32 %v3076_v58, %v2078_v13  ;;  %v1002_v53 = vadd.f32 %v1000_v51, %v992_v42  ;;  %v1150_v54 = vmul.f32 %v3084_v1, %v2145_v37  ;;  %v3125_v16 = vld [vmem:[%s4223_s0 + $0x1ea] sm:$0x3f]  ;;  %v3138_v1 = vld [vmem:[%s4223_s0 + $0xc2] sm:$0xff] }
  0x84   :  { %4545 = vst [vmem:[#allocation109_spill] sm:$0xff] %v3118_v56  ;;  %4546 = vst [vmem:[#allocation110_spill] sm:$0xff] %v3125_v16  ;;  %v769_v61 = vadd.f32 %v767_v36, %v759_v10  ;;  %v788_v9 = vmul.f32 %v3089_v27, %v2096_v18  ;;  %408 = vrot.lane.b32.xlu0 %v403_v40, %s1953_s14  ;;  %v561_v58 = vadd.f32 %v559_v8, %v2915_v31  ;;  %v3143_v10 = vld [vmem:[%s4223_s0 + $0x140] sm:$0xff] }
  0x85   :  { %v1131_v59 = vadd.f32 %v1129_v25, %v1121_v24  ;;  %v1160_v42 = vmul.f32 %v3096_v55, %v2164_v43  ;;  %v1171_v51 = vmul.f32 %v3101_v14, %v2181_v49  ;;  %4547 = vst [vmem:[#allocation111_spill] sm:$0xff] %v3138_v1  ;;  %4548 = vst [vmem:[#allocation112_spill] sm:$0xff] %v3143_v10  ;;  %v3157_v12 = vld [vmem:[%s4223_s0 + $0x141] sm:$0xff] }
  0x86   :  { %v1013_v36 = vadd.f32 %v1011_v17, %v1002_v53  ;;  %v1181_v25 = vmul.f32 %v3111_v33, %v2193_v52  ;;  %v779_v40 = vadd.f32 %v777_v22, %v769_v61  ;;  %v798_v8 = vmul.f32 %v3118_v56, %v2109_v23  ;;  %4550 = vst [vmem:[#allocation114_spill] sm:$0xff] %v3157_v12  ;;  %v3162_v22 = vld [vmem:[%s4223_s0 + $0x142] sm:$0xff] }
  0x87   :  { %v563_v24 = vmax.f32 %v561_v58, 0.0  ;;  %v3150_v14 = vrot.slane %v1897_v50, %v2147_v38  ;;  %v1142_v55 = vadd.f32 %v1140_v4, %v1131_v59  ;;  %v1191_v27 = vmul.f32 %v3125_v16, %v2231_v0  ;;  %4551 = vst [vmem:[#allocation115_spill] sm:$0xff] %v3162_v22  ;;  %v3171_v59 = vld [vmem:[%s4223_s0 + $0x1c0] sm:$0xff]  ;;  %v1899_v58 = vpop.eup %1898 }
  0x88   :  { %v1023_v53 = vadd.f32 %v1021_v6, %v1013_v36  ;;  %v790_v17 = vadd.f32 %v788_v9, %v779_v40  ;;  %v808_v50 = vmul.f32 %v3138_v1, %v2121_v28  ;;  %v819_v4 = vmul.f32 %v3143_v10, %v2135_v32  ;;  %4552 = vst [vmem:[#allocation116_spill] sm:$0xff] %v3171_v59  ;;  %v3177_v6 = vld [vmem:[%s4223_s0 + $0x1c1] sm:$0xff]  ;;  %v4554_v9 = vld [vmem:[#allocation56_spill] sm:$0xff]  ;;  %v4555_v40 = vld [vmem:[#allocation57_spill] sm:$0xff] }
  0x89   :  { %4549 = vst [vmem:[#allocation113_spill] sm:$0xff] %v3150_v14  ;;  %568 = vrot.lane.b32.xlu1 %v563_v24, %s1954_s10  ;;  %v1152_v61 = vadd.f32 %v1150_v54, %v1142_v55  ;;  %4553 = vst [vmem:[#allocation117_spill] sm:$0xff] %v3177_v6  ;;  %v598_v36 = vmul.f32 %v4554_v9, %v2264_v29  ;;  %v604_v16 = vmul.f32 %v4555_v40, %v2267_v30  ;;  %v4556_v10 = vld [vmem:[#allocation58_spill] sm:$0xff] }
  0x8a   :  { %v614_v33 = vmul.f32 %v4556_v10, %v2278_v44  ;;  %v1033_v1 = vadd.f32 %v1031_v26, %v1023_v53  ;;  %v800_v56 = vadd.f32 %v798_v8, %v790_v17  ;;  %v829_v24 = vmul.f32 %v3157_v12, %v2145_v37  ;;  %v3192_v54 = vld [vmem:[%s4223_s0 + $0x1c2] sm:$0xff]  ;;  %v4562_v12 = vld [vmem:[#allocation25_spill] sm:$0xff] }
  0x8b   :  { %v839_v55 = vmul.f32 %v3162_v22, %v2164_v43  ;;  %4557 = vst [vmem:[#allocation56_spill] sm:$0xff] %v3192_v54  ;;  %v1162_v9 = vadd.f32 %v1160_v42, %v1152_v61  ;;  %v850_v40 = vmul.f32 %v3171_v59, %v2181_v49  ;;  %v606_v3 = vadd.f32 %v604_v16, %v598_v36  ;;  %v4558_v10 = vld [vmem:[#allocation63_spill] sm:$0xff]  ;;  %v3207_v42 = vld [vmem:[%s4223_s0 + $0x78] sm:$0x3f] }
  0x8c   :  { %v625_v26 = vmul.f32 %v4558_v10, %v2281_v46  ;;  %v1057_v8 = vmul.f32 %v3150_v14, %v1033_v1  ;;  %v3200_v53 = vrot.slane %v1899_v58, %v2147_v38  ;;  %v810_v17 = vadd.f32 %v808_v50, %v800_v56  ;;  %4559 = vst [vmem:[#allocation57_spill] sm:$0xff] %v3207_v42  ;;  %v4560_v10 = vld [vmem:[#allocation64_spill] sm:$0xff]  ;;  %v3216_v56 = vld [vmem:[%s4223_s0 + $0x79] sm:$0x3f] }
  0x8d   :  { %v860_v22 = vmul.f32 %v3177_v6, %v2193_v52  ;;  %v1173_v61 = vadd.f32 %v1171_v51, %v1162_v9  ;;  %v870_v16 = vmul.f32 %v3192_v54, %v2231_v0  ;;  %v616_v36 = vadd.f32 %v614_v33, %v606_v3  ;;  %v4561_v6 = vld [vmem:[#allocation65_spill] sm:$0xff]  ;;  %v4563_v51 = vld [vmem:[#allocation26_spill] sm:$0xff]  ;;  %v4565_v54 = vld [vmem:[#allocation68_spill] sm:$0xff] }
  0x8e   :  { %v635_v1 = vmul.f32 %v4560_v10, %v4493_v60  ;;  %v1059_v50 = vadd.f32 %v1057_v8, %v2251_v20  ;;  %v821_v58 = vadd.f32 %v819_v4, %v810_v17  ;;  %v645_v59 = vmul.f32 %v4561_v6, %v4496_v41  ;;  %v3226_v3 = vld [vmem:[%s4223_s0 + $0x7a] sm:$0x3f] }
  0x8f   :  { %v285_v9 = vadd.f32 %v4563_v51, %v4562_v12  ;;  %4564 = vst [vmem:[#allocation58_spill] sm:$0xff] %v3226_v3  ;;  %v1183_v33 = vadd.f32 %v1181_v25, %v1173_v61  ;;  %v627_v10 = vadd.f32 %v625_v26, %v616_v36  ;;  %v656_v35 = vmul.f32 %v4565_v54, %v4503_v48  ;;  %v3235_v4 = vld [vmem:[%s4223_s0 + $0xf8] sm:$0x3f]  ;;  %v1805_v25 = vld [vmem:[%s4223_s0 + $0x7f] sm:$0x1] }
  0x90   :  { %v1240_v8 = vmul.f32 %v3207_v42, %v2046_v5  ;;  %4566 = vst [vmem:[#allocation63_spill] sm:$0xff] %v3235_v4  ;;  %v1061_v6 = vmax.f32 %v1059_v50, 0.0  ;;  %v831_v12 = vadd.f32 %v829_v24, %v821_v58  ;;  %v4567_v17 = vld [vmem:[#allocation29_spill] sm:$0xff]  ;;  %v1248_v26 = vmul.f32 %v3216_v56, %v2055_v7  ;;  %v4570_v58 = vld [vmem:[#allocation30_spill] sm:$0xff] }
  0x91   :  { %v295_v51 = vadd.f32 %v4567_v17, %v285_v9  ;;  %v1193_v54 = vadd.f32 %v1191_v27, %v1183_v33  ;;  %v637_v61 = vadd.f32 %v635_v1, %v627_v10  ;;  %v4568_v36 = vld [vmem:[#allocation69_spill] sm:$0xff]  ;;  %v1258_v14 = vmul.f32 %v3226_v3, %v2078_v13  ;;  %v4571_v10 = vld [vmem:[#allocation72_spill] sm:$0xff] }
  0x92   :  { %v666_v42 = vmul.f32 %v4568_v36, %v4507_v47  ;;  %v3250_v24 = vld [vmem:[%s4223_s0 + $0xf9] sm:$0x3f]  ;;  %1066 = vrot.lane.b32.xlu0 %v1061_v6, %s1957_s11  ;;  %v841_v50 = vadd.f32 %v839_v55, %v831_v12  ;;  %v1250_v17 = vadd.f32 %v1248_v26, %v1240_v8  ;;  %v1269_v27 = vmul.f32 %v3235_v4, %v2096_v18  ;;  %v4573_v55 = vld [vmem:[#allocation34_spill] sm:$0xff] }
  0x93   :  { %4569 = vst [vmem:[#allocation64_spill] sm:$0xff] %v3250_v24  ;;  %v306_v9 = vadd.f32 %v4570_v58, %v295_v51  ;;  %v1217_v1 = vmul.f32 %v3200_v53, %v1193_v54  ;;  %v647_v33 = vadd.f32 %v645_v59, %v637_v61  ;;  %v676_v36 = vmul.f32 %v4571_v10, %v4510_v34  ;;  %v3262_v3 = vld [vmem:[%s4223_s0 + $0xfa] sm:$0x3f]  ;;  %v3285_v58 = vld [vmem:[%s4223_s0 + $0x51] sm:$0xff] }
  0x94   :  { %1900 = vrcp.f32 %v1805_v25  ;;  %4572 = vst [vmem:[#allocation65_spill] sm:$0xff] %v3262_v3  ;;  %v852_v6 = vadd.f32 %v850_v40, %v841_v50  ;;  %v1260_v51 = vadd.f32 %v1258_v14, %v1250_v17  ;;  %v1279_v8 = vmul.f32 %v3250_v24, %v2109_v23  ;;  %v3270_v59 = vld [vmem:[%s4223_s0 + $0x178] sm:$0x3f]  ;;  %v3275_v25 = vld [vmem:[%s4223_s0 + $0x50] sm:$0xff]  ;;  %v4576_v40 = vld [vmem:[#allocation74_spill] sm:$0xff] }
  0x95   :  { %v316_v12 = vadd.f32 %v4573_v55, %v306_v9  ;;  %4574 = vst [vmem:[#allocation25_spill] sm:$0xff] %v3270_v59  ;;  %4575 = vst [vmem:[#allocation26_spill] sm:$0xff] %v3275_v25  ;;  %v1219_v26 = vadd.f32 %v1217_v1, %v2251_v20  ;;  %v658_v54 = vadd.f32 %v656_v35, %v647_v33  ;;  %v4577_v14 = vld [vmem:[#allocation75_spill] sm:$0xff]  ;;  %v3293_v35 = vld [vmem:[%s4223_s0 + $0x179] sm:$0x3f] }
  0x96   :  { %v687_v61 = vmul.f32 %v4576_v40, %v4515_v62  ;;  %v697_v50 = vmul.f32 %v4577_v14, %v4520_v15  ;;  %4578 = vst [vmem:[#allocation68_spill] sm:$0xff] %v3285_v58  ;;  %v862_v9 = vadd.f32 %v860_v22, %v852_v6  ;;  %v4579_v17 = vld [vmem:[#allocation35_spill] sm:$0xff]  ;;  %v1271_v55 = vadd.f32 %v1269_v27, %v1260_v51  ;;  %v3298_v1 = vld [vmem:[%s4223_s0 + $0x52] sm:$0xff] }
  0x97   :  { %v326_v10 = vadd.f32 %v4579_v17, %v316_v12  ;;  %v1289_v24 = vmul.f32 %v3262_v3, %v2121_v28  ;;  %4580 = vst [vmem:[#allocation29_spill] sm:$0xff] %v3293_v35  ;;  %4581 = vst [vmem:[#allocation69_spill] sm:$0xff] %v3298_v1  ;;  %v3303_v22 = vld [vmem:[%s4223_s0 + $0xd0] sm:$0xff]  ;;  %v1221_v33 = vmax.f32 %v1219_v26, 0.0  ;;  %v668_v27 = vadd.f32 %v666_v42, %v658_v54  ;;  %v3313_v3 = vld [vmem:[%s4223_s0 + $0x17a] sm:$0x3f] }
  0x98   :  { %4582 = vst [vmem:[#allocation30_spill] sm:$0xff] %v3303_v22  ;;  %v1300_v6 = vmul.f32 %v3270_v59, %v2135_v32  ;;  %v919_v12 = vmul.f32 %v3275_v25, %v2046_v5  ;;  %v872_v51 = vadd.f32 %v870_v16, %v862_v9  ;;  %v4583_v40 = vld [vmem:[#allocation40_spill] sm:$0xff]  ;;  %v1281_v17 = vadd.f32 %v1279_v8, %v1271_v55  ;;  %v3334_v59 = vld [vmem:[%s4223_s0 + $0x1f8] sm:$0x3f] }
  0x99   :  { %v337_v14 = vadd.f32 %v4583_v40, %v326_v10  ;;  %4584 = vst [vmem:[#allocation72_spill] sm:$0xff] %v3313_v3  ;;  %v927_v4 = vmul.f32 %v3285_v58, %v2055_v7  ;;  %v3320_v42 = vld [vmem:[%s4223_s0 + $0xd1] sm:$0xff]  ;;  %1226 = vrot.lane.b32.xlu1 %v1221_v33, %s1958_s26  ;;  %v678_v16 = vadd.f32 %v676_v36, %v668_v27  ;;  %4587 = vst [vmem:[#allocation74_spill] sm:$0xff] %v3334_v59  ;;  %v3339_v36 = vld [vmem:[%s4223_s0 + $0x1f9] sm:$0x3f] }
  0x9a   :  { %4585 = vst [vmem:[#allocation34_spill] sm:$0xff] %v3320_v42  ;;  %v1310_v8 = vmul.f32 %v3293_v35, %v2145_v37  ;;  %v937_v26 = vmul.f32 %v3298_v1, %v2078_v13  ;;  %v948_v54 = vmul.f32 %v3303_v22, %v2096_v18  ;;  %v896_v9 = vmul.f32 %v2830_v45, %v872_v51  ;;  %v4586_v10 = vld [vmem:[#allocation41_spill] sm:$0xff]  ;;  %v4591_v22 = vld [vmem:[#allocation46_spill] sm:$0xff] }
  0x9b   :  { %v347_v55 = vadd.f32 %v4586_v10, %v337_v14  ;;  %v1291_v40 = vadd.f32 %v1289_v24, %v1281_v17  ;;  %4588 = vst [vmem:[#allocation75_spill] sm:$0xff] %v3339_v36  ;;  %v929_v33 = vadd.f32 %v927_v4, %v919_v12  ;;  %v3344_v27 = vld [vmem:[%s4223_s0 + $0xd2] sm:$0xff]  ;;  %v689_v51 = vadd.f32 %v687_v61, %v678_v16  ;;  %v3357_v12 = vld [vmem:[%s4223_s0 + $0x1fa] sm:$0x3f] }
  0x9c   :  { %4589 = vst [vmem:[#allocation35_spill] sm:$0xff] %v3344_v27  ;;  %v4590_v14 = vld [vmem:[#allocation76_spill] sm:$0xff]  ;;  %v1320_v17 = vmul.f32 %v3313_v3, %v2164_v43  ;;  %v958_v10 = vmul.f32 %v3320_v42, %v2109_v23  ;;  %v898_v35 = vadd.f32 %v896_v9, %v2251_v20  ;;  %4592 = vst [vmem:[#allocation40_spill] sm:$0xff] %v3357_v12 }
  0x9d   :  { %v707_v24 = vmul.f32 %v4590_v14, %v4522_v57  ;;  %v357_v1 = vadd.f32 %v4591_v22, %v347_v55  ;;  %v1302_v4 = vadd.f32 %v1300_v6, %v1291_v40  ;;  %v939_v61 = vadd.f32 %v937_v26, %v929_v33  ;;  %v3362_v16 = vld [vmem:[%s4223_s0 + $0x150] sm:$0xff] }
  0x9e   :  { %4593 = vst [vmem:[#allocation41_spill] sm:$0xff] %v3362_v16  ;;  %v699_v14 = vadd.f32 %v697_v50, %v689_v51  ;;  %v1331_v3 = vmul.f32 %v3334_v59, %v2181_v49  ;;  %v1341_v9 = vmul.f32 %v3339_v36, %v2193_v52  ;;  %v968_v22 = vmul.f32 %v3344_v27, %v2121_v28  ;;  %v4594_v55 = vld [vmem:[#allocation52_spill] sm:$0xff]  ;;  %v4596_v59 = vld [vmem:[#allocation79_spill] sm:$0xff] }
  0x9f   :  { %v900_v6 = vmax.f32 %v898_v35, 0.0  ;;  %v368_v40 = vadd.f32 %v4594_v55, %v357_v1  ;;  %v1312_v42 = vadd.f32 %v1310_v8, %v1302_v4  ;;  %v950_v26 = vadd.f32 %v948_v54, %v939_v61  ;;  %v3374_v33 = vld [vmem:[%s4223_s0 + $0x151] sm:$0xff] }
  0xa0   :  { %4595 = vst [vmem:[#allocation76_spill] sm:$0xff] %v3374_v33  ;;  %v709_v50 = vadd.f32 %v707_v24, %v699_v14  ;;  %v1351_v51 = vmul.f32 %v3357_v12, %v2231_v0  ;;  %v979_v36 = vmul.f32 %v3362_v16, %v2135_v32  ;;  %v758_v27 = vmul.f32 %v4596_v59, %v2264_v29  ;;  %v4597_v1 = vld [vmem:[#allocation53_spill] sm:$0xff]  ;;  %v4599_v61 = vld [vmem:[#allocation80_spill] sm:$0xff] }
  0xa1   :  { %v1901_v35 = vpop.eup %1900  ;;  %904 = vrot.lane.b32.xlu0 %v900_v6, %s1956_s25  ;;  %v378_v8 = vadd.f32 %v4597_v1, %v368_v40  ;;  %v1322_v54 = vadd.f32 %v1320_v17, %v1312_v42  ;;  %v960_v4 = vadd.f32 %v958_v10, %v950_v26  ;;  %v3387_v24 = vld [vmem:[%s4223_s0 + $0x152] sm:$0xff]  ;;  %v764_v14 = vmul.f32 %v4599_v61, %v2267_v30  ;;  %v4602_v17 = vld [vmem:[#allocation59_spill] sm:$0xff] }
  0xa2   :  { %4598 = vst [vmem:[#allocation46_spill] sm:$0xff] %v3387_v24  ;;  %v719_v55 = vmul.f32 %v2809_v19, %v709_v50  ;;  %v989_v59 = vmul.f32 %v3374_v33, %v2145_v37  ;;  %v4600_v12 = vld [vmem:[#allocation81_spill] sm:$0xff]  ;;  %v3402_v16 = vld [vmem:[%s4223_s0 + $0x1d0] sm:$0xff]  ;;  %v3411_v33 = vrot.slane %v1901_v35, %v2147_v38  ;;  %v4606_v35 = vld [vmem:[#allocation90_spill] sm:$0xff] }
  0xa3   :  { %v774_v6 = vmul.f32 %v4600_v12, %v2278_v44  ;;  %v4601_v40 = vld [vmem:[#allocation85_spill] sm:$0xff]  ;;  %v388_v10 = vadd.f32 %v4602_v17, %v378_v8  ;;  %v1333_v26 = vadd.f32 %v1331_v3, %v1322_v54  ;;  %v970_v1 = vadd.f32 %v968_v22, %v960_v4  ;;  %4603 = vst [vmem:[#allocation52_spill] sm:$0xff] %v3402_v16 }
  0xa4   :  { %v785_v42 = vmul.f32 %v4601_v40, %v2281_v46  ;;  %v3407_v50 = vld [vmem:[%s4223_s0 + $0x1d1] sm:$0xff]  ;;  %v766_v61 = vadd.f32 %v764_v14, %v758_v27  ;;  %v721_v12 = vadd.f32 %v719_v55, %v2915_v31  ;;  %v999_v3 = vmul.f32 %v3387_v24, %v2164_v43 }
  0xa5   :  { %4604 = vst [vmem:[#allocation79_spill] sm:$0xff] %v3407_v50  ;;  %v4605_v22 = vld [vmem:[#allocation89_spill] sm:$0xff]  ;;  %v398_v54 = vmul.f32 %v4535_v2, %v388_v10  ;;  %v1343_v4 = vadd.f32 %v1341_v9, %v1333_v26  ;;  %v981_v40 = vadd.f32 %v979_v36, %v970_v1  ;;  %v1010_v27 = vmul.f32 %v3402_v16, %v2181_v49  ;;  %v4608_v9 = vld [vmem:[#allocation91_spill] sm:$0xff]  ;;  %v4609_v10 = vld [vmem:[#allocation66_spill] sm:$0xff] }
  0xa6   :  { %v795_v8 = vmul.f32 %v4605_v22, %v4493_v60  ;;  %v776_v17 = vadd.f32 %v774_v6, %v766_v61  ;;  %v723_v58 = vmax.f32 %v721_v12, 0.0  ;;  %v1020_v14 = vmul.f32 %v3407_v50, %v2193_v52  ;;  %v3428_v2 = vld [vmem:[%s4223_s0 + $0x1d2] sm:$0xff]  ;;  %v4610_v1 = vld [vmem:[#allocation67_spill] sm:$0xff] }
  0xa7   :  { %v805_v55 = vmul.f32 %v4606_v35, %v4496_v41  ;;  %v400_v38 = vadd.f32 %v398_v54, %v2915_v31  ;;  %v1353_v24 = vadd.f32 %v1351_v51, %v1343_v4  ;;  %v991_v25 = vadd.f32 %v989_v59, %v981_v40  ;;  %4607 = vst [vmem:[#allocation53_spill] sm:$0xff] %v3428_v2  ;;  %v4611_v51 = vld [vmem:[#allocation70_spill] sm:$0xff]  ;;  %v4612_v40 = vld [vmem:[#allocation73_spill] sm:$0xff]  ;;  %v4636_v50 = vld [vmem:[#allocation103_spill] sm:$0xff] }
  0xa8   :  { %v787_v36 = vadd.f32 %v785_v42, %v776_v17  ;;  %728 = vrot.lane.b32.xlu1 %v723_v58, %s1955_s22  ;;  %v816_v6 = vmul.f32 %v4608_v9, %v4503_v48  ;;  %v437_v26 = vmul.f32 %v4609_v10, %v2264_v29  ;;  %v443_v61 = vmul.f32 %v4610_v1, %v2267_v30  ;;  %v3572_v16 = vld [vmem:[%s4223_s0 + $0x161] sm:$0xff] }
  0xa9   :  { %v453_v59 = vmul.f32 %v4611_v51, %v2278_v44  ;;  %v402_v12 = vmax.f32 %v400_v38, 0.0  ;;  %v1377_v22 = vmul.f32 %v3411_v33, %v1353_v24  ;;  %v1001_v54 = vadd.f32 %v999_v3, %v991_v25  ;;  %v4613_v3 = vld [vmem:[#allocation77_spill] sm:$0xff] }
  0xaa   :  { %v797_v4 = vadd.f32 %v795_v8, %v787_v36  ;;  %v1030_v58 = vmul.f32 %v3428_v2, %v2231_v0  ;;  %v445_v42 = vadd.f32 %v443_v61, %v437_v26  ;;  %v464_v17 = vmul.f32 %v4612_v40, %v2281_v46  ;;  %v4614_v61 = vld [vmem:[#allocation95_spill] sm:$0xff] }
  0xab   :  { %406 = vrot.lane.b32.xlu0 %v402_v12, %s1953_s14  ;;  %v1379_v35 = vadd.f32 %v1377_v22, %v2251_v20  ;;  %v1012_v9 = vadd.f32 %v1010_v27, %v1001_v54  ;;  %v826_v38 = vmul.f32 %v2732_v21, %v4507_v47  ;;  %v836_v25 = vmul.f32 %v2763_v39, %v4510_v34  ;;  %v4615_v27 = vld [vmem:[#allocation78_spill] sm:$0xff]  ;;  %v4616_v22 = vld [vmem:[#allocation92_spill] sm:$0xff]  ;;  %v4617_v54 = vld [vmem:[#allocation93_spill] sm:$0xff]  ;;  %s1959_s14 = smov 14  }
  0xac   :  { %v807_v10 = vadd.f32 %v805_v55, %v797_v4  ;;  %v455_v24 = vadd.f32 %v453_v59, %v445_v42  ;;  %v474_v8 = vmul.f32 %v4613_v3, %v4493_v60  ;;  %v847_v51 = vmul.f32 %v4614_v61, %v4515_v62 }
  0xad   :  { %v1381_v36 = vmax.f32 %v1379_v35, 0.0  ;;  %v1022_v26 = vadd.f32 %v1020_v14, %v1012_v9  ;;  %v484_v55 = vmul.f32 %v4615_v27, %v4496_v41  ;;  %v597_v21 = vmul.f32 %v4616_v22, %v2264_v29  ;;  %v4624_v27 = vld [vmem:[#allocation96_spill] sm:$0xff] }
  0xae   :  { %v818_v1 = vadd.f32 %v816_v6, %v807_v10  ;;  %v466_v12 = vadd.f32 %v464_v17, %v455_v24  ;;  %v603_v39 = vmul.f32 %v4617_v54, %v2267_v30  ;;  %v857_v14 = vmul.f32 %v2783_v63, %v4520_v15  ;;  %v4618_v6 = vld [vmem:[#allocation94_spill] sm:$0xff]  ;;  %v4620_v24 = vld [vmem:[#allocation113_spill] sm:$0xff] }
  0xaf   :  { %1386 = vrot.lane.b32.xlu1 %v1381_v36, %s1959_s14  ;;  %v1032_v59 = vadd.f32 %v1030_v58, %v1022_v26  ;;  %v613_v42 = vmul.f32 %v4618_v6, %v2278_v44  ;;  %v4619_v17 = vld [vmem:[#allocation82_spill] sm:$0xff]  ;;  %v624_v10 = vmul.f32 %v2778_v11, %v2281_v46  ;;  %v4621_v58 = vld [vmem:[#allocation97_spill] sm:$0xff]  ;;  %v4622_v36 = vld [vmem:[#allocation83_spill] sm:$0xff]  ;;  %v634_v22 = vmul.f32 %v4624_v27, %v4493_v60 }
  0xb0   :  { %v828_v4 = vadd.f32 %v826_v38, %v818_v1  ;;  %v476_v40 = vadd.f32 %v474_v8, %v466_v12  ;;  %v495_v35 = vmul.f32 %v4619_v17, %v4503_v48  ;;  %v605_v9 = vadd.f32 %v603_v39, %v597_v21  ;;  %v3477_v8 = vld [vmem:[%s4223_s0 + $0x60] sm:$0xff]  ;;  %v4623_v1 = vld [vmem:[#allocation84_spill] sm:$0xff] }
  0xb1   :  { %v1056_v3 = vmul.f32 %v4620_v24, %v1032_v59  ;;  %v867_v38 = vmul.f32 %v4621_v58, %v4522_v57  ;;  %v505_v63 = vmul.f32 %v4622_v36, %v4507_v47  ;;  %v3482_v26 = vld [vmem:[%s4223_s0 + $0x61] sm:$0xff] }
  0xb2   :  { %v838_v61 = vadd.f32 %v836_v25, %v828_v4  ;;  %v486_v11 = vadd.f32 %v484_v55, %v476_v40  ;;  %v515_v25 = vmul.f32 %v4623_v1, %v4510_v34  ;;  %v615_v12 = vadd.f32 %v613_v42, %v605_v9  ;;  %v3491_v21 = vld [vmem:[%s4223_s0 + $0x62] sm:$0xff] }
  0xb3   :  { %v1058_v54 = vadd.f32 %v1056_v3, %v2251_v20  ;;  %v4625_v59 = vld [vmem:[#allocation86_spill] sm:$0xff]  ;;  %v1079_v9 = vmul.f32 %v3477_v8, %v2046_v5  ;;  %v1087_v3 = vmul.f32 %v3482_v26, %v2055_v7  ;;  %v4627_v58 = vld [vmem:[#allocation99_spill] sm:$0xff]  ;;  %v1097_v1 = vmul.f32 %v3491_v21, %v2078_v13 }
  0xb4   :  { %v849_v39 = vadd.f32 %v847_v51, %v838_v61  ;;  %v526_v4 = vmul.f32 %v4625_v59, %v4515_v62  ;;  %v4626_v55 = vld [vmem:[#allocation98_spill] sm:$0xff]  ;;  %v497_v40 = vadd.f32 %v495_v35, %v486_v11  ;;  %v626_v17 = vadd.f32 %v624_v10, %v615_v12 }
  0xb5   :  { %v644_v6 = vmul.f32 %v4626_v55, %v4496_v41  ;;  %v3501_v42 = vld [vmem:[%s4223_s0 + $0xe0] sm:$0xff]  ;;  %v1060_v51 = vmax.f32 %v1058_v54, 0.0  ;;  %v655_v36 = vmul.f32 %v4627_v58, %v4503_v48  ;;  %v1089_v11 = vadd.f32 %v1087_v3, %v1079_v9  ;;  %v4630_v55 = vld [vmem:[#allocation88_spill] sm:$0xff] }
  0xb6   :  { %v859_v61 = vadd.f32 %v857_v14, %v849_v39  ;;  %v3514_v27 = vld [vmem:[%s4223_s0 + $0xe1] sm:$0xff]  ;;  %v507_v35 = vadd.f32 %v505_v63, %v497_v40  ;;  %v636_v10 = vadd.f32 %v634_v22, %v626_v17  ;;  %v1108_v12 = vmul.f32 %v3501_v42, %v2096_v18  ;;  %v4631_v63 = vld [vmem:[#allocation100_spill] sm:$0xff] }
  0xb7   :  { %v3521_v14 = vld [vmem:[%s4223_s0 + $0xe2] sm:$0xff]  ;;  %1064 = vrot.lane.b32.xlu0 %v1060_v51, %s1957_s11  ;;  %v546_v58 = vmul.f32 %v4630_v55, %v4522_v57  ;;  %v665_v22 = vmul.f32 %v4631_v63, %v4507_v47  ;;  %v3533_v40 = vld [vmem:[%s4223_s0 + $0x70] sm:$0xff]  ;;  %v1099_v3 = vadd.f32 %v1097_v1, %v1089_v11  ;;  %v4633_v55 = vld [vmem:[#allocation101_spill] sm:$0xff] }
  0xb8   :  { %4628 = vst [vmem:[#allocation80_spill] sm:$0xff] %v3521_v14  ;;  %v869_v54 = vadd.f32 %v867_v38, %v859_v61  ;;  %v4629_v39 = vld [vmem:[#allocation87_spill] sm:$0xff]  ;;  %v517_v17 = vadd.f32 %v515_v25, %v507_v35  ;;  %v646_v9 = vadd.f32 %v644_v6, %v636_v10  ;;  %v1118_v38 = vmul.f32 %v3514_v27, %v2109_v23  ;;  %v3540_v51 = vld [vmem:[%s4223_s0 + $0x71] sm:$0xff]  ;;  %v4634_v6 = vld [vmem:[#allocation102_spill] sm:$0xff] }
  0xb9   :  { %v536_v59 = vmul.f32 %v4629_v39, %v4520_v15  ;;  %v3545_v61 = vld [vmem:[%s4223_s0 + $0x72] sm:$0xff]  ;;  %v675_v25 = vmul.f32 %v4633_v55, %v4510_v34  ;;  %v686_v1 = vmul.f32 %v4634_v6, %v4515_v62  ;;  %v1128_v35 = vmul.f32 %v3521_v14, %v2121_v28  ;;  %v3557_v10 = vld [vmem:[%s4223_s0 + $0x160] sm:$0xff] }
  0xba   :  { %4632 = vst [vmem:[#allocation81_spill] sm:$0xff] %v3545_v61  ;;  %v879_v39 = vmul.f32 %v2830_v45, %v869_v54  ;;  %4635 = vst [vmem:[#allocation85_spill] sm:$0xff] %v3557_v10  ;;  %v528_v11 = vadd.f32 %v526_v4, %v517_v17  ;;  %v657_v63 = vadd.f32 %v655_v36, %v646_v9  ;;  %v3564_v55 = vld [vmem:[%s4223_s0 + $0xf0] sm:$0xff] }
  0xbb   :  { %v1110_v2 = vadd.f32 %v1108_v12, %v1099_v3  ;;  %v1239_v54 = vmul.f32 %v3533_v40, %v2046_v5  ;;  %v696_v14 = vmul.f32 %v4636_v50, %v4520_v15  ;;  %v1247_v4 = vmul.f32 %v3540_v51, %v2055_v7  ;;  %v3583_v50 = vld [vmem:[%s4223_s0 + $0x162] sm:$0xff]  ;;  %v3593_v5 = vld [vmem:[%s4223_s0 + $0xf1] sm:$0xff] }
  0xbc   :  { %v881_v6 = vadd.f32 %v879_v39, %v2915_v31  ;;  %v1257_v36 = vmul.f32 %v3545_v61, %v2078_v13  ;;  %v538_v12 = vadd.f32 %v536_v59, %v528_v11  ;;  %v667_v17 = vadd.f32 %v665_v22, %v657_v63  ;;  %4637 = vst [vmem:[#allocation59_spill] sm:$0xff] %v3583_v50  ;;  %v3588_v39 = vld [vmem:[%s4223_s0 + $0x1e0] sm:$0xff]  ;;  %v3602_v63 = vld [vmem:[%s4223_s0 + $0xf2] sm:$0xff] }
  0xbd   :  { %v1120_v9 = vadd.f32 %v1118_v38, %v1110_v2  ;;  %v1139_v3 = vmul.f32 %v3557_v10, %v2135_v32  ;;  %4638 = vst [vmem:[#allocation89_spill] sm:$0xff] %v3588_v39  ;;  %v4639_v2 = vld [vmem:[#allocation104_spill] sm:$0xff]  ;;  %v1249_v38 = vadd.f32 %v1247_v4, %v1239_v54  ;;  %v1268_v11 = vmul.f32 %v3564_v55, %v2096_v18  ;;  %v3614_v4 = vld [vmem:[%s4223_s0 + $0x1e1] sm:$0xff] }
  0xbe   :  { %v883_v59 = vmax.f32 %v881_v6, 0.0  ;;  %v706_v22 = vmul.f32 %v4639_v2, %v4522_v57  ;;  %4640 = vst [vmem:[#allocation90_spill] sm:$0xff] %v3602_v63  ;;  %v548_v13 = vadd.f32 %v546_v58, %v538_v12  ;;  %v677_v7 = vadd.f32 %v675_v25, %v667_v17  ;;  %4641 = vst [vmem:[#allocation91_spill] sm:$0xff] %v3614_v4  ;;  %v4642_v25 = vld [vmem:[#allocation71_spill] sm:$0xff] }
  0xbf   :  { %v1130_v61 = vadd.f32 %v1128_v35, %v1120_v9  ;;  %v1149_v10 = vmul.f32 %v3572_v16, %v2145_v37  ;;  %v1159_v6 = vmul.f32 %v3583_v50, %v2164_v43  ;;  %v1170_v54 = vmul.f32 %v3588_v39, %v2181_v49  ;;  %v3629_v18 = vld [vmem:[%s4223_s0 + $0x1e2] sm:$0xff] }
  0xc0   :  { %888 = vrot.lane.b32.xlu1 %v883_v59, %s1956_s25  ;;  %v1259_v2 = vadd.f32 %v1257_v36, %v1249_v38  ;;  %v1278_v58 = vmul.f32 %v3593_v5, %v2109_v23  ;;  %v558_v35 = vmul.f32 %v4642_v25, %v548_v13  ;;  %v688_v12 = vadd.f32 %v686_v1, %v677_v7  ;;  %v3624_v59 = vld [vmem:[%s4223_s0 + $0x170] sm:$0xff]  ;;  %v4644_v38 = vld [vmem:[#allocation27_spill] sm:$0xff] }
  0xc1   :  { %v1141_v17 = vadd.f32 %v1139_v3, %v1130_v61  ;;  %v1288_v9 = vmul.f32 %v3602_v63, %v2121_v28  ;;  %4643 = vst [vmem:[#allocation66_spill] sm:$0xff] %v3624_v59  ;;  %v918_v23 = vmul.f32 %v4644_v38, %v2264_v29  ;;  %v4645_v7 = vld [vmem:[#allocation47_spill] sm:$0xff]  ;;  %v4646_v61 = vld [vmem:[#allocation33_spill] sm:$0xff]  ;;  %v1180_v39 = vmul.f32 %v3614_v4, %v2193_v52  ;;  %v4648_v63 = vld [vmem:[#allocation38_spill] sm:$0xff] }
  0xc2   :  { %v1270_v36 = vadd.f32 %v1268_v11, %v1259_v2  ;;  %v924_v13 = vmul.f32 %v4645_v7, %v2267_v30  ;;  %v934_v1 = vmul.f32 %v4646_v61, %v2278_v44  ;;  %v560_v3 = vadd.f32 %v558_v35, %v2915_v31  ;;  %v3643_v11 = vld [vmem:[%s4223_s0 + $0x171] sm:$0xff] }
  0xc3   :  { %v698_v25 = vadd.f32 %v696_v14, %v688_v12  ;;  %v1151_v28 = vadd.f32 %v1149_v10, %v1141_v17  ;;  %v1299_v38 = vmul.f32 %v3624_v59, %v2135_v32  ;;  %v3650_v7 = vld [vmem:[%s4223_s0 + $0x172] sm:$0xff]  ;;  %v1309_v4 = vmul.f32 %v3643_v11, %v2145_v37 }
  0xc4   :  { %v1280_v2 = vadd.f32 %v1278_v58, %v1270_v36  ;;  %v3655_v14 = vld [vmem:[%s4223_s0 + $0x1f0] sm:$0xff]  ;;  %v926_v10 = vadd.f32 %v924_v13, %v918_v23  ;;  %v562_v17 = vmax.f32 %v560_v3, 0.0  ;;  %v1190_v36 = vmul.f32 %v3629_v18, %v2231_v0 }
  0xc5   :  { %v4647_v35 = vld [vmem:[#allocation48_spill] sm:$0xff]  ;;  %v708_v61 = vadd.f32 %v706_v22, %v698_v25  ;;  %v1161_v58 = vadd.f32 %v1159_v6, %v1151_v28  ;;  %v955_v50 = vmul.f32 %v4648_v63, %v4493_v60  ;;  %v1319_v22 = vmul.f32 %v3650_v7, %v2164_v43  ;;  %v4649_v63 = vld [vmem:[#allocation31_spill] sm:$0xff] }
  0xc6   :  { %v945_v12 = vmul.f32 %v4647_v35, %v2281_v46  ;;  %v1290_v32 = vadd.f32 %v1288_v9, %v1280_v2  ;;  %v936_v59 = vadd.f32 %v934_v1, %v926_v10  ;;  %566 = vrot.lane.b32.xlu0 %v562_v17, %s1954_s10  ;;  %v1330_v28 = vmul.f32 %v3655_v14, %v2181_v49  ;;  %v3674_v6 = vld [vmem:[%s4223_s0 + $0x1f1] sm:$0xff]  ;;  %v4650_v25 = vld [vmem:[#allocation39_spill] sm:$0xff]  ;;  %s1968_s10 = smov 118  }
  0xc7   :  { %v718_v23 = vmul.f32 %v2809_v19, %v708_v61  ;;  %v1172_v13 = vadd.f32 %v1170_v54, %v1161_v58  ;;  %v965_v3 = vmul.f32 %v4649_v63, %v4496_v41  ;;  %v1078_v19 = vmul.f32 %v4650_v25, %v2264_v29  ;;  %v3684_v10 = vld [vmem:[%s4223_s0 + $0x1f2] sm:$0xff] }
  0xc8   :  { %v1301_v9 = vadd.f32 %v1299_v38, %v1290_v32  ;;  %v947_v1 = vadd.f32 %v945_v12, %v936_v59  ;;  %v4651_v35 = vld [vmem:[#allocation32_spill] sm:$0xff]  ;;  %v4652_v32 = vld [vmem:[#allocation54_spill] sm:$0xff]  ;;  %v1340_v12 = vmul.f32 %v3674_v6, %v2193_v52  ;;  %v4653_v58 = vld [vmem:[#allocation49_spill] sm:$0xff] }
  0xc9   :  { %v720_v54 = vadd.f32 %v718_v23, %v2915_v31  ;;  %v1182_v2 = vadd.f32 %v1180_v39, %v1172_v13  ;;  %v1084_v17 = vmul.f32 %v4651_v35, %v2267_v30  ;;  %v1094_v59 = vmul.f32 %v4652_v32, %v2278_v44  ;;  %v4654_v25 = vld [vmem:[#allocation36_spill] sm:$0xff] }
  0xca   :  { %v1311_v38 = vadd.f32 %v1309_v4, %v1301_v9  ;;  %v957_v61 = vadd.f32 %v955_v50, %v947_v1  ;;  %v976_v23 = vmul.f32 %v4653_v58, %v4503_v48  ;;  %v1105_v49 = vmul.f32 %v4654_v25, %v2281_v46  ;;  %v4655_v4 = vld [vmem:[#allocation55_spill] sm:$0xff]  ;;  %v4656_v1 = vld [vmem:[#allocation44_spill] sm:$0xff] }
  0xcb   :  { %v722_v39 = vmax.f32 %v720_v54, 0.0  ;;  %v1192_v13 = vadd.f32 %v1190_v36, %v1182_v2  ;;  %v1086_v63 = vadd.f32 %v1084_v17, %v1078_v19  ;;  %v1350_v35 = vmul.f32 %v3684_v10, %v2231_v0  ;;  %v4657_v19 = vld [vmem:[#allocation37_spill] sm:$0xff]  ;;  %v4658_v32 = vld [vmem:[#allocation60_spill] sm:$0xff] }
  0xcc   :  { %v1321_v43 = vadd.f32 %v1319_v22, %v1311_v38  ;;  %v967_v37 = vadd.f32 %v965_v3, %v957_v61  ;;  %v986_v9 = vmul.f32 %v4655_v4, %v4507_v47  ;;  %v996_v54 = vmul.f32 %v4656_v1, %v4510_v34  ;;  %v4659_v3 = vld [vmem:[#allocation61_spill] sm:$0xff]  ;;  %v4661_v4 = vld [vmem:[#allocation50_spill] sm:$0xff] }
  0xcd   :  { %726 = vrot.lane.b32.xlu1 %v722_v39, %s1955_s22  ;;  %v1216_v50 = vmul.f32 %v3200_v53, %v1192_v13  ;;  %v1096_v36 = vadd.f32 %v1094_v59, %v1086_v63  ;;  %v1115_v2 = vmul.f32 %v4657_v19, %v4493_v60  ;;  %v1007_v38 = vmul.f32 %v4658_v32, %v4515_v62  ;;  %v4660_v13 = vld [vmem:[#allocation62_spill] sm:$0xff]  ;;  %s91_s22 = sld [smem:[#allocation8]] }
  0xce   :  { %v1332_v17 = vadd.f32 %v1330_v28, %v1321_v43  ;;  %v978_v22 = vadd.f32 %v976_v23, %v967_v37  ;;  %v1125_v61 = vmul.f32 %v4659_v3, %v4496_v41  ;;  %v757_v25 = vmul.f32 %v4660_v13, %v2264_v29  ;;  %v4662_v43 = vld [vmem:[#allocation43_spill] sm:$0xff]  ;;  %v4665_v13 = vld [vmem:[#allocation45_spill] sm:$0xff] }
  0xcf   :  { %v1218_v58 = vadd.f32 %v1216_v50, %v2251_v20  ;;  %v1107_v39 = vadd.f32 %v1105_v49, %v1096_v36  ;;  %v763_v59 = vmul.f32 %v4661_v4, %v2267_v30  ;;  %v1136_v37 = vmul.f32 %v4662_v43, %v4503_v48  ;;  %v4663_v28 = vld [vmem:[#allocation51_spill] sm:$0xff]  ;;  %v4664_v50 = vld [vmem:[#allocation105_spill] sm:$0xff] }
  0xd0   :  { %v1342_v63 = vadd.f32 %v1340_v12, %v1332_v17  ;;  %v988_v1 = vadd.f32 %v986_v9, %v978_v22  ;;  %v773_v23 = vmul.f32 %v4663_v28, %v2278_v44  ;;  %v784_v49 = vmul.f32 %v4664_v50, %v2281_v46  ;;  %v4666_v12 = vld [vmem:[#allocation42_spill] sm:$0xff]  ;;  %v4667_v22 = vld [vmem:[#allocation23_spill] sm:$0xff] }
  0xd1   :  { %v1220_v19 = vmax.f32 %v1218_v58, 0.0  ;;  %v1117_v32 = vadd.f32 %v1115_v2, %v1107_v39  ;;  %v765_v3 = vadd.f32 %v763_v59, %v757_v25  ;;  %v1017_v52 = vmul.f32 %v4665_v13, %v4520_v15  ;;  %v4668_v2 = vld [vmem:[#allocation109_spill] sm:$0xff] }
  0xd2   :  { %v1352_v36 = vadd.f32 %v1350_v35, %v1342_v63  ;;  %v998_v0 = vadd.f32 %v996_v54, %v988_v1  ;;  %v1027_v9 = vmul.f32 %v4666_v12, %v4522_v57  ;;  %v1146_v4 = vmul.f32 %v4667_v22, %v4507_v47  ;;  %v4669_v54 = vld [vmem:[#allocation106_spill] sm:$0xff]  ;;  %v4670_v63 = vld [vmem:[#allocation107_spill] sm:$0xff]  ;;  %v4674_v12 = vld [vmem:[#allocation108_spill] sm:$0xff] }
  0xd3   :  { %1224 = vrot.lane.b32.xlu0 %v1220_v19, %s1958_s26  ;;  %v1127_v17 = vadd.f32 %v1125_v61, %v1117_v32  ;;  %v775_v58 = vadd.f32 %v773_v23, %v765_v3  ;;  %v794_v39 = vmul.f32 %v4668_v2, %v4493_v60  ;;  %v1156_v59 = vmul.f32 %v4669_v54, %v4510_v34  ;;  %v4671_v61 = vld [vmem:[#allocation111_spill] sm:$0xff]  ;;  %v4672_v32 = vld [vmem:[#allocation57_spill] sm:$0xff] }
  0xd4   :  { %v1376_v25 = vmul.f32 %v3411_v33, %v1352_v36  ;;  %v1009_v35 = vadd.f32 %v1007_v38, %v998_v0  ;;  %v1167_v1 = vmul.f32 %v4670_v63, %v4515_v62  ;;  %v804_v19 = vmul.f32 %v4671_v61, %v4496_v41  ;;  %v4673_v38 = vld [vmem:[#allocation58_spill] sm:$0xff] }
  0xd5   :  { %v1138_v43 = vadd.f32 %v1136_v37, %v1127_v17  ;;  %v786_v28 = vadd.f32 %v784_v49, %v775_v58  ;;  %v1238_v23 = vmul.f32 %v4672_v32, %v2264_v29  ;;  %v1244_v0 = vmul.f32 %v3216_v56, %v2267_v30  ;;  %v4675_v17 = vld [vmem:[#allocation112_spill] sm:$0xff]  ;;  %v4677_v56 = vld [vmem:[#allocation110_spill] sm:$0xff] }
  0xd6   :  { %v1378_v3 = vadd.f32 %v1376_v25, %v2251_v20  ;;  %v1019_v50 = vadd.f32 %v1017_v52, %v1009_v35  ;;  %v1254_v36 = vmul.f32 %v4673_v38, %v2278_v44  ;;  %v1177_v37 = vmul.f32 %v4674_v12, %v4520_v15  ;;  %v4676_v25 = vld [vmem:[#allocation63_spill] sm:$0xff] }
  0xd7   :  { %v1148_v13 = vadd.f32 %v1146_v4, %v1138_v43  ;;  %v796_v49 = vadd.f32 %v794_v39, %v786_v28  ;;  %v815_v22 = vmul.f32 %v4675_v17, %v4503_v48  ;;  %v1246_v54 = vadd.f32 %v1244_v0, %v1238_v23  ;;  %v4678_v4 = vld [vmem:[#allocation114_spill] sm:$0xff]  ;;  %v4679_v28 = vld [vmem:[#allocation115_spill] sm:$0xff]  ;;  %v4680_v23 = vld [vmem:[#allocation64_spill] sm:$0xff] }
  0xd8   :  { %v1380_v58 = vmax.f32 %v1378_v3, 0.0  ;;  %v1029_v2 = vadd.f32 %v1027_v9, %v1019_v50  ;;  %v1265_v52 = vmul.f32 %v4676_v25, %v2281_v46  ;;  %v1187_v63 = vmul.f32 %v4677_v56, %v4522_v57  ;;  %v4681_v0 = vld [vmem:[#allocation116_spill] sm:$0xff]  ;;  %v4683_v17 = vld [vmem:[#allocation26_spill] sm:$0xff] }
  0xd9   :  { %v1158_v35 = vadd.f32 %v1156_v59, %v1148_v13  ;;  %v806_v61 = vadd.f32 %v804_v19, %v796_v49  ;;  %v825_v43 = vmul.f32 %v4678_v4, %v4507_v47  ;;  %v835_v32 = vmul.f32 %v4679_v28, %v4510_v34  ;;  %v4682_v19 = vld [vmem:[#allocation65_spill] sm:$0xff] }
  0xda   :  { %1384 = vrot.lane.b32.xlu1 %v1380_v58, %s1959_s14  ;;  %v1039_v39 = vmul.f32 %v4620_v24, %v1029_v2  ;;  %v1256_v9 = vadd.f32 %v1254_v36, %v1246_v54  ;;  %v1275_v3 = vmul.f32 %v4680_v23, %v4493_v60  ;;  %v846_v38 = vmul.f32 %v4681_v0, %v4515_v62  ;;  %v4684_v2 = vld [vmem:[#allocation68_spill] sm:$0xff]  ;;  %v4688_v0 = vld [vmem:[#allocation117_spill] sm:$0xff] }
  0xdb   :  { %v1169_v50 = vadd.f32 %v1167_v1, %v1158_v35  ;;  %v817_v59 = vadd.f32 %v815_v22, %v806_v61  ;;  %v1285_v13 = vmul.f32 %v4682_v19, %v4496_v41  ;;  %v917_v58 = vmul.f32 %v4683_v17, %v2264_v29  ;;  %v4685_v1 = vld [vmem:[#allocation25_spill] sm:$0xff] }
  0xdc   :  { %v1041_v12 = vadd.f32 %v1039_v39, %v2915_v31  ;;  %v1267_v49 = vadd.f32 %v1265_v52, %v1256_v9  ;;  %v923_v36 = vmul.f32 %v4684_v2, %v2267_v30  ;;  %v1296_v22 = vmul.f32 %v4685_v1, %v4503_v48  ;;  %v4686_v35 = vld [vmem:[#allocation69_spill] sm:$0xff]  ;;  %v4687_v39 = vld [vmem:[#allocation30_spill] sm:$0xff] }
  0xdd   :  { %v1179_v54 = vadd.f32 %v1177_v37, %v1169_v50  ;;  %v827_v25 = vadd.f32 %v825_v43, %v817_v59  ;;  %v933_v56 = vmul.f32 %v4686_v35, %v2278_v44  ;;  %v944_v52 = vmul.f32 %v4687_v39, %v2281_v46  ;;  %v4689_v37 = vld [vmem:[#allocation56_spill] sm:$0xff]  ;;  %v4690_v59 = vld [vmem:[#allocation29_spill] sm:$0xff] }
  0xde   :  { %v1043_v61 = vmax.f32 %v1041_v12, 0.0  ;;  %v1277_v4 = vadd.f32 %v1275_v3, %v1267_v49  ;;  %v925_v28 = vadd.f32 %v923_v36, %v917_v58  ;;  %v856_v19 = vmul.f32 %v4688_v0, %v4520_v15  ;;  %v4691_v3 = vld [vmem:[#allocation34_spill] sm:$0xff] }
  0xdf   :  { %v1189_v9 = vadd.f32 %v1187_v63, %v1179_v54  ;;  %v837_v23 = vadd.f32 %v835_v32, %v827_v25  ;;  %v866_v43 = vmul.f32 %v4689_v37, %v4522_v57  ;;  %v1306_v17 = vmul.f32 %v4690_v59, %v4507_v47  ;;  %v4692_v32 = vld [vmem:[#allocation72_spill] sm:$0xff]  ;;  %v4693_v36 = vld [vmem:[#allocation74_spill] sm:$0xff] }
  0xe0   :  { %1048 = vrot.lane.b32.xlu0 %v1043_v61, %s1957_s11  ;;  %v1287_v50 = vadd.f32 %v1285_v13, %v1277_v4  ;;  %v935_v12 = vadd.f32 %v933_v56, %v925_v28  ;;  %v954_v49 = vmul.f32 %v4691_v3, %v4493_v60  ;;  %v1316_v2 = vmul.f32 %v4692_v32, %v4510_v34  ;;  %v4694_v13 = vld [vmem:[#allocation35_spill] sm:$0xff] }
  0xe1   :  { %v1199_v58 = vmul.f32 %v3200_v53, %v1189_v9  ;;  %v848_v63 = vadd.f32 %v846_v38, %v837_v23  ;;  %v1327_v54 = vmul.f32 %v4693_v36, %v4515_v62  ;;  %v964_v35 = vmul.f32 %v4694_v13, %v4496_v41  ;;  %v4695_v9 = vld [vmem:[#allocation75_spill] sm:$0xff]  ;;  %v4696_v23 = vld [vmem:[#allocation41_spill] sm:$0xff]  ;;  %v4700_v36 = vld [vmem:[#allocation52_spill] sm:$0xff] }
  0xe2   :  { %v1298_v25 = vadd.f32 %v1296_v22, %v1287_v50  ;;  %v946_v1 = vadd.f32 %v944_v52, %v935_v12  ;;  %v1077_v56 = vmul.f32 %v3477_v8, %v2264_v29  ;;  %v1083_v38 = vmul.f32 %v3482_v26, %v2267_v30  ;;  %v4697_v26 = vld [vmem:[#allocation40_spill] sm:$0xff] }
  0xe3   :  { %v1201_v61 = vadd.f32 %v1199_v58, %v2915_v31  ;;  %v858_v4 = vadd.f32 %v856_v19, %v848_v63  ;;  %v1093_v28 = vmul.f32 %v3491_v21, %v2278_v44  ;;  %v1337_v22 = vmul.f32 %v4695_v9, %v4520_v15  ;;  %v4698_v21 = vld [vmem:[#allocation76_spill] sm:$0xff]  ;;  %v4699_v58 = vld [vmem:[#allocation46_spill] sm:$0xff] }
  0xe4   :  { %v1308_v39 = vadd.f32 %v1306_v17, %v1298_v25  ;;  %v956_v52 = vadd.f32 %v954_v49, %v946_v1  ;;  %v975_v0 = vmul.f32 %v4696_v23, %v4503_v48  ;;  %v1085_v8 = vadd.f32 %v1083_v38, %v1077_v56  ;;  %v4701_v1 = vld [vmem:[#allocation80_spill] sm:$0xff] }
  0xe5   :  { %v1203_v37 = vmax.f32 %v1201_v61, 0.0  ;;  %v868_v50 = vadd.f32 %v866_v43, %v858_v4  ;;  %v1104_v19 = vmul.f32 %v3501_v42, %v2281_v46  ;;  %v1347_v12 = vmul.f32 %v4697_v26, %v4522_v57 }
  0xe6   :  { %v1318_v59 = vadd.f32 %v1316_v2, %v1308_v39  ;;  %v966_v3 = vadd.f32 %v964_v35, %v956_v52  ;;  %v985_v17 = vmul.f32 %v4698_v21, %v4507_v47  ;;  %v995_v63 = vmul.f32 %v4699_v58, %v4510_v34 }
  0xe7   :  { %1208 = vrot.lane.b32.xlu1 %v1203_v37, %s1958_s26  ;;  %v878_v49 = vmul.f32 %v2830_v45, %v868_v50  ;;  %v1095_v43 = vadd.f32 %v1093_v28, %v1085_v8  ;;  %v1114_v32 = vmul.f32 %v3514_v27, %v4493_v60  ;;  %v1006_v25 = vmul.f32 %v4700_v36, %v4515_v62  ;;  %v4702_v27 = vld [vmem:[#allocation85_spill] sm:$0xff] }
  0xe8   :  { %v1329_v42 = vadd.f32 %v1327_v54, %v1318_v59  ;;  %v977_v2 = vadd.f32 %v975_v0, %v966_v3  ;;  %v1124_v13 = vmul.f32 %v4701_v1, %v4496_v41  ;;  %v1237_v45 = vmul.f32 %v3533_v40, %v2264_v29  ;;  %v4703_v28 = vld [vmem:[#allocation81_spill] sm:$0xff]  ;;  %v4704_v40 = vld [vmem:[#allocation79_spill] sm:$0xff] }
  0xe9   :  { %v880_v35 = vadd.f32 %v878_v49, %v2915_v31  ;;  %v1106_v56 = vadd.f32 %v1104_v19, %v1095_v43  ;;  %v1243_v61 = vmul.f32 %v3540_v51, %v2267_v30  ;;  %v1135_v54 = vmul.f32 %v4702_v27, %v4503_v48 }
  0xea   :  { %v1339_v4 = vadd.f32 %v1337_v22, %v1329_v42  ;;  %v987_v38 = vadd.f32 %v985_v17, %v977_v2  ;;  %v1253_v39 = vmul.f32 %v4703_v28, %v2278_v44  ;;  %v1264_v0 = vmul.f32 %v3564_v55, %v2281_v46  ;;  %v4705_v55 = vld [vmem:[#allocation53_spill] sm:$0xff]  ;;  %v4706_v17 = vld [vmem:[#allocation59_spill] sm:$0xff] }
  0xeb   :  { %v882_v9 = vmax.f32 %v880_v35, 0.0  ;;  %v1116_v52 = vadd.f32 %v1114_v32, %v1106_v56  ;;  %v1245_v23 = vadd.f32 %v1243_v61, %v1237_v45  ;;  %v1016_v8 = vmul.f32 %v4704_v40, %v4520_v15  ;;  %v4710_v61 = vld [vmem:[#allocation91_spill] sm:$0xff] }
  0xec   :  { %v1349_v37 = vadd.f32 %v1347_v12, %v1339_v4  ;;  %v997_v50 = vadd.f32 %v995_v63, %v987_v38  ;;  %v1145_v22 = vmul.f32 %v3572_v16, %v4507_v47  ;;  %v1274_v59 = vmul.f32 %v3593_v5, %v4493_v60  ;;  %v4707_v63 = vld [vmem:[#allocation90_spill] sm:$0xff]  ;;  %v4708_v5 = vld [vmem:[#allocation89_spill] sm:$0xff]  ;;  %v3865_v28 = vld [vmem:[%s4223_s0 + $0xa] sm:$0x3f] }
  0xed   :  { %886 = vrot.lane.b32.xlu0 %v882_v9, %s1956_s25  ;;  %v1126_v51 = vadd.f32 %v1124_v13, %v1116_v52  ;;  %v1255_v19 = vadd.f32 %v1253_v39, %v1245_v23  ;;  %v1026_v12 = vmul.f32 %v4705_v55, %v4522_v57  ;;  %v1155_v49 = vmul.f32 %v4706_v17, %v4510_v34  ;;  %v3851_v13 = vld [vmem:[%s4223_s0 + $0x9] sm:$0x3f]  ;;  %v4711_v9 = vld [vmem:[#allocation12_spill] sm:$0xff] }
  0xee   :  { %v1359_v26 = vmul.f32 %v3411_v33, %v1349_v37  ;;  %v1008_v3 = vadd.f32 %v1006_v25, %v997_v50  ;;  %v1284_v43 = vmul.f32 %v4707_v63, %v4496_v41  ;;  %v1166_v2 = vmul.f32 %v4708_v5, %v4515_v62  ;;  %v4709_v25 = vld [vmem:[#allocation66_spill] sm:$0xff]  ;;  %v3878_v50 = vld [vmem:[%s4223_s0 + $0x88] sm:$0x3f] }
  0xef   :  { %v1137_v21 = vadd.f32 %v1135_v54, %v1126_v51  ;;  %v1266_v58 = vadd.f32 %v1264_v0, %v1255_v19  ;;  %v1295_v1 = vmul.f32 %v4709_v25, %v4503_v48  ;;  %v1176_v4 = vmul.f32 %v4710_v61, %v4520_v15  ;;  %v3860_v54 = vld [vmem:[%s4223_s0 + $0x8] sm:$0x3f] }
  0xf0   :  { %v1361_v16 = vadd.f32 %v1359_v26, %v2915_v31  ;;  %v1018_v32 = vadd.f32 %v1016_v8, %v1008_v3  ;;  %v1305_v27 = vmul.f32 %v3643_v11, %v4507_v47  ;;  %v122_v52 = vmul.f32 %v4711_v9, %v3851_v13  ;;  %v4712_v8 = vld [vmem:[#allocation13_spill] sm:$0xff]  ;;  %v3893_v26 = vld [vmem:[%s4223_s0 + $0x89] sm:$0x3f]  ;;  %v3898_v3 = vld [vmem:[%s4223_s0 + $0x1] sm:$0xff] }
  0xf1   :  { %v1147_v42 = vadd.f32 %v1145_v22, %v1137_v21  ;;  %v1276_v36 = vadd.f32 %v1274_v59, %v1266_v58  ;;  %v1186_v11 = vmul.f32 %v3629_v18, %v4522_v57  ;;  %v1315_v37 = vmul.f32 %v3650_v7, %v4510_v34  ;;  %v4713_v18 = vld [vmem:[#allocation11_spill] sm:$0xff] }
  0xf2   :  { %v1363_v35 = vmax.f32 %v1361_v16, 0.0  ;;  %v1028_v56 = vadd.f32 %v1026_v12, %v1018_v32  ;;  %v134_v51 = vmul.f32 %v4712_v8, %v3865_v28  ;;  %v112_v22 = vmul.f32 %v4713_v18, %v3860_v54  ;;  %v4714_v12 = vld [vmem:[#allocation14_spill] sm:$0xff] }
  0xf3   :  { %v1157_v45 = vadd.f32 %v1155_v49, %v1147_v42  ;;  %v1286_v38 = vadd.f32 %v1284_v43, %v1276_v36  ;;  %v1326_v7 = vmul.f32 %v3655_v14, %v4515_v62  ;;  %v147_v21 = vmul.f32 %v3878_v50, %v4714_v12  ;;  %v3902_v49 = vpop.permute.xlu1 %424  ;;  %v3909_v43 = vld [vmem:[%s4223_s0 + $0x8a] sm:$0x3f]  ;;  %v3914_v16 = vld [vmem:[%s4223_s0] sm:$0xff] }
  0xf4   :  { %1368 = vrot.lane.b32.xlu1 %v1363_v35, %s1959_s14  ;;  %v1038_v39 = vmul.f32 %v4620_v24, %v1028_v56  ;;  %v103_v24 = vld [vmem:[%s4223_s0 + $0xf] sm:$0x1]  ;;  %v124_v17 = vadd.f32 %v122_v52, %v112_v22  ;;  %v1336_v14 = vmul.f32 %v3674_v6, %v4520_v15  ;;  %v3919_v32 = vld [vmem:[%s4223_s0 + $0x2] sm:$0xff] }
  0xf5   :  { %v1168_v23 = vadd.f32 %v1166_v2, %v1157_v45  ;;  %v1297_v0 = vadd.f32 %v1295_v1, %v1286_v38  ;;  %1902 = vrcp.f32 %v103_v24  ;;  %v4715_v42 = vld [vmem:[#allocation15_spill] sm:$0xff]  ;;  %v121_v2 = vmul.f32 %v4711_v9, %v3898_v3  ;;  %v3937_v56 = vld [vmem:[%s4223_s0 + $0x80] sm:$0xff]  ;;  %v4716_v45 = vld [vmem:[#allocation16_spill] sm:$0xff]  ;;  %v3951_v9 = vpop.permute.xlu0 %426 }
  0xf6   :  { %v1040_v40 = vadd.f32 %v1038_v39, %v2915_v31  ;;  %v159_v6 = vmul.f32 %v3893_v26, %v4715_v42  ;;  %v136_v5 = vadd.f32 %v134_v51, %v124_v17  ;;  %v1346_v1 = vmul.f32 %v3684_v10, %v4522_v57  ;;  %v3932_v35 = vld [vmem:[%s4223_s0 + $0x108] sm:$0x3f] }
  0xf7   :  { %v1178_v19 = vadd.f32 %v1176_v4, %v1168_v23  ;;  %v1307_v59 = vadd.f32 %v1305_v27, %v1297_v0  ;;  %v171_v61 = vmul.f32 %v3909_v43, %v4716_v45  ;;  %v111_v10 = vmul.f32 %v4713_v18, %v3914_v16  ;;  %v3949_v39 = vld [vmem:[%s4223_s0 + $0x109] sm:$0x3f]  ;;  %v3956_v52 = vld [vmem:[%s4223_s0 + $0x81] sm:$0xff]  ;;  %v4717_v23 = vld [vmem:[#allocation17_spill] sm:$0xff]  ;;  %v3962_v24 = vpop.permute.xlu1 %746 }
  0xf8   :  { %v1042_v55 = vmax.f32 %v1040_v40, 0.0  ;;  %v149_v4 = vadd.f32 %v147_v21, %v136_v5  ;;  %v3967_v18 = vld [vmem:[%s4223_s0 + $0x10a] sm:$0x3f]  ;;  %v3972_v22 = vld [vmem:[%s4223_s0 + $0x82] sm:$0xff] }
  0xf9   :  { %v1188_v58 = vadd.f32 %v1186_v11, %v1178_v19  ;;  %v1317_v63 = vadd.f32 %v1315_v37, %v1307_v59  ;;  %v184_v11 = vmul.f32 %v3932_v35, %v4717_v23  ;;  %v146_v37 = vmul.f32 %v3937_v56, %v4714_v12  ;;  %v4718_v19 = vld [vmem:[#allocation18_spill] sm:$0xff]  ;;  %v3983_v17 = vld [vmem:[%s4223_s0 + $0x188] sm:$0x3f] }
  0xfa   :  { %1046 = vrot.lane.b32.xlu0 %v1042_v55, %s1957_s11  ;;  %v161_v0 = vadd.f32 %v159_v6, %v149_v4  ;;  %v123_v40 = vadd.f32 %v121_v2, %v111_v10  ;;  %v196_v59 = vmul.f32 %v3949_v39, %v4718_v19  ;;  %v158_v55 = vmul.f32 %v3956_v52, %v4715_v42  ;;  %v4720_v4 = vld [vmem:[#allocation21_spill] sm:$0xff]  ;;  %s1635_s11 = sld [smem:[#allocation8 + $0x1]] }
  0xfb   :  { %v1198_v36 = vmul.f32 %v3200_v53, %v1188_v58  ;;  %v1328_v25 = vadd.f32 %v1326_v7, %v1317_v63  ;;  %v133_v53 = vmul.f32 %v4712_v8, %v3919_v32  ;;  %v3988_v58 = vld [vmem:[%s4223_s0 + $0x100] sm:$0xff]  ;;  %v117_v63 = vmul.f32 %v2267_v30, %v3851_v13 }
  0xfc   :  { %v173_v7 = vadd.f32 %v171_v61, %v161_v0  ;;  %v170_v5 = vmul.f32 %v3972_v22, %v4716_v45  ;;  %v4010_v13 = vld [vmem:[%s4223_s0 + $0x101] sm:$0xff]  ;;  %v129_v61 = vmul.f32 %v2278_v44, %v3865_v28  ;;  %v109_v45 = vmul.f32 %v2264_v29, %v3860_v54  ;;  %v4032_v0 = vpop.permute.xlu1 %906 }
  0xfd   :  { %v1200_v38 = vadd.f32 %v1198_v36, %v2915_v31  ;;  %v1338_v27 = vadd.f32 %v1336_v14, %v1328_v25  ;;  %v135_v12 = vadd.f32 %v133_v53, %v123_v40  ;;  %v4719_v14 = vld [vmem:[#allocation20_spill] sm:$0xff]  ;;  %v4005_v25 = vld [vmem:[%s4223_s0 + $0x18a] sm:$0x3f]  ;;  %v221_v53 = vmul.f32 %v3983_v17, %v4720_v4 }
  0xfe   :  { %v208_v42 = vmul.f32 %v3967_v18, %v4719_v14  ;;  %v186_v6 = vadd.f32 %v184_v11, %v173_v7  ;;  %v4030_v11 = vld [vmem:[%s4223_s0 + $0x180] sm:$0xff]  ;;  %v4722_v7 = vld [vmem:[#allocation24_spill] sm:$0xff] }
  0xff   :  { %v1202_v8 = vmax.f32 %v1200_v38, 0.0  ;;  %v1348_v51 = vadd.f32 %v1346_v1, %v1338_v27  ;;  %v148_v2 = vadd.f32 %v146_v37, %v135_v12  ;;  %v4012_v1 = vpop.permute.xlu0 %586  ;;  %v183_v38 = vmul.f32 %v3988_v58, %v4717_v23  ;;  %v4025_v27 = vld [vmem:[%s4223_s0 + $0x102] sm:$0xff] }
 0x100   :  { %v198_v10 = vadd.f32 %v196_v59, %v186_v6  ;;  %v4721_v37 = vld [vmem:[#allocation22_spill] sm:$0xff]  ;;  %v245_v12 = vmul.f32 %v4005_v25, %v4722_v7 }
 0x101   :  { %1206 = vrot.lane.b32.xlu0 %v1202_v8, %s1958_s26  ;;  %v1358_v21 = vmul.f32 %v3411_v33, %v1348_v51  ;;  %v3997_v33 = vld [vmem:[%s4223_s0 + $0x189] sm:$0x3f]  ;;  %v160_v28 = vadd.f32 %v158_v55, %v148_v2  ;;  %v4039_v23 = vld [vmem:[%s4223_s0 + $0x181] sm:$0xff]  ;;  %v142_v8 = vmul.f32 %v3878_v50, %v2281_v46  ;;  %v119_v51 = vadd.f32 %v117_v63, %v109_v45 }
 0x102   :  { %v233_v40 = vmul.f32 %v3997_v33, %v4721_v37  ;;  %v1903_v59 = vpop.eup %1902  ;;  %v210_v55 = vadd.f32 %v208_v42, %v198_v10  ;;  %v4050_v6 = vld [vmem:[%s4223_s0 + $0x182] sm:$0xff]  ;;  %v207_v50 = vmul.f32 %v4025_v27, %v4719_v14  ;;  %v220_v63 = vmul.f32 %v4030_v11, %v4720_v4  ;;  %s1636_s0 = sld [smem:[#allocation8 + $0x2]] }
 0x103   :  { %v1360_v36 = vadd.f32 %v1358_v21, %v2915_v31  ;;  %v195_v21 = vmul.f32 %v4010_v13, %v4718_v19  ;;  %v172_v2 = vadd.f32 %v170_v5, %v160_v28  ;;  %v154_v42 = vmul.f32 %v3893_v26, %v4493_v60  ;;  %v4723_v28 = vld [vmem:[#allocation19_spill] sm:$0xff]  ;;  %v4068_v31 = vpop.permute.xlu0 %584 }
 0x104   :  { %v223_v45 = vadd.f32 %v221_v53, %v210_v55  ;;  %v232_v19 = vmul.f32 %v4039_v23, %v4721_v37  ;;  %v116_v5 = vmul.f32 %v2267_v30, %v3898_v3  ;;  %v244_v14 = vmul.f32 %v4050_v6, %v4722_v7 }
 0x105   :  { %v1362_v54 = vmax.f32 %v1360_v36, 0.0  ;;  %v131_v36 = vadd.f32 %v129_v61, %v119_v51  ;;  %v185_v10 = vadd.f32 %v183_v38, %v172_v2  ;;  %v166_v26 = vmul.f32 %v3909_v43, %v4496_v41  ;;  %v4072_v51 = vpop.permute.xlu1 %744 }
 0x106   :  { %v235_v4 = vadd.f32 %v233_v40, %v223_v45  ;;  %v128_v38 = vmul.f32 %v2278_v44, %v3919_v32  ;;  %v108_v30 = vmul.f32 %v2264_v29, %v3914_v16  ;;  %v179_v3 = vmul.f32 %v3932_v35, %v4503_v48  ;;  %v98_v16 = vld [vmem:[%s4228_s5 + $0x8] sm:$0xff] }
 0x107   :  { %1366 = vrot.lane.b32.xlu1 %v1362_v54, %s1959_s14  ;;  %v4064_v54 = vrot.slane %v1903_v59, %v4723_v28  ;;  %v144_v61 = vadd.f32 %v142_v8, %v131_v36  ;;  %v197_v53 = vadd.f32 %v195_v21, %v185_v10  ;;  %v141_v59 = vmul.f32 %v3937_v56, %v2281_v46  ;;  %v97_v46 = vld [vmem:[%s4228_s5] sm:$0xff] }
 0x108   :  { %v247_v7 = vadd.f32 %v245_v12, %v235_v4  ;;  %v118_v8 = vadd.f32 %v116_v5, %v108_v30  ;;  %v1960_v40 = vmov 0.0   ;;  %v191_v44 = vmul.f32 %v3949_v39, %v4507_v47  ;;  %v4101_v39 = vpop.permute.xlu0 %408 }
 0x109   :  { %v156_v37 = vadd.f32 %v154_v42, %v144_v61  ;;  %v209_v43 = vadd.f32 %v207_v50, %v197_v53  ;;  %1841 = vmatprep.subr.mxu0 %v1960_v40  ;;  %1858 = vmatprep.subr.mxu1 %v1960_v40  ;;  %v153_v29 = vmul.f32 %v3956_v52, %v4493_v60  ;;  %v1962_v21 = vmov 0  }
 0x10a   :  { %v264_v35 = vmul.f32 %v4064_v54, %v247_v7  ;;  %v130_v12 = vadd.f32 %v128_v38, %v118_v8  ;;  %1849 = vmatprep.mubr.msk.f32.mxu0 %vm1961_vm0, %v1960_v40  ;;  %1852 = vmatprep.mubr.msk.f32.mxu1 %vm1961_vm0, %v1960_v40  ;;  %v203_v60 = vmul.f32 %v3967_v18, %v4510_v34 }
 0x10b   :  { %v168_v32 = vadd.f32 %v166_v26, %v156_v37  ;;  %v222_v56 = vadd.f32 %v220_v63, %v209_v43  ;;  %v165_v55 = vmul.f32 %v3972_v22, %v4496_v41  ;;  %1887 = vset.pattern.permute.xlu1 %v1962_v21  ;;  %1886 = vset.pattern.permute.xlu0 %v1962_v21  ;;  %v4106_v63 = vpop.permute.xlu1 %568  ;;  %v99_v41 = vld [vmem:[%s4228_s5 + $0x10] sm:$0xf]  ;;  %v100_v22 = vld [vmem:[%s4229_s6] sm:$0xff] }
 0x10c   :  { %v267_v2 = vadd.f32 %v2251_v20, %v264_v35  ;;  %v143_v42 = vadd.f32 %v141_v59, %v130_v12  ;;  %1403 = vperm.xlu1 %1887, %v98_v16   ;;  %1398 = vperm.xlu0 %1886, %v97_v46   ;;  %v216_v18 = vmul.f32 %v3983_v17, %v4515_v62 }
 0x10d   :  { %v181_v52 = vadd.f32 %v179_v3, %v168_v32  ;;  %v234_v50 = vadd.f32 %v232_v19, %v222_v56  ;;  %v178_v10 = vmul.f32 %v3988_v58, %v4503_v48  ;;  %v228_v28 = vmul.f32 %v3997_v33, %v4520_v15  ;;  %v1067_v33 = vpop.permute.xlu0 %1066 }
 0x10e   :  { %v269_v45 = vmax.f32 %v267_v2, 0.0  ;;  %v155_v5 = vadd.f32 %v153_v29, %v143_v42  ;;  %v190_v61 = vmul.f32 %v4010_v13, %v4507_v47  ;;  %v240_v48 = vmul.f32 %v4005_v25, %v4522_v57  ;;  %v102_v47 = vld [vmem:[%s4229_s6 + $0x10] sm:$0xf] }
 0x10f   :  { %v193_v36 = vadd.f32 %v191_v44, %v181_v52  ;;  %v246_v19 = vadd.f32 %v244_v14, %v234_v50  ;;  %v101_v14 = vld [vmem:[%s4229_s6 + $0x8] sm:$0xff]  ;;  %v202_v25 = vmul.f32 %v4025_v27, %v4510_v34  ;;  %v239_v3 = vmul.f32 %v4050_v6, %v4522_v57  ;;  %v94_v50 = vld [vmem:[%s4227_s4] sm:$0xff] }
 0x110   :  { %271 = vst.msk [vmem:[#allocation2 + $0x16] sm:$0x3f] %vm261_vm1, %v269_v45  ;;  %v167_v4 = vadd.f32 %v165_v55, %v155_v5  ;;  %1408 = vperm.xlu1 %1887, %v99_v41   ;;  %1510 = vperm.xlu0 %1886, %v100_v22  }
 0x111   :  { %v205_v17 = vadd.f32 %v203_v60, %v193_v36  ;;  %v263_v26 = vmul.f32 %v4064_v54, %v246_v19  ;;  %431 = vst.msk [vmem:[#allocation2 + $0x16] sm:$0x3f] %vm414_vm2, %v3951_v9  ;;  %v1227_v9 = vpop.permute.xlu1 %1226 }
 0x112   :  { %591 = vst.msk [vmem:[#allocation2 + $0x16] sm:$0x3f] %vm574_vm3, %v4012_v1  ;;  %v180_v53 = vadd.f32 %v178_v10, %v167_v4 }
 0x113   :  { %v218_v58 = vadd.f32 %v216_v18, %v205_v17  ;;  %v266_v13 = vadd.f32 %v2251_v20, %v263_v26  ;;  %751 = vst.msk [vmem:[#allocation2 + $0x16] sm:$0x3f] %vm734_vm4, %v3962_v24  ;;  %v215_v20 = vmul.f32 %v4030_v11, %v4515_v62  ;;  %v227_v24 = vmul.f32 %v4039_v23, %v4520_v15  ;;  %v905_v11 = vpop.permute.xlu0 %904  ;;  %v4724_v15 = vld [vmem:[#allocation28_spill] sm:$0xff] }
 0x114   :  { %911 = vst.msk [vmem:[#allocation2 + $0x16] sm:$0x3f] %vm894_vm5, %v4032_v0  ;;  %v192_v1 = vadd.f32 %v190_v61, %v180_v53  ;;  %1515 = vperm.xlu1 %1887, %v101_v14   ;;  %1520 = vperm.xlu0 %1886, %v102_v47   ;;  %v96_v18 = vld [vmem:[%s4227_s4 + $0x10] sm:$0xf] }
 0x115   :  { %v230_v38 = vadd.f32 %v228_v28, %v218_v58  ;;  %v268_v30 = vmax.f32 %v266_v13, 0.0  ;;  %1071 = vst.msk [vmem:[#allocation2 + $0x16] sm:$0x3f] %vm1054_vm6, %v1067_v33 }
 0x116   :  { %1231 = vst.msk [vmem:[#allocation2 + $0x16] sm:$0x3f] %vm1214_vm8, %v1227_v9  ;;  %v204_v27 = vadd.f32 %v202_v25, %v192_v1 }
 0x117   :  { %v242_v34 = vadd.f32 %v240_v48, %v230_v38  ;;  %270 = vst.msk [vmem:[#allocation2 + $0xe] sm:$0xff] %vm259_vm7, %v268_v30 }
 0x118   :  { %430 = vst.msk [vmem:[#allocation2 + $0xe] sm:$0xff] %vm412_vm9, %v3902_v49  ;;  %v217_v37 = vadd.f32 %v215_v20, %v204_v27 }
 0x119   :  { %v253_v62 = vmul.f32 %v4064_v54, %v242_v34  ;;  %590 = vst.msk [vmem:[#allocation2 + $0xe] sm:$0xff] %vm572_vm10, %v4068_v31 }
 0x11a   :  { %v729_v0 = vpop.permute.xlu1 %728  ;;  %750 = vst.msk [vmem:[#allocation2 + $0xe] sm:$0xff] %vm732_vm11, %v4072_v51  ;;  %v229_v49 = vadd.f32 %v227_v24, %v217_v37 }
 0x11b   :  { %v256_v23 = vadd.f32 %v4724_v15, %v253_v62  ;;  %910 = vst.msk [vmem:[#allocation2 + $0xe] sm:$0xff] %vm892_vm12, %v905_v11 }
 0x11c   :  { %v241_v7 = vadd.f32 %v239_v3, %v229_v49 }
 0x11d   :  { %v258_v59 = vmax.f32 %v256_v23, 0.0  ;;  %v407_v6 = vpop.permute.xlu0 %406 }
 0x11e   :  { %v252_v31 = vmul.f32 %v4064_v54, %v241_v7 }
 0x11f   :  { %262 = vst.msk [vmem:[#allocation2 + $0x8] sm:$0x3f] %vm261_vm1, %v258_v59  ;;  %vm1212_vm1 = vcmask 113760  }
 0x120   :  { %415 = vst.msk [vmem:[#allocation2 + $0x8] sm:$0x3f] %vm414_vm2, %v4101_v39  ;;  %v255_v51 = vadd.f32 %v4724_v15, %v252_v31  ;;  %vm1372_vm2 = vcmask 130160   ;;  %v1571_v31 = vld [vmem:[%s4224_s1] sm:$0xff] }
 0x121   :  { %v1387_v57 = vpop.permute.xlu1 %1386  ;;  %575 = vst.msk [vmem:[#allocation2 + $0x8] sm:$0x3f] %vm574_vm3, %v4106_v63  ;;  %vm1411_vm3 = vcmask 228352   ;;  %v95_v63 = vld [vmem:[%s4227_s4 + $0x8] sm:$0xff]  ;;  %s1963_s4 = smov 124  }
 0x122   :  { %1391 = vst.msk [vmem:[#allocation2 + $0x16] sm:$0x3f] %vm1374_vm13, %v1387_v57  ;;  %v257_v43 = vmax.f32 %v255_v51, 0.0  ;;  %v1572_v57 = vstv %s91_s22  ;;  %v1575_v51 = vstv %s1635_s11 }
 0x123   :  { %735 = vst.msk [vmem:[#allocation2 + $0x8] sm:$0x3f] %vm734_vm4, %v729_v0  ;;  %vm1526_vm4 = vcmask 130048  }
 0x124   :  { %260 = vst.msk [vmem:[#allocation2] sm:$0xff] %vm259_vm7, %v257_v43 }
 0x125   :  { %413 = vst.msk [vmem:[#allocation2] sm:$0xff] %vm412_vm9, %v407_v6  ;;  %v1573_v6 = vmul.f32 %v1572_v57, %v1571_v31 }
 0x129   :  { %v1065_v8 = vpop.permute.xlu0 %1064  ;;  %v1395_v54 = vld [vmem:[#allocation2 + $0x18] sm:$0xf] }
 0x12a   :  { %1070 = vst.msk [vmem:[#allocation2 + $0xe] sm:$0xff] %vm1052_vm14, %v1065_v8  ;;  %1842 = vmatpush3.msk.msra.mxu0 %vm1421_vm15, %v1395_v54  ;;  %1862 = vmatpush3.msk.msra.mxu1 %vm1421_vm15, %v1395_v54 }
 0x12b   :  { %1843 = vmatprep.subr.mxu0 %v1960_v40  ;;  %1859 = vmatprep.subr.mxu1 %v1960_v40 }
 0x132   :  { %v889_v44 = vpop.permute.xlu1 %888 }
 0x133   :  { %895 = vst.msk [vmem:[#allocation2 + $0x8] sm:$0x3f] %vm894_vm5, %v889_v44  ;;  %vm1539_vm5 = vcmask 8192  }
 0x138   :  { %v567_v32 = vpop.permute.xlu0 %566 }
 0x139   :  { %573 = vst.msk [vmem:[#allocation2] sm:$0xff] %vm572_vm10, %v567_v32 }
 0x13f   :  { %v727_v29 = vpop.permute.xlu1 %726 }
 0x140   :  { %733 = vst.msk [vmem:[#allocation2] sm:$0xff] %vm732_vm11, %v727_v29 }
 0x145   :  { %v1225_v16 = vpop.permute.xlu0 %1224 }
 0x146   :  { %1230 = vst.msk [vmem:[#allocation2 + $0xe] sm:$0xff] %vm1212_vm1, %v1225_v16 }
 0x14c   :  { %v1385_v46 = vpop.permute.xlu1 %1384 }
 0x14d   :  { %1390 = vst.msk [vmem:[#allocation2 + $0xe] sm:$0xff] %vm1372_vm2, %v1385_v46 }
 0x152   :  { %v1049_v35 = vpop.permute.xlu0 %1048 }
 0x153   :  { %1055 = vst.msk [vmem:[#allocation2 + $0x8] sm:$0x3f] %vm1054_vm6, %v1049_v35 }
 0x154   :  { %v1394_v56 = vld [vmem:[#allocation2 + $0x10] sm:$0xff] }
 0x155   :  { %1844 = vmatpush3.msra.mxu0 %v1394_v56  ;;  %1863 = vmatpush3.msra.mxu1 %v1394_v56  ;;  %v1584_v56 = vstv %s1636_s0 }
 0x156   :  { %1845 = vmatprep.subr.mxu0 %v1960_v40  ;;  %1860 = vmatprep.subr.mxu1 %v1960_v40 }
 0x159   :  { %v1209_v12 = vpop.permute.xlu1 %1208 }
 0x15a   :  { %1215 = vst.msk [vmem:[#allocation2 + $0x8] sm:$0x3f] %vm1214_vm8, %v1209_v12 }
 0x15f   :  { %v887_v60 = vpop.permute.xlu0 %886 }
 0x160   :  { %893 = vst.msk [vmem:[#allocation2] sm:$0xff] %vm892_vm12, %v887_v60 }
 0x166   :  { %v1369_v39 = vpop.permute.xlu1 %1368 }
 0x167   :  { %1375 = vst.msk [vmem:[#allocation2 + $0x8] sm:$0x3f] %vm1374_vm13, %v1369_v39 }
 0x16c   :  { %v1047_v52 = vpop.permute.xlu0 %1046 }
 0x16d   :  { %1053 = vst.msk [vmem:[#allocation2] sm:$0xff] %vm1052_vm14, %v1047_v52 }
 0x16e   :  { %v1393_v55 = vld [vmem:[#allocation2 + $0x8] sm:$0xff] }
 0x16f   :  { %1846 = vmatpush3.msra.mxu0 %v1393_v55  ;;  %1864 = vmatpush3.msra.mxu1 %v1393_v55 }
 0x170   :  { %1847 = vmatprep.subr.mxu0 %v1960_v40  ;;  %1861 = vmatprep.subr.mxu1 %v1960_v40 }
 0x173   :  { %v1207_v21 = vpop.permute.xlu0 %1206 }
 0x174   :  { %1213 = vst.msk [vmem:[#allocation2] sm:$0xff] %vm1212_vm1, %v1207_v21 }
 0x179   :  { %v1367_v2 = vpop.permute.xlu1 %1366 }
 0x17a   :  { %1373 = vst.msk [vmem:[#allocation2] sm:$0xff] %vm1372_vm2, %v1367_v2 }
 0x181   :  { %v1392_v42 = vld [vmem:[#allocation2] sm:$0xff] }
 0x182   :  { %1848 = vmatpush3.msra.mxu0 %v1392_v42  ;;  %1865 = vmatpush3.msra.mxu1 %v1392_v42 }
 0x183   :  { %1850 = vmatmul.mubr.msk.f32.vlgmr.msra.gmra.mxu0 %vm1411_vm3, %v94_v50  ;;  %1853 = vmatmul.mubr.msk.f32.vlgmr.msra.gmra.mxu1 %vm1411_vm3, %v95_v63 }
 0x184   :  { %1855 = vmatprep.mubr.msk.f32.mxu1 %vm1961_vm0, %v1960_v40  ;;  %vm1530_vm0 = vcmask 125952  }
 0x187   :  { %1856 = vmatmul.mubr.msk.f32.gmra.mxu1 %vm1411_vm3, %v96_v18  ;;  %v1404_v36 = vpop.permute.xlu1 %1403  ;;  %v1399_v41 = vpop.permute.xlu0 %1398 }
 0x18b   :  { %v1409_v22 = vpop.permute.xlu1 %1408  ;;  %v1511_v10 = vpop.permute.xlu0 %1510 }
 0x18f   :  { %v1516_v48 = vpop.permute.xlu1 %1515  ;;  %v1521_v53 = vpop.permute.xlu0 %1520 }
 0x243   :  { %v1491_v45 = vpop.f32.mrf.mxu0  ;;  %v1496_v19 = vpop.f32.mrf.mxu1 }
 0x244   :  { %v1492_v5 = vadd.f32 %v1491_v45, %v1399_v41  ;;  %v1497_v28 = vadd.f32 %v1496_v19, %v1404_v36 }
 0x245   :  { %v1851_v17 = vpop.f32.mrf.mxu0  ;;  %v1854_v26 = vpop.f32.mrf.mxu1 }
 0x246   :  { %v1505_v61 = vmax.f32 %v1492_v5, 0.0  ;;  %v1506_v4 = vmax.f32 %v1497_v28, 0.0 }
 0x247   :  { %v1501_v40 = vpop.f32.mrf.mxu1 }
 0x248   :  { %v1523_v58 = vmul.f32 %v1511_v10, %v1505_v61  ;;  %v1524_v33 = vmul.f32 %v1516_v48, %v1506_v4  ;;  %v1502_v14 = vadd.f32 %v1501_v40, %v1409_v22 }
 0x249   :  { %v1857_v47 = vpop.f32.mrf.mxu1 }
 0x24a   :  { %v1527_v13 = vsel %vm1526_vm4, %v1523_v58, 0.0  ;;  %v1528_v9 = vsel %vm1526_vm4, %v1524_v33, 0.0  ;;  %v1507_v25 = vmax.f32 %v1502_v14, 0.0 }
 0x24b   :  { %v1529_v30 = vadd.f32 %v1528_v9, %v1527_v13 }
 0x24c   :  { %v1525_v38 = vmul.f32 %v1521_v53, %v1507_v25 }
 0x24e   :  { %v1531_v20 = vsel %vm1530_vm0, %v1525_v38, 0.0 }
 0x24f   :  { %v1532_v1 = vadd.f32 %v1531_v20, %v1529_v30 }
 0x251   :  { %v1533_v34 = vrot.slane %v1532_v1, 4 }
 0x253   :  { %v1534_v24 = vadd.f32 %v1533_v34, %v1532_v1 }
 0x255   :  { %v1535_v27 = vrot.slane %v1534_v24, 2 }
 0x257   :  { %v1536_v62 = vadd.f32 %v1535_v27, %v1534_v24 }
 0x259   :  { %v1537_v11 = vrot.slane %v1536_v62, 1 }
 0x25b   :  { %v1538_v0 = vadd.f32 %v1537_v11, %v1536_v62 }
 0x25d   :  { %1546 = vrot.lane.b32.xlu0 %v1538_v0, %s1963_s4  ;;  %1542 = vrot.lane.b32.xlu1 %v1538_v0, %s1964_s12  ;;  %1540 = vst.msk [vmem:[#allocation3] sm:$0x1] %vm1539_vm5, %v1538_v0 }
 0x261   :  { %1554 = vrot.lane.b32.xlu0 %v1538_v0, %s1965_s29  ;;  %1550 = vrot.lane.b32.xlu1 %v1538_v0, %s1966_s15 }
 0x265   :  { %1562 = vrot.lane.b32.xlu0 %v1538_v0, %s1967_s18  ;;  %1558 = vrot.lane.b32.xlu1 %v1538_v0, %s1968_s10 }
 0x269   :  { %1566 = vrot.lane.b32.xlu1 %v1538_v0, %s1969_s19 }
 0x2cf   :  { %v1547_v3 = vpop.permute.xlu0 %1546  ;;  %v1543_v37 = vpop.permute.xlu1 %1542 }
 0x2d0   :  { %1549 = vst.msk [vmem:[#allocation3 + $0x2] sm:$0x1] %vm1539_vm5, %v1547_v3  ;;  %1545 = vst.msk [vmem:[#allocation3 + $0x1] sm:$0x1] %vm1539_vm5, %v1543_v37 }
 0x2d3   :  { %v1555_v15 = vpop.permute.xlu0 %1554  ;;  %v1551_v23 = vpop.permute.xlu1 %1550 }
 0x2d4   :  { %1557 = vst.msk [vmem:[#allocation3 + $0x4] sm:$0x1] %vm1539_vm5, %v1555_v15  ;;  %1553 = vst.msk [vmem:[#allocation3 + $0x3] sm:$0x1] %vm1539_vm5, %v1551_v23 }
 0x2d7   :  { %v1563_v49 = vpop.permute.xlu0 %1562  ;;  %v1559_v59 = vpop.permute.xlu1 %1558 }
 0x2d8   :  { %1565 = vst.msk [vmem:[#allocation3 + $0x6] sm:$0x1] %vm1539_vm5, %v1563_v49  ;;  %1561 = vst.msk [vmem:[#allocation3 + $0x5] sm:$0x1] %vm1539_vm5, %v1559_v59 }
 0x2db   :  { %v1567_v7 = vpop.permute.xlu1 %1566 }
 0x2dc   :  { %1569 = vst.msk [vmem:[#allocation3 + $0x7] sm:$0x1] %vm1539_vm5, %v1567_v7 }
 0x2e3   :  { %v1570_v43 = vld [vmem:[#allocation3] sm:$0xff] }
 0x2e4   :  { %v1574_v8 = vadd.f32 %v1573_v6, %v1570_v43 }
 0x2e6   :  { %v1576_v54 = vadd.f32 %v1575_v51, %v1574_v8 }
 0x2e8   :  { %v1577_v44 = vsel %vm259_vm7, %v1576_v54, -inf }
 0x2e9   :  { %v1578_v32 = vrot.slane %v1577_v44, 4 }
 0x2eb   :  { %v1579_v29 = vmax.f32 %v1577_v44, %v1578_v32 }
 0x2ed   :  { %v1580_v16 = vrot.slane %v1579_v29, 2 }
 0x2ef   :  { %v1581_v46 = vmax.f32 %v1579_v29, %v1580_v16 }
 0x2f1   :  { %v1582_v35 = vrot.slane %v1581_v46, 1 }
 0x2f3   :  { %v1583_v12 = vmax.f32 %v1581_v46, %v1582_v35 }
 0x2f5   :  { %v1585_v60 = vmax.f32 %v1583_v12, %v1584_v56 }
 0x2f7   :  { %v1586_v39 = vsub.f32 %v1576_v54, %v1585_v60  ;;  %v1589_v55 = vsub.f32 %v1584_v56, %v1585_v60 }
 0x2f9   :  { %v1587_v52 = vmul.f32 1.442695, %v1586_v39  ;;  %v1590_v21 = vmul.f32 1.442695, %v1589_v55 }
 0x2fb   :  { %1904 = vpow2.f32 %v1587_v52 }
 0x2fc   :  { %1906 = vpow2.f32 %v1590_v21 }
 0x308   :  { %v1905_v2 = vpop.eup %1904 }
 0x309   :  { %v1592_v50 = vsel %vm259_vm7, %v1905_v2, 0.0  ;;  %v1907_v45 = vpop.eup %1906 }
 0x30a   :  { %v1593_v63 = vrot.slane %v1592_v50, 4 }
 0x30c   :  { %v1594_v42 = vadd.f32 %v1593_v63, %v1592_v50 }
 0x30e   :  { %v1595_v18 = vrot.slane %v1594_v42, 2 }
 0x310   :  { %v1596_v36 = vadd.f32 %v1595_v18, %v1594_v42 }
 0x312   :  { %v1597_v41 = vrot.slane %v1596_v36, 1 }
 0x314   :  { %v1598_v22 = vadd.f32 %v1597_v41, %v1596_v36 }
 0x316   :  { %v1599_v19 = vadd.f32 %v1907_v45, %v1598_v22 }
 0x318   :  { %1908 = vrcp.f32 %v1599_v19 }
 0x325   :  { %v1909_v10 = vpop.eup %1908 }
 0x326   :  { %v1601_v5 = vmul.f32 %v1909_v10, %v1907_v45  ;;  %v1603_v28 = vmul.f32 %v1909_v10, %v1905_v2 }
 0x328   :  { %1602 = vst.msk [vmem:[%s4231_s8] sm:$0x1] %vm1539_vm5, %v1601_v5 }
 0x329   :  { %1604 = vst.msk [vmem:[%s4231_s8 + $0x1] sm:$0xff] %vm259_vm7, %v1603_v28 }
 0x32a   :  { %1609 = vsyncpa [#allocation5], 1 }
 0x32b   :  { %1610 = vsyncpa [#allocation7], 1 }

</bundles_post_ra>
